<compile_context>
chip_gen: v7x
topology: tpu7x:2x2x1
jax: 0.10.0
libtpu: 0.0.40
codegen_flags: <defaults>
</compile_context>

<pallas_src>
import math
from functools import partial

import jax
import jax.numpy as jnp
from jax.experimental import pallas as pl
from jax.experimental.pallas import tpu as pltpu


_FEAT_PAD = 128      # input_dim (80) zero-padded to a full lane tile
_OUT_PAD = 128       # num_classes (8) zero-padded to a full lane tile
_BN_EPS = 1e-5
_HID = 512


# ---------------------------------------------------------------------------
# Fused kernel: tdnn1..tdnn4 -> stat pooling -> folded (segment6@7@output) tail
# ---------------------------------------------------------------------------

def _xvector_kernel(
    t_valid,                                # static: valid rows at tdnn4 output
    x_ref,                                  # (T_pad, 128) bf16  (last batch element)
    w1_ref, b1_ref, g1_ref, s1_ref,         # tdnn1: W (5*128, 512) bf16; b/scale/shift (1,512) f32
    w2_ref, b2_ref, g2_ref, s2_ref,         # tdnn2: W (3*512, 512)
    w3_ref, b3_ref, g3_ref, s3_ref,         # tdnn3: W (2*512, 512)
    w4_ref, b4_ref, g4_ref, s4_ref,         # tdnn4: W (1*512, 512)
    wt_ref, bt_ref,                         # folded tail: (1024, 128) bf16, (1, 128) f32
    o_ref,                                  # (1, 128) f32
):
    rows = x_ref.shape[0]
    hid = w4_ref.shape[1]                   # 512

    def tdnn(x_bf16, w_ref, b_ref, g_ref, s_ref, context, dilation):
        """Linear(unfold(x)) -> ReLU -> (Dropout=id at eval) -> eval BatchNorm.

        Each tap hits the MXU (bf16 x bf16 -> f32) with the SAME full,
        sublane-aligned LHS block against its 128-aligned weight row block;
        the time shift is applied to the tap output via pltpu.roll (XLU), so
        no unaligned row slices/copies are generated.  Rows >= the layer's
        valid time extent hold wraparound garbage that later layers never
        read when producing their own valid rows.
        """
        feat = x_bf16.shape[1]
        acc = jnp.dot(x_bf16, w_ref[pl.ds(0, feat), :],
                      preferred_element_type=jnp.float32)
        for c in range(1, context):          # static unroll, context <= 5
            part = jnp.dot(x_bf16, w_ref[pl.ds(c * feat, feat), :],
                           preferred_element_type=jnp.float32)
            # jnp.roll semantics: result[t] = part[t + c*dilation] for valid t.
            acc = acc + pltpu.roll(part, shift=rows - c * dilation, axis=0)
        return jnp.maximum(acc + b_ref[...], 0.0) * g_ref[...] + s_ref[...]

    x0 = x_ref[...]                                               # bf16 (cast once, in wrapper)
    y1 = jnp.maximum(tdnn(x0, w1_ref, b1_ref, g1_ref, s1_ref, 5, 1), 0.0)   # outer F.relu
    y1 = y1.astype(jnp.bfloat16)                                  # one cast per layer
    y2 = tdnn(y1, w2_ref, b2_ref, g2_ref, s2_ref, 3, 1).astype(jnp.bfloat16)
    y3 = tdnn(y2, w3_ref, b3_ref, g3_ref, s3_ref, 2, 2).astype(jnp.bfloat16)
    y4 = tdnn(y3, w4_ref, b4_ref, g4_ref, s4_ref, 1, 1)           # f32 for the pooling

    # Statistics pooling over the valid rows: mean + unbiased variance over
    # time (torch.var default ddof=1).
    y4v = y4[:t_valid, :]
    mean = jnp.sum(y4v, axis=0, keepdims=True) * (1.0 / t_valid)
    diff = y4v - mean
    var = jnp.sum(diff * diff, axis=0, keepdims=True) * (1.0 / (t_valid - 1))

    # Folded linear tail (W6 @ W7 @ Wo composed offline); consumed as its
    # mean-half / var-half row blocks so no lane-dim concat is needed.
    o_ref[...] = (
        jnp.dot(mean.astype(jnp.bfloat16), wt_ref[pl.ds(0, hid), :],
                preferred_element_type=jnp.float32)
        + jnp.dot(var.astype(jnp.bfloat16), wt_ref[pl.ds(hid, hid), :],
                  preferred_element_type=jnp.float32)
        + bt_ref[...])


# ---------------------------------------------------------------------------
# Jitted wrapper
# ---------------------------------------------------------------------------

@partial(jax.jit, static_argnames=("num_classes",))
def x_vector_forward(x, params, num_classes=8):
    """x: (B, T, input_dim) f32 -> predictions (1, num_classes) (eval mode)."""
    B, T, D = x.shape
    if D > _FEAT_PAD:
        raise ValueError("input_dim must be <= 128")
    t4 = T - 8                       # time extent after tdnn1..tdnn4 contexts/dilations
    if t4 < 2:
        raise ValueError("need T >= 10 so the unbiased variance is defined")

    # X_vector.forward returns segment6_out[-1] -> segment7 -> output, and
    # eval-mode BN/dropout are per-sample, so predictions depend only on the
    # LAST batch element: slice it here so (B-1)/B of the input bytes are
    # never DMA'd.  Zero-pad features to a full lane tile and time to a
    # sublane multiple, then cast to bf16 once (halves input HBM->VMEM bytes).
    t_pad = ((T + 15) // 16) * 16
    x_last = x[B - 1].astype(jnp.float32)
    x_pad = jnp.pad(x_last, ((0, t_pad - T), (0, _FEAT_PAD - D))).astype(jnp.bfloat16)

    flat = (x_pad,
            *params["tdnn1"], *params["tdnn2"], *params["tdnn3"], *params["tdnn4"],
            *params["tail"])
    vmem = pl.BlockSpec(memory_space=pltpu.MemorySpace.VMEM)
    out = pl.pallas_call(
        partial(_xvector_kernel, t4),
        out_shape=jax.ShapeDtypeStruct((1, _OUT_PAD), jnp.float32),
        in_specs=[vmem] * len(flat),
        out_specs=vmem,
    )(*flat)
    return out[:, :num_classes]


# ---------------------------------------------------------------------------
# Parameters.  `init_raw_params` mirrors the PyTorch module (nn.Linear default
# U(-1/sqrt(fan_in)) init; untrained eval-mode BatchNorm1d); `pack_params`
# converts them OFFLINE into kernel layout (bf16, padded, linear tail folded).
# ---------------------------------------------------------------------------

def _linear_init(key, fan_in, fan_out):
    k1, k2 = jax.random.split(key)
    bound = 1.0 / math.sqrt(fan_in)
    w = jax.random.uniform(k1, (fan_in, fan_out), jnp.float32, -bound, bound)
    b = jax.random.uniform(k2, (fan_out,), jnp.float32, -bound, bound)
    return w, b


def init_raw_params(key, input_dim=80, num_classes=8):
    keys = jax.random.split(key, 8)

    def tdnn_params(k, in_dim, out_dim, context):
        w, b = _linear_init(k, in_dim * context, out_dim)
        # Untrained eval-mode BatchNorm1d: gamma=1, beta=0, running stats (0, 1).
        # Kept as a generic post-ReLU affine so negative gammas would also work.
        scale = jnp.full((out_dim,), 1.0 / math.sqrt(1.0 + _BN_EPS), jnp.float32)
        shift = jnp.zeros((out_dim,), jnp.float32)
        return (w, b, scale, shift)

    return {
        "tdnn1": tdnn_params(keys[0], input_dim, _HID, 5),
        "tdnn2": tdnn_params(keys[1], _HID, _HID, 3),
        "tdnn3": tdnn_params(keys[2], _HID, _HID, 2),
        "tdnn4": tdnn_params(keys[3], _HID, _HID, 1),
        # keys[4] (tdnn5): its output is never consumed in X_vector.forward.
        "segment6": _linear_init(keys[5], 2 * _HID, _HID),
        "segment7": _linear_init(keys[6], _HID, _HID),
        "output": _linear_init(keys[7], _HID, num_classes),
    }


def pack_params(raw, input_dim=80, num_classes=8):
    def pack_tdnn(p, in_dim, context, pad_in_to=None):
        w, b, scale, shift = p
        if pad_in_to is not None and pad_in_to != in_dim:
            out_dim = w.shape[1]
            w = w.reshape(context, in_dim, out_dim)
            w = jnp.pad(w, ((0, 0), (0, pad_in_to - in_dim), (0, 0)))
            w = w.reshape(context * pad_in_to, out_dim)
        return (w.astype(jnp.bfloat16), b[None, :], scale[None, :], shift[None, :])

    # Fold the purely-linear tail (segment6 -> segment7 -> output; no
    # activation between them in the reference forward) into one matrix.
    w6, b6 = raw["segment6"]
    w7, b7 = raw["segment7"]
    wo, bo = raw["output"]
    w_tail = w6 @ w7 @ wo                            # (1024, num_classes) f32
    b_tail = (b6 @ w7 + b7) @ wo + bo                # (num_classes,) f32
    w_tail = jnp.pad(w_tail, ((0, 0), (0, _OUT_PAD - num_classes)))
    b_tail = jnp.pad(b_tail, (0, _OUT_PAD - num_classes))

    return {
        "tdnn1": pack_tdnn(raw["tdnn1"], input_dim, 5, pad_in_to=_FEAT_PAD),
        "tdnn2": pack_tdnn(raw["tdnn2"], _HID, 3),
        "tdnn3": pack_tdnn(raw["tdnn3"], _HID, 2),
        "tdnn4": pack_tdnn(raw["tdnn4"], _HID, 1),
        "tail": (w_tail.astype(jnp.bfloat16), b_tail[None, :]),
    }


# ---------------------------------------------------------------------------
# Pure-JAX f32 reference of X_vector.forward (eval mode) for validation.
# ---------------------------------------------------------------------------

def ref_forward(x, raw):
    def tdnn(h, p, context, dilation):
        w, b, scale, shift = p
        t_out = h.shape[0] - (context - 1) * dilation
        # F.unfold ordering: [x[t], x[t+d], ...] concatenated along features.
        u = jnp.concatenate(
            [h[c * dilation: c * dilation + t_out] for c in range(context)], axis=1)
        return jnp.maximum(u @ w + b, 0.0) * scale + shift

    def per_sample(h):
        h = jnp.maximum(tdnn(h, raw["tdnn1"], 5, 1), 0.0)
        h = tdnn(h, raw["tdnn2"], 3, 1)
        h = tdnn(h, raw["tdnn3"], 2, 2)
        h = tdnn(h, raw["tdnn4"], 1, 1)
        mean = jnp.mean(h, axis=0)
        var = jnp.var(h, axis=0, ddof=1)             # torch.var default: unbiased
        stat = jnp.concatenate([mean, var])
        w6, b6 = raw["segment6"]
        return stat @ w6 + b6

    seg6 = jax.vmap(per_sample)(x)                   # segment6 over the full batch
    w7, b7 = raw["segment7"]
    wo, bo = raw["output"]
    xvec = seg6[-1][None, :] @ w7 + b7               # segment6_out[-1]
    return xvec @ wo + bo


if __name__ == "__main__":
    key = jax.random.PRNGKey(0)
    pkey, xkey = jax.random.split(key)
    raw = init_raw_params(pkey, input_dim=80, num_classes=8)
    params = pack_params(raw, input_dim=80, num_classes=8)

    # Small input consistent with the module: batch=2, time=20, features=80.
    x = jax.random.normal(xkey, (2, 20, 80), jnp.float32)

    preds = x_vector_forward(x, params, num_classes=8)
    preds = jax.block_until_ready(preds)
    assert preds.shape == (1, 8), preds.shape

    # Validate against the pure-JAX f32 reference (kernel uses bf16 matmuls).
    ref = jax.block_until_ready(ref_forward(x, raw))
    max_err = float(jnp.max(jnp.abs(preds - ref)))
    assert jnp.allclose(preds, ref, rtol=3e-2, atol=3e-3), f"max|err|={max_err}"
    print("KERNEL_OK")
</pallas_src>

<mosaic_0001>
module attributes {stable_mosaic.version = 11 : i64} {
  func.func @_xvector_kernel(%arg0: memref<32x128xbf16, #tpu.memory_space<vmem>>, %arg1: memref<640x512xbf16, #tpu.memory_space<vmem>>, %arg2: memref<1x512xf32, #tpu.memory_space<vmem>>, %arg3: memref<1x512xf32, #tpu.memory_space<vmem>>, %arg4: memref<1x512xf32, #tpu.memory_space<vmem>>, %arg5: memref<1536x512xbf16, #tpu.memory_space<vmem>>, %arg6: memref<1x512xf32, #tpu.memory_space<vmem>>, %arg7: memref<1x512xf32, #tpu.memory_space<vmem>>, %arg8: memref<1x512xf32, #tpu.memory_space<vmem>>, %arg9: memref<1024x512xbf16, #tpu.memory_space<vmem>>, %arg10: memref<1x512xf32, #tpu.memory_space<vmem>>, %arg11: memref<1x512xf32, #tpu.memory_space<vmem>>, %arg12: memref<1x512xf32, #tpu.memory_space<vmem>>, %arg13: memref<512x512xbf16, #tpu.memory_space<vmem>>, %arg14: memref<1x512xf32, #tpu.memory_space<vmem>>, %arg15: memref<1x512xf32, #tpu.memory_space<vmem>>, %arg16: memref<1x512xf32, #tpu.memory_space<vmem>>, %arg17: memref<1024x128xbf16, #tpu.memory_space<vmem>>, %arg18: memref<1x128xf32, #tpu.memory_space<vmem>>, %arg19: memref<1x128xf32, #tpu.memory_space<vmem>>) attributes {dimension_semantics = [], scalar_prefetch = 0 : i64, scratch_operands = 0 : i64, tpu.core_type = #tpu.core_type<tc>} {
    %c0 = arith.constant 0 : index
    %c0_0 = arith.constant 0 : index
    %0 = vector.load %arg0[%c0, %c0_0] : memref<32x128xbf16, #tpu.memory_space<vmem>>, vector<32x128xbf16>
    %c0_1 = arith.constant 0 : index
    %c0_2 = arith.constant 0 : index
    %1 = vector.load %arg1[%c0_1, %c0_2] : memref<640x512xbf16, #tpu.memory_space<vmem>>, vector<128x512xbf16>
    %cst = arith.constant dense<0.000000e+00> : vector<32x512xf32>
    %2 = tpu.matmul %0, %1, %cst {dimension_numbers = #tpu.dot_dimension_numbers<[1], [0], [0], [1], [0, 0, 1, 1], [], []>} : vector<32x128xbf16>, vector<128x512xbf16>, vector<32x512xf32> -> vector<32x512xf32>
    %c128 = arith.constant 128 : index
    %c0_3 = arith.constant 0 : index
    %3 = vector.load %arg1[%c128, %c0_3] : memref<640x512xbf16, #tpu.memory_space<vmem>>, vector<128x512xbf16>
    %cst_4 = arith.constant dense<0.000000e+00> : vector<32x512xf32>
    %4 = tpu.matmul %0, %3, %cst_4 {dimension_numbers = #tpu.dot_dimension_numbers<[1], [0], [0], [1], [0, 0, 1, 1], [], []>} : vector<32x128xbf16>, vector<128x512xbf16>, vector<32x512xf32> -> vector<32x512xf32>
    %c31_i32 = arith.constant 31 : i32
    %5 = tpu.dynamic_rotate %4 by %c31_i32 dim 0 : vector<32x512xf32>, i32 -> vector<32x512xf32>
    %6 = arith.addf %2, %5 : vector<32x512xf32>
    %c256 = arith.constant 256 : index
    %c0_5 = arith.constant 0 : index
    %7 = vector.load %arg1[%c256, %c0_5] : memref<640x512xbf16, #tpu.memory_space<vmem>>, vector<128x512xbf16>
    %cst_6 = arith.constant dense<0.000000e+00> : vector<32x512xf32>
    %8 = tpu.matmul %0, %7, %cst_6 {dimension_numbers = #tpu.dot_dimension_numbers<[1], [0], [0], [1], [0, 0, 1, 1], [], []>} : vector<32x128xbf16>, vector<128x512xbf16>, vector<32x512xf32> -> vector<32x512xf32>
    %c30_i32 = arith.constant 30 : i32
    %9 = tpu.dynamic_rotate %8 by %c30_i32 dim 0 : vector<32x512xf32>, i32 -> vector<32x512xf32>
    %10 = arith.addf %6, %9 : vector<32x512xf32>
    %c384 = arith.constant 384 : index
    %c0_7 = arith.constant 0 : index
    %11 = vector.load %arg1[%c384, %c0_7] : memref<640x512xbf16, #tpu.memory_space<vmem>>, vector<128x512xbf16>
    %cst_8 = arith.constant dense<0.000000e+00> : vector<32x512xf32>
    %12 = tpu.matmul %0, %11, %cst_8 {dimension_numbers = #tpu.dot_dimension_numbers<[1], [0], [0], [1], [0, 0, 1, 1], [], []>} : vector<32x128xbf16>, vector<128x512xbf16>, vector<32x512xf32> -> vector<32x512xf32>
    %c29_i32 = arith.constant 29 : i32
    %13 = tpu.dynamic_rotate %12 by %c29_i32 dim 0 : vector<32x512xf32>, i32 -> vector<32x512xf32>
    %14 = arith.addf %10, %13 : vector<32x512xf32>
    %c512 = arith.constant 512 : index
    %c0_9 = arith.constant 0 : index
    %15 = vector.load %arg1[%c512, %c0_9] : memref<640x512xbf16, #tpu.memory_space<vmem>>, vector<128x512xbf16>
    %cst_10 = arith.constant dense<0.000000e+00> : vector<32x512xf32>
    %16 = tpu.matmul %0, %15, %cst_10 {dimension_numbers = #tpu.dot_dimension_numbers<[1], [0], [0], [1], [0, 0, 1, 1], [], []>} : vector<32x128xbf16>, vector<128x512xbf16>, vector<32x512xf32> -> vector<32x512xf32>
    %c28_i32 = arith.constant 28 : i32
    %17 = tpu.dynamic_rotate %16 by %c28_i32 dim 0 : vector<32x512xf32>, i32 -> vector<32x512xf32>
    %18 = arith.addf %14, %17 : vector<32x512xf32>
    %c0_11 = arith.constant 0 : index
    %c0_12 = arith.constant 0 : index
    %19 = vector.load %arg2[%c0_11, %c0_12] : memref<1x512xf32, #tpu.memory_space<vmem>>, vector<1x512xf32>
    %20 = vector.broadcast %19 : vector<1x512xf32> to vector<32x512xf32>
    %21 = arith.addf %18, %20 : vector<32x512xf32>
    %cst_13 = arith.constant 0.000000e+00 : f32
    %22 = vector.broadcast %cst_13 : f32 to vector<32x512xf32>
    %23 = arith.maximumf %21, %22 : vector<32x512xf32>
    %c0_14 = arith.constant 0 : index
    %c0_15 = arith.constant 0 : index
    %24 = vector.load %arg3[%c0_14, %c0_15] : memref<1x512xf32, #tpu.memory_space<vmem>>, vector<1x512xf32>
    %25 = vector.broadcast %24 : vector<1x512xf32> to vector<32x512xf32>
    %26 = arith.mulf %23, %25 : vector<32x512xf32>
    %c0_16 = arith.constant 0 : index
    %c0_17 = arith.constant 0 : index
    %27 = vector.load %arg4[%c0_16, %c0_17] : memref<1x512xf32, #tpu.memory_space<vmem>>, vector<1x512xf32>
    %28 = vector.broadcast %27 : vector<1x512xf32> to vector<32x512xf32>
    %29 = arith.addf %26, %28 : vector<32x512xf32>
    %cst_18 = arith.constant 0.000000e+00 : f32
    %30 = vector.broadcast %cst_18 : f32 to vector<32x512xf32>
    %31 = arith.maximumf %29, %30 : vector<32x512xf32>
    %32 = arith.truncf %31 : vector<32x512xf32> to vector<32x512xbf16>
    %c0_19 = arith.constant 0 : index
    %c0_20 = arith.constant 0 : index
    %33 = vector.load %arg5[%c0_19, %c0_20] : memref<1536x512xbf16, #tpu.memory_space<vmem>>, vector<512x512xbf16>
    %cst_21 = arith.constant dense<0.000000e+00> : vector<32x512xf32>
    %34 = tpu.matmul %32, %33, %cst_21 {dimension_numbers = #tpu.dot_dimension_numbers<[1], [0], [0], [1], [0, 0, 1, 1], [], []>} : vector<32x512xbf16>, vector<512x512xbf16>, vector<32x512xf32> -> vector<32x512xf32>
    %c512_22 = arith.constant 512 : index
    %c0_23 = arith.constant 0 : index
    %35 = vector.load %arg5[%c512_22, %c0_23] : memref<1536x512xbf16, #tpu.memory_space<vmem>>, vector<512x512xbf16>
    %cst_24 = arith.constant dense<0.000000e+00> : vector<32x512xf32>
    %36 = tpu.matmul %32, %35, %cst_24 {dimension_numbers = #tpu.dot_dimension_numbers<[1], [0], [0], [1], [0, 0, 1, 1], [], []>} : vector<32x512xbf16>, vector<512x512xbf16>, vector<32x512xf32> -> vector<32x512xf32>
    %c31_i32_25 = arith.constant 31 : i32
    %37 = tpu.dynamic_rotate %36 by %c31_i32_25 dim 0 : vector<32x512xf32>, i32 -> vector<32x512xf32>
    %38 = arith.addf %34, %37 : vector<32x512xf32>
    %c1024 = arith.constant 1024 : index
    %c0_26 = arith.constant 0 : index
    %39 = vector.load %arg5[%c1024, %c0_26] : memref<1536x512xbf16, #tpu.memory_space<vmem>>, vector<512x512xbf16>
    %cst_27 = arith.constant dense<0.000000e+00> : vector<32x512xf32>
    %40 = tpu.matmul %32, %39, %cst_27 {dimension_numbers = #tpu.dot_dimension_numbers<[1], [0], [0], [1], [0, 0, 1, 1], [], []>} : vector<32x512xbf16>, vector<512x512xbf16>, vector<32x512xf32> -> vector<32x512xf32>
    %c30_i32_28 = arith.constant 30 : i32
    %41 = tpu.dynamic_rotate %40 by %c30_i32_28 dim 0 : vector<32x512xf32>, i32 -> vector<32x512xf32>
    %42 = arith.addf %38, %41 : vector<32x512xf32>
    %c0_29 = arith.constant 0 : index
    %c0_30 = arith.constant 0 : index
    %43 = vector.load %arg6[%c0_29, %c0_30] : memref<1x512xf32, #tpu.memory_space<vmem>>, vector<1x512xf32>
    %44 = vector.broadcast %43 : vector<1x512xf32> to vector<32x512xf32>
    %45 = arith.addf %42, %44 : vector<32x512xf32>
    %cst_31 = arith.constant 0.000000e+00 : f32
    %46 = vector.broadcast %cst_31 : f32 to vector<32x512xf32>
    %47 = arith.maximumf %45, %46 : vector<32x512xf32>
    %c0_32 = arith.constant 0 : index
    %c0_33 = arith.constant 0 : index
    %48 = vector.load %arg7[%c0_32, %c0_33] : memref<1x512xf32, #tpu.memory_space<vmem>>, vector<1x512xf32>
    %49 = vector.broadcast %48 : vector<1x512xf32> to vector<32x512xf32>
    %50 = arith.mulf %47, %49 : vector<32x512xf32>
    %c0_34 = arith.constant 0 : index
    %c0_35 = arith.constant 0 : index
    %51 = vector.load %arg8[%c0_34, %c0_35] : memref<1x512xf32, #tpu.memory_space<vmem>>, vector<1x512xf32>
    %52 = vector.broadcast %51 : vector<1x512xf32> to vector<32x512xf32>
    %53 = arith.addf %50, %52 : vector<32x512xf32>
    %54 = arith.truncf %53 : vector<32x512xf32> to vector<32x512xbf16>
    %c0_36 = arith.constant 0 : index
    %c0_37 = arith.constant 0 : index
    %55 = vector.load %arg9[%c0_36, %c0_37] : memref<1024x512xbf16, #tpu.memory_space<vmem>>, vector<512x512xbf16>
    %cst_38 = arith.constant dense<0.000000e+00> : vector<32x512xf32>
    %56 = tpu.matmul %54, %55, %cst_38 {dimension_numbers = #tpu.dot_dimension_numbers<[1], [0], [0], [1], [0, 0, 1, 1], [], []>} : vector<32x512xbf16>, vector<512x512xbf16>, vector<32x512xf32> -> vector<32x512xf32>
    %c512_39 = arith.constant 512 : index
    %c0_40 = arith.constant 0 : index
    %57 = vector.load %arg9[%c512_39, %c0_40] : memref<1024x512xbf16, #tpu.memory_space<vmem>>, vector<512x512xbf16>
    %cst_41 = arith.constant dense<0.000000e+00> : vector<32x512xf32>
    %58 = tpu.matmul %54, %57, %cst_41 {dimension_numbers = #tpu.dot_dimension_numbers<[1], [0], [0], [1], [0, 0, 1, 1], [], []>} : vector<32x512xbf16>, vector<512x512xbf16>, vector<32x512xf32> -> vector<32x512xf32>
    %c30_i32_42 = arith.constant 30 : i32
    %59 = tpu.dynamic_rotate %58 by %c30_i32_42 dim 0 : vector<32x512xf32>, i32 -> vector<32x512xf32>
    %60 = arith.addf %56, %59 : vector<32x512xf32>
    %c0_43 = arith.constant 0 : index
    %c0_44 = arith.constant 0 : index
    %61 = vector.load %arg10[%c0_43, %c0_44] : memref<1x512xf32, #tpu.memory_space<vmem>>, vector<1x512xf32>
    %62 = vector.broadcast %61 : vector<1x512xf32> to vector<32x512xf32>
    %63 = arith.addf %60, %62 : vector<32x512xf32>
    %cst_45 = arith.constant 0.000000e+00 : f32
    %64 = vector.broadcast %cst_45 : f32 to vector<32x512xf32>
    %65 = arith.maximumf %63, %64 : vector<32x512xf32>
    %c0_46 = arith.constant 0 : index
    %c0_47 = arith.constant 0 : index
    %66 = vector.load %arg11[%c0_46, %c0_47] : memref<1x512xf32, #tpu.memory_space<vmem>>, vector<1x512xf32>
    %67 = vector.broadcast %66 : vector<1x512xf32> to vector<32x512xf32>
    %68 = arith.mulf %65, %67 : vector<32x512xf32>
    %c0_48 = arith.constant 0 : index
    %c0_49 = arith.constant 0 : index
    %69 = vector.load %arg12[%c0_48, %c0_49] : memref<1x512xf32, #tpu.memory_space<vmem>>, vector<1x512xf32>
    %70 = vector.broadcast %69 : vector<1x512xf32> to vector<32x512xf32>
    %71 = arith.addf %68, %70 : vector<32x512xf32>
    %72 = arith.truncf %71 : vector<32x512xf32> to vector<32x512xbf16>
    %c0_50 = arith.constant 0 : index
    %c0_51 = arith.constant 0 : index
    %73 = vector.load %arg13[%c0_50, %c0_51] : memref<512x512xbf16, #tpu.memory_space<vmem>>, vector<512x512xbf16>
    %cst_52 = arith.constant dense<0.000000e+00> : vector<32x512xf32>
    %74 = tpu.matmul %72, %73, %cst_52 {dimension_numbers = #tpu.dot_dimension_numbers<[1], [0], [0], [1], [0, 0, 1, 1], [], []>} : vector<32x512xbf16>, vector<512x512xbf16>, vector<32x512xf32> -> vector<32x512xf32>
    %c0_53 = arith.constant 0 : index
    %c0_54 = arith.constant 0 : index
    %75 = vector.load %arg14[%c0_53, %c0_54] : memref<1x512xf32, #tpu.memory_space<vmem>>, vector<1x512xf32>
    %76 = vector.broadcast %75 : vector<1x512xf32> to vector<32x512xf32>
    %77 = arith.addf %74, %76 : vector<32x512xf32>
    %cst_55 = arith.constant 0.000000e+00 : f32
    %78 = vector.broadcast %cst_55 : f32 to vector<32x512xf32>
    %79 = arith.maximumf %77, %78 : vector<32x512xf32>
    %c0_56 = arith.constant 0 : index
    %c0_57 = arith.constant 0 : index
    %80 = vector.load %arg15[%c0_56, %c0_57] : memref<1x512xf32, #tpu.memory_space<vmem>>, vector<1x512xf32>
    %81 = vector.broadcast %80 : vector<1x512xf32> to vector<32x512xf32>
    %82 = arith.mulf %79, %81 : vector<32x512xf32>
    %c0_58 = arith.constant 0 : index
    %c0_59 = arith.constant 0 : index
    %83 = vector.load %arg16[%c0_58, %c0_59] : memref<1x512xf32, #tpu.memory_space<vmem>>, vector<1x512xf32>
    %84 = vector.broadcast %83 : vector<1x512xf32> to vector<32x512xf32>
    %85 = arith.addf %82, %84 : vector<32x512xf32>
    %86 = vector.extract_strided_slice %85 {offsets = [0, 0], sizes = [12, 512], strides = [1, 1]} : vector<32x512xf32> to vector<12x512xf32>
    %cst_60 = arith.constant dense<0.000000e+00> : vector<512xf32>
    %87 = vector.multi_reduction <add>, %86, %cst_60 [0] : vector<12x512xf32> to vector<512xf32>
    %88 = vector.shape_cast %87 : vector<512xf32> to vector<1x512xf32>
    %cst_61 = arith.constant 0.0833333358 : f32
    %89 = vector.broadcast %cst_61 : f32 to vector<1x512xf32>
    %90 = arith.mulf %88, %89 : vector<1x512xf32>
    %91 = vector.broadcast %90 : vector<1x512xf32> to vector<12x512xf32>
    %92 = arith.subf %86, %91 : vector<12x512xf32>
    %93 = arith.mulf %92, %92 : vector<12x512xf32>
    %cst_62 = arith.constant dense<0.000000e+00> : vector<512xf32>
    %94 = vector.multi_reduction <add>, %93, %cst_62 [0] : vector<12x512xf32> to vector<512xf32>
    %95 = vector.shape_cast %94 : vector<512xf32> to vector<1x512xf32>
    %cst_63 = arith.constant 0.0909090936 : f32
    %96 = vector.broadcast %cst_63 : f32 to vector<1x512xf32>
    %97 = arith.mulf %95, %96 : vector<1x512xf32>
    %98 = arith.truncf %90 : vector<1x512xf32> to vector<1x512xbf16>
    %c0_64 = arith.constant 0 : index
    %c0_65 = arith.constant 0 : index
    %99 = vector.load %arg17[%c0_64, %c0_65] : memref<1024x128xbf16, #tpu.memory_space<vmem>>, vector<512x128xbf16>
    %cst_66 = arith.constant dense<0.000000e+00> : vector<1x128xf32>
    %100 = tpu.matmul %98, %99, %cst_66 {dimension_numbers = #tpu.dot_dimension_numbers<[1], [0], [0], [1], [0, 0, 1, 1], [], []>} : vector<1x512xbf16>, vector<512x128xbf16>, vector<1x128xf32> -> vector<1x128xf32>
    %101 = arith.truncf %97 : vector<1x512xf32> to vector<1x512xbf16>
    %c512_67 = arith.constant 512 : index
    %c0_68 = arith.constant 0 : index
    %102 = vector.load %arg17[%c512_67, %c0_68] : memref<1024x128xbf16, #tpu.memory_space<vmem>>, vector<512x128xbf16>
    %cst_69 = arith.constant dense<0.000000e+00> : vector<1x128xf32>
    %103 = tpu.matmul %101, %102, %cst_69 {dimension_numbers = #tpu.dot_dimension_numbers<[1], [0], [0], [1], [0, 0, 1, 1], [], []>} : vector<1x512xbf16>, vector<512x128xbf16>, vector<1x128xf32> -> vector<1x128xf32>
    %104 = arith.addf %100, %103 : vector<1x128xf32>
    %c0_70 = arith.constant 0 : index
    %c0_71 = arith.constant 0 : index
    %105 = vector.load %arg18[%c0_70, %c0_71] : memref<1x128xf32, #tpu.memory_space<vmem>>, vector<1x128xf32>
    %106 = arith.addf %104, %105 : vector<1x128xf32>
    %c0_72 = arith.constant 0 : index
    %c0_73 = arith.constant 0 : index
    %107 = vector.load %arg19[%c0_72, %c0_73] : memref<1x128xf32, #tpu.memory_space<vmem>>, vector<1x128xf32>
    tpu.vector_store %arg19[%c0_72, %c0_73], %106 {strides = array<i32>} : memref<1x128xf32, #tpu.memory_space<vmem>>, vector<1x128xf32>,
    return
  }
}

</mosaic_0001>

<bundles_post_ra>
// kernel: x_vector_forward.1
= control target key start
LH: loop header
LB: loop body
LE: loop exit
PB: predicated region body
PF: predicated region fallthrough
CT: control target
= control target key end

     0   :  { %s13892_s0 = inlined_call_operand.vmem [shape: bf16[32,128], index: 0, kind: input, shape index: {}]   ;;  %s13893_s1 = inlined_call_operand.hbm [shape: bf16[640,512], index: 1, kind: input, shape index: {}]   ;;  %s13894_s2 = inlined_call_operand.hbm [shape: f32[1,512], index: 2, kind: input, shape index: {}]   ;;  %s13895_s3 = inlined_call_operand.hbm [shape: f32[1,512], index: 3, kind: input, shape index: {}]   ;;  %s13896_s4 = inlined_call_operand.hbm [shape: f32[1,512], index: 4, kind: input, shape index: {}]   ;;  %s13897_s5 = inlined_call_operand.hbm [shape: bf16[1536,512], index: 5, kind: input, shape index: {}]   ;;  %s13898_s6 = inlined_call_operand.hbm [shape: f32[1,512], index: 6, kind: input, shape index: {}]   ;;  %s13899_s7 = inlined_call_operand.hbm [shape: f32[1,512], index: 7, kind: input, shape index: {}]   ;;  %s13900_s8 = inlined_call_operand.hbm [shape: f32[1,512], index: 8, kind: input, shape index: {}]   ;;  %s13901_s9 = inlined_call_operand.hbm [shape: bf16[1024,512], index: 9, kind: input, shape index: {}]   ;;  %s13902_s10 = inlined_call_operand.hbm [shape: f32[1,512], index: 10, kind: input, shape index: {}]   ;;  %s13903_s11 = inlined_call_operand.hbm [shape: f32[1,512], index: 11, kind: input, shape index: {}]   ;;  %s13904_s12 = inlined_call_operand.hbm [shape: f32[1,512], index: 12, kind: input, shape index: {}]   ;;  %s13905_s13 = inlined_call_operand.hbm [shape: bf16[512,512], index: 13, kind: input, shape index: {}]   ;;  %s13906_s14 = inlined_call_operand.hbm [shape: f32[1,512], index: 14, kind: input, shape index: {}]   ;;  %s13907_s15 = inlined_call_operand.hbm [shape: f32[1,512], index: 15, kind: input, shape index: {}]   ;;  %s13908_s16 = inlined_call_operand.hbm [shape: f32[1,512], index: 16, kind: input, shape index: {}]   ;;  %s13909_s17 = inlined_call_operand.hbm [shape: bf16[1024,128], index: 17, kind: input, shape index: {}]   ;;  %s13910_s18 = inlined_call_operand.hbm [shape: f32[1,128], index: 18, kind: input, shape index: {}]   ;;  %s13911_s19 = inlined_call_operand.hbm [shape: f32[1,128], index: 19, kind: output, shape index: {}]  }
   0x1   :  { %13920 = sst [smem:[#allocation43_spill]] %s13892_s0 }
   0x2   :  { %13921 = sst [smem:[#allocation44_spill]] %s13893_s1 }
   0x3   :  { %13922 = sst [smem:[#allocation45_spill]] %s13894_s2 }
   0x4   :  { %13923 = sst [smem:[#allocation46_spill]] %s13895_s3 }
   0x5   :  { %24 = vsyncpa [#allocation3], 0 }
   0x6   :  { %25 = vsyncpa [#allocation6], 0 }
   0x7   :  { %26 = vsyncpa [#allocation9], 0 }
   0x8   :  { %27 = vsyncpa [#allocation12], 0 }
   0x9   :  { %28 = vsyncpa [#allocation15], 0 }
   0xa   :  { %29 = vsyncpa [#allocation18], 0 }
   0xb   :  { %30 = vsyncpa [#allocation21], 0 }
   0xc   :  { %31 = vsyncpa [#allocation24], 0 }
   0xd   :  { %32 = vsyncpa [#allocation27], 0 }
   0xe   :  { %33 = vsyncpa [#allocation30], 0 }
   0xf   :  { %34 = vsyncpa [#allocation4], 0  ;;  %s12396_s0 = smov [#allocation5]   ;;  %s12397_s20 = smov [#allocation8]  }
  0x10   :  { %s55_s30 = sshll.u32 %s12396_s0, 4  ;;  %s75_s21 = sshll.u32 %s12397_s20, 4  ;;  %s56_s30 = int_to_ptr.vmem [resolvable:$true] %s55_s30  ;;  %s76_s21 = int_to_ptr.vmem [resolvable:$true] %s75_s21 }
  0x11   :  { %s13924_s2 = sld [smem:[#allocation45_spill]] }
  0x17   :  { %s11956_s23 = scalar_lea.hbm %s13924_s2, 64 }
  0x18   :  { %p11957_p0 = scmp.ne.s32.totalorder %s13924_s2, %s11956_s23  ;;  %p11960_p1 = scmp.lt.u32.totalorder %s11956_s23, %s13924_s2 }
  0x1a   :  { %p11962_p2 = pnand %p11960_p1, %p11957_p0 }
  0x1c   :  { %11965 = shalt.err (!%p11962_p2)
}
  0x1d   :  { %s11966_s27 = scalar_lea.vmem %s56_s30, 64  ;;  %p11971_p4 = scmp.lt.s32.totalorder %s56_s30, %s56_s30 }
  0x1e   :  { %p11967_p3 = scmp.ne.s32.totalorder %s56_s30, %s11966_s27  ;;  %p11972_p5 = scmp.lt.s32.totalorder %s11966_s27, %s11966_s27 }
  0x20   :  { %p11973_p6 = por %p11972_p5, %p11971_p4 }
  0x22   :  { %p11974_p7 = pnand %p11973_p6, %p11967_p3 }
  0x24   :  { %11977 = shalt.err (!%p11974_p7)
}
  0x25   :  { %58 = dma.hbm_to_vmem [thread:$0]  %s13924_s2, 64, %s56_s30, [#allocation6]  }
  0x26   :  { %s11978_s1 = scalar_lea.hbm %s13896_s4, 64 }
  0x27   :  { %p11979_p8 = scmp.ne.s32.totalorder %s13896_s4, %s11978_s1  ;;  %p11982_p9 = scmp.lt.u32.totalorder %s11978_s1, %s13896_s4 }
  0x29   :  { %p11984_p10 = pnand %p11982_p9, %p11979_p8 }
  0x2b   :  { %11987 = shalt.err (!%p11984_p10)
}
  0x2c   :  { %s11988_s3 = scalar_lea.vmem %s76_s21, 64  ;;  %p11993_p12 = scmp.lt.s32.totalorder %s76_s21, %s76_s21 }
  0x2d   :  { %p11989_p11 = scmp.ne.s32.totalorder %s76_s21, %s11988_s3  ;;  %p11994_p13 = scmp.lt.s32.totalorder %s11988_s3, %s11988_s3 }
  0x2f   :  { %p11995_p0 = por %p11994_p13, %p11993_p12 }
  0x31   :  { %p11996_p1 = pnand %p11995_p0, %p11989_p11 }
  0x33   :  { %11999 = shalt.err (!%p11996_p1)
}
  0x34   :  { %78 = dma.hbm_to_vmem [thread:$0]  %s13896_s4, 64, %s76_s21, [#allocation9]  }
  0x35   :  { %s12398_s26 = smov [#allocation11]   ;;  %s12399_s28 = smov [#allocation14]  }
  0x36   :  { %s97_s27 = sshll.u32 %s12398_s26, 4  ;;  %s117_s29 = sshll.u32 %s12399_s28, 4  ;;  %s98_s27 = int_to_ptr.vmem [resolvable:$true] %s97_s27  ;;  %s118_s29 = int_to_ptr.vmem [resolvable:$true] %s117_s29 }
  0x37   :  { %s12000_s1 = scalar_lea.hbm %s13898_s6, 64 }
  0x38   :  { %p12001_p2 = scmp.ne.s32.totalorder %s13898_s6, %s12000_s1  ;;  %p12004_p3 = scmp.lt.u32.totalorder %s12000_s1, %s13898_s6 }
  0x3a   :  { %p12006_p4 = pnand %p12004_p3, %p12001_p2 }
  0x3c   :  { %12009 = shalt.err (!%p12006_p4)
}
  0x3d   :  { %s12010_s4 = scalar_lea.vmem %s98_s27, 64  ;;  %p12015_p6 = scmp.lt.s32.totalorder %s98_s27, %s98_s27 }
  0x3e   :  { %p12011_p5 = scmp.ne.s32.totalorder %s98_s27, %s12010_s4  ;;  %p12016_p7 = scmp.lt.s32.totalorder %s12010_s4, %s12010_s4 }
  0x40   :  { %p12017_p8 = por %p12016_p7, %p12015_p6 }
  0x42   :  { %p12018_p9 = pnand %p12017_p8, %p12011_p5 }
  0x44   :  { %12021 = shalt.err (!%p12018_p9)
}
  0x45   :  { %100 = dma.hbm_to_vmem [thread:$0]  %s13898_s6, 64, %s98_s27, [#allocation12]  }
  0x46   :  { %s12022_s26 = scalar_lea.hbm %s13900_s8, 64 }
  0x47   :  { %p12023_p10 = scmp.ne.s32.totalorder %s13900_s8, %s12022_s26  ;;  %p12026_p11 = scmp.lt.u32.totalorder %s12022_s26, %s13900_s8 }
  0x49   :  { %p12028_p12 = pnand %p12026_p11, %p12023_p10 }
  0x4b   :  { %12031 = shalt.err (!%p12028_p12)
}
  0x4c   :  { %s12032_s22 = scalar_lea.vmem %s118_s29, 64  ;;  %p12037_p0 = scmp.lt.s32.totalorder %s118_s29, %s118_s29 }
  0x4d   :  { %p12033_p13 = scmp.ne.s32.totalorder %s118_s29, %s12032_s22  ;;  %p12038_p1 = scmp.lt.s32.totalorder %s12032_s22, %s12032_s22 }
  0x4f   :  { %p12039_p2 = por %p12038_p1, %p12037_p0 }
  0x51   :  { %p12040_p3 = pnand %p12039_p2, %p12033_p13 }
  0x53   :  { %12043 = shalt.err (!%p12040_p3)
}
  0x54   :  { %120 = dma.hbm_to_vmem [thread:$0]  %s13900_s8, 64, %s118_s29, [#allocation15]  }
  0x55   :  { %s12400_s24 = smov [#allocation17]   ;;  %s12401_s25 = smov [#allocation20]  }
  0x56   :  { %s139_s23 = sshll.u32 %s12400_s24, 4  ;;  %s159_s4 = sshll.u32 %s12401_s25, 4  ;;  %s140_s23 = int_to_ptr.vmem [resolvable:$true] %s139_s23  ;;  %s160_s4 = int_to_ptr.vmem [resolvable:$true] %s159_s4 }
  0x57   :  { %s12044_s30 = scalar_lea.hbm %s13902_s10, 64 }
  0x58   :  { %p12045_p4 = scmp.ne.s32.totalorder %s13902_s10, %s12044_s30  ;;  %p12048_p5 = scmp.lt.u32.totalorder %s12044_s30, %s13902_s10 }
  0x5a   :  { %p12050_p6 = pnand %p12048_p5, %p12045_p4 }
  0x5c   :  { %12053 = shalt.err (!%p12050_p6)
}
  0x5d   :  { %s12054_s8 = scalar_lea.vmem %s140_s23, 64  ;;  %p12059_p8 = scmp.lt.s32.totalorder %s140_s23, %s140_s23 }
  0x5e   :  { %p12055_p7 = scmp.ne.s32.totalorder %s140_s23, %s12054_s8  ;;  %p12060_p9 = scmp.lt.s32.totalorder %s12054_s8, %s12054_s8 }
  0x60   :  { %p12061_p10 = por %p12060_p9, %p12059_p8 }
  0x62   :  { %p12062_p11 = pnand %p12061_p10, %p12055_p7 }
  0x64   :  { %12065 = shalt.err (!%p12062_p11)
}
  0x65   :  { %142 = dma.hbm_to_vmem [thread:$0]  %s13902_s10, 64, %s140_s23, [#allocation18]  }
  0x66   :  { %s12066_s6 = scalar_lea.hbm %s13904_s12, 64 }
  0x67   :  { %p12067_p12 = scmp.ne.s32.totalorder %s13904_s12, %s12066_s6  ;;  %p12070_p13 = scmp.lt.u32.totalorder %s12066_s6, %s13904_s12 }
  0x69   :  { %p12072_p0 = pnand %p12070_p13, %p12067_p12 }
  0x6b   :  { %12075 = shalt.err (!%p12072_p0)
}
  0x6c   :  { %s12076_s3 = scalar_lea.vmem %s160_s4, 64  ;;  %p12081_p2 = scmp.lt.s32.totalorder %s160_s4, %s160_s4 }
  0x6d   :  { %p12077_p1 = scmp.ne.s32.totalorder %s160_s4, %s12076_s3  ;;  %p12082_p3 = scmp.lt.s32.totalorder %s12076_s3, %s12076_s3 }
  0x6f   :  { %p12083_p4 = por %p12082_p3, %p12081_p2 }
  0x71   :  { %p12084_p5 = pnand %p12083_p4, %p12077_p1 }
  0x73   :  { %12087 = shalt.err (!%p12084_p5)
}
  0x74   :  { %162 = dma.hbm_to_vmem [thread:$0]  %s13904_s12, 64, %s160_s4, [#allocation21]  }
  0x75   :  { %s12402_s30 = smov [#allocation23]   ;;  %s12403_s26 = smov [#allocation26]  }
  0x76   :  { %s181_s2 = sshll.u32 %s12402_s30, 4  ;;  %s201_s28 = sshll.u32 %s12403_s26, 4  ;;  %s182_s2 = int_to_ptr.vmem [resolvable:$true] %s181_s2  ;;  %s202_s28 = int_to_ptr.vmem [resolvable:$true] %s201_s28 }
  0x77   :  { %s12088_s29 = scalar_lea.hbm %s13906_s14, 64 }
  0x78   :  { %p12089_p6 = scmp.ne.s32.totalorder %s13906_s14, %s12088_s29  ;;  %p12092_p7 = scmp.lt.u32.totalorder %s12088_s29, %s13906_s14 }
  0x7a   :  { %p12094_p8 = pnand %p12092_p7, %p12089_p6 }
  0x7c   :  { %12097 = shalt.err (!%p12094_p8)
}
  0x7d   :  { %s12098_s12 = scalar_lea.vmem %s182_s2, 64  ;;  %p12103_p10 = scmp.lt.s32.totalorder %s182_s2, %s182_s2 }
  0x7e   :  { %p12099_p9 = scmp.ne.s32.totalorder %s182_s2, %s12098_s12  ;;  %p12104_p11 = scmp.lt.s32.totalorder %s12098_s12, %s12098_s12 }
  0x80   :  { %p12105_p12 = por %p12104_p11, %p12103_p10 }
  0x82   :  { %p12106_p13 = pnand %p12105_p12, %p12099_p9 }
  0x84   :  { %12109 = shalt.err (!%p12106_p13)
}
  0x85   :  { %184 = dma.hbm_to_vmem [thread:$0]  %s13906_s14, 64, %s182_s2, [#allocation24]  }
  0x86   :  { %s12110_s21 = scalar_lea.hbm %s13908_s16, 64 }
  0x87   :  { %p12111_p0 = scmp.ne.s32.totalorder %s13908_s16, %s12110_s21  ;;  %p12114_p1 = scmp.lt.u32.totalorder %s12110_s21, %s13908_s16 }
  0x89   :  { %p12116_p2 = pnand %p12114_p1, %p12111_p0 }
  0x8b   :  { %12119 = shalt.err (!%p12116_p2)
}
  0x8c   :  { %s12120_s26 = scalar_lea.vmem %s202_s28, 64  ;;  %p12125_p4 = scmp.lt.s32.totalorder %s202_s28, %s202_s28 }
  0x8d   :  { %p12121_p3 = scmp.ne.s32.totalorder %s202_s28, %s12120_s26  ;;  %p12126_p5 = scmp.lt.s32.totalorder %s12120_s26, %s12120_s26 }
  0x8f   :  { %p12127_p6 = por %p12126_p5, %p12125_p4 }
  0x91   :  { %p12128_p7 = pnand %p12127_p6, %p12121_p3 }
  0x93   :  { %12131 = shalt.err (!%p12128_p7)
}
  0x94   :  { %204 = dma.hbm_to_vmem [thread:$0]  %s13908_s16, 64, %s202_s28, [#allocation27]  }
  0x95   :  { %s12404_s0 = smov [#allocation2]   ;;  %s13925_s1 = sld [smem:[#allocation44_spill]] }
  0x96   :  { %s42_s8 = sshll.u32 %s12404_s0, 4  ;;  %s43_s8 = int_to_ptr.vmem [resolvable:$true] %s42_s8 }
  0x9b   :  { %s12132_s22 = scalar_lea.hbm %s13925_s1, 20480 }
  0x9c   :  { %p12133_p8 = scmp.ne.s32.totalorder %s13925_s1, %s12132_s22  ;;  %p12136_p9 = scmp.lt.u32.totalorder %s12132_s22, %s13925_s1 }
  0x9e   :  { %p12138_p10 = pnand %p12136_p9, %p12133_p8 }
  0xa0   :  { %12141 = shalt.err (!%p12138_p10)
}
  0xa1   :  { %s12142_s24 = scalar_lea.vmem %s43_s8, 20480  ;;  %p12147_p12 = scmp.lt.s32.totalorder %s43_s8, %s43_s8 }
  0xa2   :  { %p12143_p11 = scmp.ne.s32.totalorder %s43_s8, %s12142_s24  ;;  %p12148_p13 = scmp.lt.s32.totalorder %s12142_s24, %s12142_s24 }
  0xa4   :  { %p12149_p0 = por %p12148_p13, %p12147_p12 }
  0xa6   :  { %p12150_p1 = pnand %p12149_p0, %p12143_p11 }
  0xa8   :  { %12153 = shalt.err (!%p12150_p1)
}
  0xa9   :  { %s12405_s16 = smov 256   ;;  %s12406_s28 = smov 16  }
  0xaa   :  { %48 = dma.hbm_to_vmem [thread:$0]  %s13925_s1, 20480, %s43_s8, [#allocation3], %s12405_s16, %s12405_s16, %s12406_s28  }
  0xab   :  { %s12407_s3 = smov [#allocation7]   ;;  %s12408_s23 = smov [#allocation10]  }
  0xac   :  { %s65_s10 = sshll.u32 %s12407_s3, 4  ;;  %s84_s30 = sshll.u32 %s12408_s23, 4  ;;  %s66_s10 = int_to_ptr.vmem [resolvable:$true] %s65_s10  ;;  %s85_s30 = int_to_ptr.vmem [resolvable:$true] %s84_s30 }
  0xad   :  { %s13926_s2 = sld [smem:[#allocation46_spill]] }
  0xb3   :  { %s12154_s0 = scalar_lea.hbm %s13926_s2, 64 }
  0xb4   :  { %p12155_p2 = scmp.ne.s32.totalorder %s13926_s2, %s12154_s0  ;;  %p12158_p3 = scmp.lt.u32.totalorder %s12154_s0, %s13926_s2 }
  0xb6   :  { %p12160_p4 = pnand %p12158_p3, %p12155_p2 }
  0xb8   :  { %12163 = shalt.err (!%p12160_p4)
}
  0xb9   :  { %s12164_s8 = scalar_lea.vmem %s66_s10, 64  ;;  %p12169_p6 = scmp.lt.s32.totalorder %s66_s10, %s66_s10 }
  0xba   :  { %p12165_p5 = scmp.ne.s32.totalorder %s66_s10, %s12164_s8  ;;  %p12170_p7 = scmp.lt.s32.totalorder %s12164_s8, %s12164_s8 }
  0xbc   :  { %p12171_p8 = por %p12170_p7, %p12169_p6 }
  0xbe   :  { %p12172_p9 = pnand %p12171_p8, %p12165_p5 }
  0xc0   :  { %12175 = shalt.err (!%p12172_p9)
}
  0xc1   :  { %68 = dma.hbm_to_vmem [thread:$0]  %s13926_s2, 64, %s66_s10, [#allocation6]  }
  0xc2   :  { %s12176_s24 = scalar_lea.hbm %s13897_s5, 49152 }
  0xc3   :  { %p12177_p10 = scmp.ne.s32.totalorder %s13897_s5, %s12176_s24  ;;  %p12180_p11 = scmp.lt.u32.totalorder %s12176_s24, %s13897_s5 }
  0xc5   :  { %p12182_p12 = pnand %p12180_p11, %p12177_p10 }
  0xc7   :  { %12185 = shalt.err (!%p12182_p12)
}
  0xc8   :  { %s12186_s26 = scalar_lea.vmem %s85_s30, 49152  ;;  %p12191_p0 = scmp.lt.s32.totalorder %s85_s30, %s85_s30 }
  0xc9   :  { %p12187_p13 = scmp.ne.s32.totalorder %s85_s30, %s12186_s26  ;;  %p12192_p1 = scmp.lt.s32.totalorder %s12186_s26, %s12186_s26 }
  0xcb   :  { %p12193_p2 = por %p12192_p1, %p12191_p0 }
  0xcd   :  { %p12194_p3 = pnand %p12193_p2, %p12187_p13 }
  0xcf   :  { %12197 = shalt.err (!%p12194_p3)
}
  0xd0   :  { %90 = dma.hbm_to_vmem [thread:$0]  %s13897_s5, 49152, %s85_s30, [#allocation9], %s12405_s16, %s12405_s16, %s12406_s28  }
  0xd1   :  { %s12409_s2 = smov [#allocation13]   ;;  %s12410_s29 = smov [#allocation16]  }
  0xd2   :  { %s107_s0 = sshll.u32 %s12409_s2, 4  ;;  %s126_s20 = sshll.u32 %s12410_s29, 4  ;;  %s108_s0 = int_to_ptr.vmem [resolvable:$true] %s107_s0  ;;  %s127_s20 = int_to_ptr.vmem [resolvable:$true] %s126_s20 }
  0xd3   :  { %s12198_s8 = scalar_lea.hbm %s13899_s7, 64 }
  0xd4   :  { %p12199_p4 = scmp.ne.s32.totalorder %s13899_s7, %s12198_s8  ;;  %p12202_p5 = scmp.lt.u32.totalorder %s12198_s8, %s13899_s7 }
  0xd6   :  { %p12204_p6 = pnand %p12202_p5, %p12199_p4 }
  0xd8   :  { %12207 = shalt.err (!%p12204_p6)
}
  0xd9   :  { %s12208_s5 = scalar_lea.vmem %s108_s0, 64  ;;  %p12213_p8 = scmp.lt.s32.totalorder %s108_s0, %s108_s0 }
  0xda   :  { %p12209_p7 = scmp.ne.s32.totalorder %s108_s0, %s12208_s5  ;;  %p12214_p9 = scmp.lt.s32.totalorder %s12208_s5, %s12208_s5 }
  0xdc   :  { %p12215_p10 = por %p12214_p9, %p12213_p8 }
  0xde   :  { %p12216_p11 = pnand %p12215_p10, %p12209_p7 }
  0xe0   :  { %12219 = shalt.err (!%p12216_p11)
}
  0xe1   :  { %110 = dma.hbm_to_vmem [thread:$0]  %s13899_s7, 64, %s108_s0, [#allocation12]  }
  0xe2   :  { %s12220_s3 = scalar_lea.hbm %s13901_s9, 32768 }
  0xe3   :  { %p12221_p12 = scmp.ne.s32.totalorder %s13901_s9, %s12220_s3  ;;  %p12224_p13 = scmp.lt.u32.totalorder %s12220_s3, %s13901_s9 }
  0xe5   :  { %p12226_p0 = pnand %p12224_p13, %p12221_p12 }
  0xe7   :  { %12229 = shalt.err (!%p12226_p0)
}
  0xe8   :  { %s12230_s2 = scalar_lea.vmem %s127_s20, 32768  ;;  %p12235_p2 = scmp.lt.s32.totalorder %s127_s20, %s127_s20 }
  0xe9   :  { %p12231_p1 = scmp.ne.s32.totalorder %s127_s20, %s12230_s2  ;;  %p12236_p3 = scmp.lt.s32.totalorder %s12230_s2, %s12230_s2 }
  0xeb   :  { %p12237_p4 = por %p12236_p3, %p12235_p2 }
  0xed   :  { %p12238_p5 = pnand %p12237_p4, %p12231_p1 }
  0xef   :  { %12241 = shalt.err (!%p12238_p5)
}
  0xf0   :  { %132 = dma.hbm_to_vmem [thread:$0]  %s13901_s9, 32768, %s127_s20, [#allocation15], %s12405_s16, %s12405_s16, %s12406_s28  }
  0xf1   :  { %s12411_s29 = smov [#allocation19]   ;;  %s12412_s6 = smov [#allocation22]  }
  0xf2   :  { %s149_s22 = sshll.u32 %s12411_s29, 4  ;;  %s168_s8 = sshll.u32 %s12412_s6, 4  ;;  %s150_s22 = int_to_ptr.vmem [resolvable:$true] %s149_s22  ;;  %s169_s8 = int_to_ptr.vmem [resolvable:$true] %s168_s8 }
  0xf3   :  { %s12242_s4 = scalar_lea.hbm %s13903_s11, 64 }
  0xf4   :  { %p12243_p6 = scmp.ne.s32.totalorder %s13903_s11, %s12242_s4  ;;  %p12246_p7 = scmp.lt.u32.totalorder %s12242_s4, %s13903_s11 }
  0xf6   :  { %p12248_p8 = pnand %p12246_p7, %p12243_p6 }
  0xf8   :  { %12251 = shalt.err (!%p12248_p8)
}
  0xf9   :  { %s12252_s9 = scalar_lea.vmem %s150_s22, 64  ;;  %p12257_p10 = scmp.lt.s32.totalorder %s150_s22, %s150_s22 }
  0xfa   :  { %p12253_p9 = scmp.ne.s32.totalorder %s150_s22, %s12252_s9  ;;  %p12258_p11 = scmp.lt.s32.totalorder %s12252_s9, %s12252_s9 }
  0xfc   :  { %p12259_p12 = por %p12258_p11, %p12257_p10 }
  0xfe   :  { %p12260_p13 = pnand %p12259_p12, %p12253_p9 }
 0x100   :  { %12263 = shalt.err (!%p12260_p13)
}
 0x101   :  { %152 = dma.hbm_to_vmem [thread:$0]  %s13903_s11, 64, %s150_s22, [#allocation18]  }
 0x102   :  { %s12264_s23 = scalar_lea.hbm %s13905_s13, 16384 }
 0x103   :  { %p12265_p0 = scmp.ne.s32.totalorder %s13905_s13, %s12264_s23  ;;  %p12268_p1 = scmp.lt.u32.totalorder %s12264_s23, %s13905_s13 }
 0x105   :  { %p12270_p2 = pnand %p12268_p1, %p12265_p0 }
 0x107   :  { %12273 = shalt.err (!%p12270_p2)
}
 0x108   :  { %s12274_s7 = scalar_lea.vmem %s169_s8, 16384  ;;  %p12279_p4 = scmp.lt.s32.totalorder %s169_s8, %s169_s8 }
 0x109   :  { %p12275_p3 = scmp.ne.s32.totalorder %s169_s8, %s12274_s7  ;;  %p12280_p5 = scmp.lt.s32.totalorder %s12274_s7, %s12274_s7 }
 0x10b   :  { %p12281_p6 = por %p12280_p5, %p12279_p4 }
 0x10d   :  { %p12282_p7 = pnand %p12281_p6, %p12275_p3 }
 0x10f   :  { %12285 = shalt.err (!%p12282_p7)
}
 0x110   :  { %174 = dma.hbm_to_vmem [thread:$0]  %s13905_s13, 16384, %s169_s8, [#allocation21], %s12405_s16, %s12405_s16, %s12406_s28  }
 0x111   :  { %s12413_s29 = smov [#allocation25]   ;;  %s12414_s6 = smov [#allocation28]  }
 0x112   :  { %s191_s22 = sshll.u32 %s12413_s29, 4  ;;  %s210_s1 = sshll.u32 %s12414_s6, 4  ;;  %s192_s22 = int_to_ptr.vmem [resolvable:$true] %s191_s22  ;;  %s211_s1 = int_to_ptr.vmem [resolvable:$true] %s210_s1 }
 0x113   :  { %s12286_s27 = scalar_lea.hbm %s13907_s15, 64 }
 0x114   :  { %p12287_p8 = scmp.ne.s32.totalorder %s13907_s15, %s12286_s27  ;;  %p12290_p9 = scmp.lt.u32.totalorder %s12286_s27, %s13907_s15 }
 0x116   :  { %p12292_p10 = pnand %p12290_p9, %p12287_p8 }
 0x118   :  { %12295 = shalt.err (!%p12292_p10)
}
 0x119   :  { %s12296_s13 = scalar_lea.vmem %s192_s22, 64  ;;  %p12301_p12 = scmp.lt.s32.totalorder %s192_s22, %s192_s22 }
 0x11a   :  { %p12297_p11 = scmp.ne.s32.totalorder %s192_s22, %s12296_s13  ;;  %p12302_p13 = scmp.lt.s32.totalorder %s12296_s13, %s12296_s13 }
 0x11c   :  { %p12303_p0 = por %p12302_p13, %p12301_p12 }
 0x11e   :  { %p12304_p1 = pnand %p12303_p0, %p12297_p11 }
 0x120   :  { %12307 = shalt.err (!%p12304_p1)
}
 0x121   :  { %194 = dma.hbm_to_vmem [thread:$0]  %s13907_s15, 64, %s192_s22, [#allocation24]  }
 0x122   :  { %s12308_s25 = scalar_lea.hbm %s13909_s17, 8192 }
 0x123   :  { %p12309_p2 = scmp.ne.s32.totalorder %s13909_s17, %s12308_s25  ;;  %p12312_p3 = scmp.lt.u32.totalorder %s12308_s25, %s13909_s17 }
 0x125   :  { %p12314_p4 = pnand %p12312_p3, %p12309_p2 }
 0x127   :  { %12317 = shalt.err (!%p12314_p4)
}
 0x128   :  { %s12318_s10 = scalar_lea.vmem %s211_s1, 8192  ;;  %p12323_p6 = scmp.lt.s32.totalorder %s211_s1, %s211_s1 }
 0x129   :  { %p12319_p5 = scmp.ne.s32.totalorder %s211_s1, %s12318_s10  ;;  %p12324_p7 = scmp.lt.s32.totalorder %s12318_s10, %s12318_s10 }
 0x12b   :  { %p12325_p8 = por %p12324_p7, %p12323_p6 }
 0x12d   :  { %p12326_p9 = pnand %p12325_p8, %p12319_p5 }
 0x12f   :  { %12329 = shalt.err (!%p12326_p9)
}
 0x130   :  { %s12415_s15 = smov 64   ;;  %s12416_s14 = smov 4  }
 0x131   :  { %216 = dma.hbm_to_vmem [thread:$0]  %s13909_s17, 8192, %s211_s1, [#allocation27], %s12415_s15, %s12415_s15, %s12416_s14  }
 0x132   :  { %s12417_s11 = smov [#allocation29]   ;;  %s12330_s6 = scalar_lea.hbm %s13910_s18, 16 }
 0x133   :  { %s223_s0 = sshll.u32 %s12417_s11, 4  ;;  %p12331_p10 = scmp.ne.s32.totalorder %s13910_s18, %s12330_s6  ;;  %s224_s0 = int_to_ptr.vmem [resolvable:$true] %s223_s0 }
 0x134   :  { %p12334_p11 = scmp.lt.u32.totalorder %s12330_s6, %s13910_s18 }
 0x136   :  { %p12336_p12 = pnand %p12334_p11, %p12331_p10 }
 0x138   :  { %12339 = shalt.err (!%p12336_p12)
}
 0x139   :  { %s12340_s30 = scalar_lea.vmem %s224_s0, 16  ;;  %s12344_s17 = scalar_lea.vmem %s224_s0, 32 }
 0x13a   :  { %p12341_p13 = scmp.ne.s32.totalorder %s224_s0, %s12340_s30  ;;  %p12345_p0 = scmp.lt.s32.totalorder %s224_s0, %s224_s0 }
 0x13b   :  { %p12346_p1 = scmp.lt.s32.totalorder %s12344_s17, %s12340_s30 }
 0x13d   :  { %p12347_p2 = por %p12346_p1, %p12345_p0 }
 0x13f   :  { %p12348_p3 = pnand %p12347_p2, %p12341_p13 }
 0x141   :  { %12351 = shalt.err (!%p12348_p3)
}
 0x142   :  { %226 = dma.hbm_to_vmem [thread:$0]  %s13910_s18, 16, %s224_s0, [#allocation30]  }
 0x143   :  { %12374 = dma.done.wait [#allocation3], 20480  }
 0x144   :  { %12375 = vsyncadd [#allocation3], 4294946816 }
 0x145   :  { %12376 = dma.done.wait [#allocation6], 128  }
 0x146   :  { %12377 = vsyncadd [#allocation6], 4294967168 }
 0x147   :  { %12378 = dma.done.wait [#allocation9], 49216  }
 0x148   :  { %12379 = vsyncadd [#allocation9], 4294918080 }
 0x149   :  { %12380 = dma.done.wait [#allocation12], 128  }
 0x14a   :  { %12381 = vsyncadd [#allocation12], 4294967168 }
 0x14b   :  { %12382 = dma.done.wait [#allocation15], 32832  }
 0x14c   :  { %12383 = vsyncadd [#allocation15], 4294934464 }
 0x14d   :  { %12384 = dma.done.wait [#allocation18], 128  }
 0x14e   :  { %12385 = vsyncadd [#allocation18], 4294967168 }
 0x14f   :  { %12386 = dma.done.wait [#allocation21], 16448  }
 0x150   :  { %12387 = vsyncadd [#allocation21], 4294950848 }
 0x151   :  { %12388 = dma.done.wait [#allocation24], 128  }
 0x152   :  { %12389 = vsyncadd [#allocation24], 4294967168 }
 0x153   :  { %12390 = dma.done.wait [#allocation27], 8256  }
 0x154   :  { %12391 = vsyncadd [#allocation27], 4294959040 }
 0x155   :  { %12392 = dma.done.wait [#allocation30], 16  }
 0x156   :  { %12393 = vsyncadd [#allocation30], 4294967280  ;;  %v12418_v0 = vmov 0   ;;  %v10496_v1 = vld [vmem:[#allocation2 + $0x104] ss:$16 sps:$4 sm:$0xff]   ;;  %s13927_s13 = sld [smem:[#allocation43_spill]] }
 0x157   :  { %554 = vmatprep.mubr.bf16.mxu0 %v12418_v0  ;;  %607 = vmatprep.mubr.bf16.mxu1 %v12418_v0  ;;  %v10498_v2 = vld [vmem:[#allocation2 + $0x10c] ss:$16 sps:$4 sm:$0xff]   ;;  %v10500_v3 = vld [vmem:[#allocation2 + $0x100] ss:$16 sps:$4 sm:$0xff]   ;;  %v10501_v4 = vld [vmem:[#allocation2 + $0x108] ss:$16 sps:$4 sm:$0xff]  }
 0x158   :  { %522 = vmatprep.subr.bf16.mxu0 %v10496_v1  ;;  %575 = vmatprep.subr.bf16.mxu1 %v10498_v2  ;;  %v10502_v5 = vld [vmem:[#allocation2 + $0x124] ss:$16 sps:$4 sm:$0xff]   ;;  %v10504_v6 = vld [vmem:[#allocation2 + $0x12c] ss:$16 sps:$4 sm:$0xff]   ;;  %v10506_v7 = vld [vmem:[#allocation2 + $0x120] ss:$16 sps:$4 sm:$0xff]  }
 0x159   :  { %523 = vmatpush1.bf16.msra.mxu0 %v10500_v3  ;;  %576 = vmatpush1.bf16.msra.mxu1 %v10501_v4  ;;  %v10507_v8 = vld [vmem:[#allocation2 + $0x128] ss:$16 sps:$4 sm:$0xff]   ;;  %v10508_v9 = vld [vmem:[#allocation2 + $0x144] ss:$16 sps:$4 sm:$0xff]   ;;  %v10510_v10 = vld [vmem:[#allocation2 + $0x14c] ss:$16 sps:$4 sm:$0xff]  }
 0x15a   :  { %524 = vmatprep.subr.bf16.mxu0 %v10502_v5  ;;  %577 = vmatprep.subr.bf16.mxu1 %v10504_v6  ;;  %v10512_v11 = vld [vmem:[#allocation2 + $0x140] ss:$16 sps:$4 sm:$0xff]   ;;  %v10513_v12 = vld [vmem:[#allocation2 + $0x148] ss:$16 sps:$4 sm:$0xff]   ;;  %v10514_v13 = vld [vmem:[#allocation2 + $0x164] ss:$16 sps:$4 sm:$0xff]  }
 0x15b   :  { %v10516_v14 = vld [vmem:[#allocation2 + $0x16c] ss:$16 sps:$4 sm:$0xff]   ;;  %v10518_v15 = vld [vmem:[#allocation2 + $0x160] ss:$16 sps:$4 sm:$0xff]   ;;  %v10519_v16 = vld [vmem:[#allocation2 + $0x168] ss:$16 sps:$4 sm:$0xff]  }
 0x15c   :  { %v10520_v17 = vld [vmem:[#allocation2 + $0x184] ss:$16 sps:$4 sm:$0xff]   ;;  %v10522_v18 = vld [vmem:[#allocation2 + $0x18c] ss:$16 sps:$4 sm:$0xff]   ;;  %v10524_v19 = vld [vmem:[#allocation2 + $0x180] ss:$16 sps:$4 sm:$0xff]  }
 0x15d   :  { %525 = vmatpush1.bf16.msra.mxu0 %v10506_v7  ;;  %578 = vmatpush1.bf16.msra.mxu1 %v10507_v8  ;;  %v10525_v20 = vld [vmem:[#allocation2 + $0x188] ss:$16 sps:$4 sm:$0xff]   ;;  %v10526_v21 = vld [vmem:[#allocation2 + $0x1a4] ss:$16 sps:$4 sm:$0xff]   ;;  %v10528_v22 = vld [vmem:[#allocation2 + $0x1ac] ss:$16 sps:$4 sm:$0xff]  }
 0x15e   :  { %526 = vmatprep.subr.bf16.mxu0 %v10508_v9  ;;  %579 = vmatprep.subr.bf16.mxu1 %v10510_v10  ;;  %v10530_v23 = vld [vmem:[#allocation2 + $0x1a0] ss:$16 sps:$4 sm:$0xff]   ;;  %v10531_v24 = vld [vmem:[#allocation2 + $0x1a8] ss:$16 sps:$4 sm:$0xff]   ;;  %v10532_v25 = vld [vmem:[#allocation2 + $0x1c4] ss:$16 sps:$4 sm:$0xff]  }
 0x15f   :  { %v10534_v26 = vld [vmem:[#allocation2 + $0x1cc] ss:$16 sps:$4 sm:$0xff]   ;;  %v10536_v27 = vld [vmem:[#allocation2 + $0x1c0] ss:$16 sps:$4 sm:$0xff]   ;;  %v10537_v28 = vld [vmem:[#allocation2 + $0x1c8] ss:$16 sps:$4 sm:$0xff]  }
 0x160   :  { %v10538_v29 = vld [vmem:[#allocation2 + $0x1e4] ss:$16 sps:$4 sm:$0xff]   ;;  %v10540_v30 = vld [vmem:[#allocation2 + $0x1ec] ss:$16 sps:$4 sm:$0xff]   ;;  %v10542_v31 = vld [vmem:[#allocation2 + $0x1e0] ss:$16 sps:$4 sm:$0xff]  }
 0x161   :  { %527 = vmatpush1.bf16.msra.mxu0 %v10512_v11  ;;  %580 = vmatpush1.bf16.msra.mxu1 %v10513_v12  ;;  %v10543_v32 = vld [vmem:[#allocation2 + $0x1e8] ss:$16 sps:$4 sm:$0xff]   ;;  %v10547_v33 = vld [vmem:[#allocation2 + $0x4] ss:$16 sps:$4 sm:$0xff]   ;;  %v10550_v34 = vld [vmem:[#allocation2 + $0xc] ss:$16 sps:$4 sm:$0xff]  }
 0x162   :  { %528 = vmatprep.subr.bf16.mxu0 %v10514_v13  ;;  %581 = vmatprep.subr.bf16.mxu1 %v10516_v14  ;;  %v12753_v35 = vld [vmem:[%s13927_s13] sm:$0xff]   ;;  %v10548_v37 = vld [vmem:[#allocation2 + $0x8] ss:$16 sps:$4 sm:$0xff]   ;;  %v10556_v39 = vld [vmem:[#allocation2 + $0x2c] ss:$16 sps:$4 sm:$0xff]   ;;  %vm8466_vm4 = vcmask 1043456  }
 0x163   :  { %v10545_v36 = vld [vmem:[#allocation2] ss:$16 sps:$4 sm:$0xff]   ;;  %v10553_v38 = vld [vmem:[#allocation2 + $0x24] ss:$16 sps:$4 sm:$0xff]   ;;  %v10554_v41 = vld [vmem:[#allocation2 + $0x28] ss:$16 sps:$4 sm:$0xff]  }
 0x164   :  { %v10551_v40 = vld [vmem:[#allocation2 + $0x20] ss:$16 sps:$4 sm:$0xff]   ;;  %v10560_v42 = vld [vmem:[#allocation2 + $0x44] ss:$16 sps:$4 sm:$0xff]   ;;  %v10563_v43 = vld [vmem:[#allocation2 + $0x4c] ss:$16 sps:$4 sm:$0xff]  }
 0x165   :  { %529 = vmatpush1.bf16.msra.mxu0 %v10518_v15  ;;  %582 = vmatpush1.bf16.msra.mxu1 %v10519_v16  ;;  %v12762_v44 = vld [vmem:[%s13927_s13 + $0x8] sm:$0xff]   ;;  %v10558_v45 = vld [vmem:[#allocation2 + $0x40] ss:$16 sps:$4 sm:$0xff]   ;;  %v10566_v47 = vld [vmem:[#allocation2 + $0x64] ss:$16 sps:$4 sm:$0xff]   ;;  %s12419_s3 = smov [#allocation31]  }
 0x166   :  { %530 = vmatprep.subr.bf16.mxu0 %v10520_v17  ;;  %583 = vmatprep.subr.bf16.mxu1 %v10522_v18  ;;  %v10561_v46 = vld [vmem:[#allocation2 + $0x48] ss:$16 sps:$4 sm:$0xff]   ;;  %v10569_v48 = vld [vmem:[#allocation2 + $0x6c] ss:$16 sps:$4 sm:$0xff]   ;;  %v10564_v49 = vld [vmem:[#allocation2 + $0x60] ss:$16 sps:$4 sm:$0xff]  }
 0x167   :  { %v10567_v50 = vld [vmem:[#allocation2 + $0x68] ss:$16 sps:$4 sm:$0xff]   ;;  %v10572_v51 = vld [vmem:[#allocation2 + $0x84] ss:$16 sps:$4 sm:$0xff]   ;;  %v10575_v52 = vld [vmem:[#allocation2 + $0x8c] ss:$16 sps:$4 sm:$0xff]  }
 0x168   :  { %v10570_v53 = vld [vmem:[#allocation2 + $0x80] ss:$16 sps:$4 sm:$0xff]   ;;  %v10573_v54 = vld [vmem:[#allocation2 + $0x88] ss:$16 sps:$4 sm:$0xff]   ;;  %v10578_v55 = vld [vmem:[#allocation2 + $0xa4] ss:$16 sps:$4 sm:$0xff]  }
 0x169   :  { %531 = vmatpush1.bf16.msra.mxu0 %v10524_v19  ;;  %584 = vmatpush1.bf16.msra.mxu1 %v10525_v20  ;;  %v10581_v56 = vld [vmem:[#allocation2 + $0xac] ss:$16 sps:$4 sm:$0xff]   ;;  %v10576_v57 = vld [vmem:[#allocation2 + $0xa0] ss:$16 sps:$4 sm:$0xff]   ;;  %v10579_v58 = vld [vmem:[#allocation2 + $0xa8] ss:$16 sps:$4 sm:$0xff]  }
 0x16a   :  { %532 = vmatprep.subr.bf16.mxu0 %v10526_v21  ;;  %585 = vmatprep.subr.bf16.mxu1 %v10528_v22  ;;  %v10584_v59 = vld [vmem:[#allocation2 + $0xc4] ss:$16 sps:$4 sm:$0xff]   ;;  %v10587_v60 = vld [vmem:[#allocation2 + $0xcc] ss:$16 sps:$4 sm:$0xff]   ;;  %v10582_v61 = vld [vmem:[#allocation2 + $0xc0] ss:$16 sps:$4 sm:$0xff]  }
 0x16b   :  { %v10585_v62 = vld [vmem:[#allocation2 + $0xc8] ss:$16 sps:$4 sm:$0xff]   ;;  %v10590_v63 = vld [vmem:[#allocation2 + $0xe4] ss:$16 sps:$4 sm:$0xff]   ;;  %v10593_v1 = vld [vmem:[#allocation2 + $0xec] ss:$16 sps:$4 sm:$0xff]  }
 0x16c   :  { %v10588_v2 = vld [vmem:[#allocation2 + $0xe0] ss:$16 sps:$4 sm:$0xff]   ;;  %v10591_v3 = vld [vmem:[#allocation2 + $0xe8] ss:$16 sps:$4 sm:$0xff]   ;;  %v10596_v4 = vld [vmem:[#allocation2 + $0x204] ss:$16 sps:$4 sm:$0xff]  }
 0x16d   :  { %533 = vmatpush1.bf16.msra.mxu0 %v10530_v23  ;;  %586 = vmatpush1.bf16.msra.mxu1 %v10531_v24  ;;  %v10599_v5 = vld [vmem:[#allocation2 + $0x20c] ss:$16 sps:$4 sm:$0xff]   ;;  %v10594_v6 = vld [vmem:[#allocation2 + $0x200] ss:$16 sps:$4 sm:$0xff]   ;;  %v10597_v7 = vld [vmem:[#allocation2 + $0x208] ss:$16 sps:$4 sm:$0xff]  }
 0x16e   :  { %534 = vmatprep.subr.bf16.mxu0 %v10532_v25  ;;  %587 = vmatprep.subr.bf16.mxu1 %v10534_v26  ;;  %v10602_v8 = vld [vmem:[#allocation2 + $0x224] ss:$16 sps:$4 sm:$0xff]   ;;  %v10605_v9 = vld [vmem:[#allocation2 + $0x22c] ss:$16 sps:$4 sm:$0xff]   ;;  %v10600_v10 = vld [vmem:[#allocation2 + $0x220] ss:$16 sps:$4 sm:$0xff]  }
 0x16f   :  { %v10603_v11 = vld [vmem:[#allocation2 + $0x228] ss:$16 sps:$4 sm:$0xff]   ;;  %v10608_v12 = vld [vmem:[#allocation2 + $0x244] ss:$16 sps:$4 sm:$0xff]   ;;  %v10611_v13 = vld [vmem:[#allocation2 + $0x24c] ss:$16 sps:$4 sm:$0xff]  }
 0x170   :  { %v10606_v14 = vld [vmem:[#allocation2 + $0x240] ss:$16 sps:$4 sm:$0xff]   ;;  %v10609_v15 = vld [vmem:[#allocation2 + $0x248] ss:$16 sps:$4 sm:$0xff]   ;;  %v10614_v16 = vld [vmem:[#allocation2 + $0x264] ss:$16 sps:$4 sm:$0xff]  }
 0x171   :  { %535 = vmatpush1.bf16.msra.mxu0 %v10536_v27  ;;  %588 = vmatpush1.bf16.msra.mxu1 %v10537_v28  ;;  %v10617_v17 = vld [vmem:[#allocation2 + $0x26c] ss:$16 sps:$4 sm:$0xff]   ;;  %v10612_v18 = vld [vmem:[#allocation2 + $0x260] ss:$16 sps:$4 sm:$0xff]   ;;  %v10615_v19 = vld [vmem:[#allocation2 + $0x268] ss:$16 sps:$4 sm:$0xff]  }
 0x172   :  { %536 = vmatprep.subr.bf16.mxu0 %v10538_v29  ;;  %589 = vmatprep.subr.bf16.mxu1 %v10540_v30  ;;  %v10620_v20 = vld [vmem:[#allocation2 + $0x284] ss:$16 sps:$4 sm:$0xff]   ;;  %v10623_v21 = vld [vmem:[#allocation2 + $0x28c] ss:$16 sps:$4 sm:$0xff]   ;;  %v10618_v22 = vld [vmem:[#allocation2 + $0x280] ss:$16 sps:$4 sm:$0xff]  }
 0x173   :  { %v10621_v23 = vld [vmem:[#allocation2 + $0x288] ss:$16 sps:$4 sm:$0xff]   ;;  %v10626_v24 = vld [vmem:[#allocation2 + $0x2a4] ss:$16 sps:$4 sm:$0xff]   ;;  %v10629_v25 = vld [vmem:[#allocation2 + $0x2ac] ss:$16 sps:$4 sm:$0xff]  }
 0x174   :  { %v10624_v26 = vld [vmem:[#allocation2 + $0x2a0] ss:$16 sps:$4 sm:$0xff]   ;;  %v10627_v27 = vld [vmem:[#allocation2 + $0x2a8] ss:$16 sps:$4 sm:$0xff]   ;;  %v10632_v28 = vld [vmem:[#allocation2 + $0x2c4] ss:$16 sps:$4 sm:$0xff]  }
 0x175   :  { %537 = vmatpush1.bf16.msra.mxu0 %v10542_v31  ;;  %590 = vmatpush1.bf16.msra.mxu1 %v10543_v32  ;;  %v10635_v29 = vld [vmem:[#allocation2 + $0x2cc] ss:$16 sps:$4 sm:$0xff]   ;;  %v10630_v30 = vld [vmem:[#allocation2 + $0x2c0] ss:$16 sps:$4 sm:$0xff]   ;;  %v10633_v31 = vld [vmem:[#allocation2 + $0x2c8] ss:$16 sps:$4 sm:$0xff]  }
 0x176   :  { %823 = vmatprep.subr.bf16.mxu0 %v10547_v33  ;;  %876 = vmatprep.subr.bf16.mxu1 %v10550_v34  ;;  %v10638_v32 = vld [vmem:[#allocation2 + $0x2e4] ss:$16 sps:$4 sm:$0xff]   ;;  %v10641_v33 = vld [vmem:[#allocation2 + $0x2ec] ss:$16 sps:$4 sm:$0xff]   ;;  %v10636_v34 = vld [vmem:[#allocation2 + $0x2e0] ss:$16 sps:$4 sm:$0xff]  }
 0x177   :  { %s9244_s23 = sshll.u32 %s12419_s3, 4  ;;  %s9245_s23 = int_to_ptr.vmem [resolvable:$true] %s9244_s23 }
 0x178   :  { %555 = vmatmul.mubr.bf16.vlgmr.msra.gmra.mrb[0].mxu0 %v12753_v35  ;;  %608 = vmatmul.mubr.bf16.vlgmr.msra.gmra.mrb[0].mxu1 %v12753_v35  ;;  %s12352_s26 = scalar_lea.vmem %s9245_s23, 16  ;;  %s12356_s10 = scalar_lea.vmem %s9245_s23, 32 }
 0x179   :  { %824 = vmatpush1.bf16.msra.mxu0 %v10545_v36  ;;  %877 = vmatpush1.bf16.msra.mxu1 %v10548_v37  ;;  %v10639_v36 = vld [vmem:[#allocation2 + $0x2e8] ss:$16 sps:$4 sm:$0xff]   ;;  %v10644_v37 = vld [vmem:[#allocation2 + $0x304] ss:$16 sps:$4 sm:$0xff]   ;;  %p12353_p4 = scmp.ne.s32.totalorder %s9245_s23, %s12352_s26  ;;  %p12357_p5 = scmp.lt.s32.totalorder %s9245_s23, %s9245_s23 }
 0x17a   :  { %825 = vmatprep.subr.bf16.mxu0 %v10553_v38  ;;  %878 = vmatprep.subr.bf16.mxu1 %v10556_v39  ;;  %v10647_v38 = vld [vmem:[#allocation2 + $0x30c] ss:$16 sps:$4 sm:$0xff]   ;;  %v10642_v39 = vld [vmem:[#allocation2 + $0x300] ss:$16 sps:$4 sm:$0xff]   ;;  %p12358_p6 = scmp.lt.s32.totalorder %s12356_s10, %s12352_s26 }
 0x17b   :  { %564 = vmatprep.mubr.bf16.mxu0 %v12418_v0  ;;  %617 = vmatprep.mubr.bf16.mxu1 %v12418_v0 }
 0x17c   :  { %p12359_p7 = por %p12358_p6, %p12357_p5 }
 0x17d   :  { %826 = vmatpush1.bf16.msra.mxu0 %v10551_v40  ;;  %879 = vmatpush1.bf16.msra.mxu1 %v10554_v41  ;;  %v10645_v40 = vld [vmem:[#allocation2 + $0x308] ss:$16 sps:$4 sm:$0xff]   ;;  %v10650_v41 = vld [vmem:[#allocation2 + $0x324] ss:$16 sps:$4 sm:$0xff]  }
 0x17e   :  { %827 = vmatprep.subr.bf16.mxu0 %v10560_v42  ;;  %880 = vmatprep.subr.bf16.mxu1 %v10563_v43  ;;  %v10653_v42 = vld [vmem:[#allocation2 + $0x32c] ss:$16 sps:$4 sm:$0xff]   ;;  %v10648_v43 = vld [vmem:[#allocation2 + $0x320] ss:$16 sps:$4 sm:$0xff]   ;;  %p12360_p8 = pnand %p12359_p7, %p12353_p4 }
 0x180   :  { %565 = vmatmul.mubr.bf16.gmra.mrb[4].mxu0 %v12762_v44  ;;  %618 = vmatmul.mubr.bf16.gmra.mrb[4].mxu1 %v12762_v44 }
 0x181   :  { %828 = vmatpush1.bf16.msra.mxu0 %v10558_v45  ;;  %881 = vmatpush1.bf16.msra.mxu1 %v10561_v46  ;;  %v10651_v45 = vld [vmem:[#allocation2 + $0x328] ss:$16 sps:$4 sm:$0xff]   ;;  %v10656_v46 = vld [vmem:[#allocation2 + $0x344] ss:$16 sps:$4 sm:$0xff]  }
 0x182   :  { %829 = vmatprep.subr.bf16.mxu0 %v10566_v47  ;;  %882 = vmatprep.subr.bf16.mxu1 %v10569_v48  ;;  %v10659_v47 = vld [vmem:[#allocation2 + $0x34c] ss:$16 sps:$4 sm:$0xff]   ;;  %v10654_v48 = vld [vmem:[#allocation2 + $0x340] ss:$16 sps:$4 sm:$0xff]  }
 0x183   :  { %855 = vmatprep.mubr.bf16.mxu0 %v12418_v0  ;;  %908 = vmatprep.mubr.bf16.mxu1 %v12418_v0 }
 0x185   :  { %830 = vmatpush1.bf16.msra.mxu0 %v10564_v49  ;;  %883 = vmatpush1.bf16.msra.mxu1 %v10567_v50  ;;  %v10657_v49 = vld [vmem:[#allocation2 + $0x348] ss:$16 sps:$4 sm:$0xff]   ;;  %v10662_v50 = vld [vmem:[#allocation2 + $0x364] ss:$16 sps:$4 sm:$0xff]  }
 0x186   :  { %831 = vmatprep.subr.bf16.mxu0 %v10572_v51  ;;  %884 = vmatprep.subr.bf16.mxu1 %v10575_v52  ;;  %v10665_v51 = vld [vmem:[#allocation2 + $0x36c] ss:$16 sps:$4 sm:$0xff]   ;;  %v10660_v52 = vld [vmem:[#allocation2 + $0x360] ss:$16 sps:$4 sm:$0xff]  }
 0x189   :  { %832 = vmatpush1.bf16.msra.mxu0 %v10570_v53  ;;  %885 = vmatpush1.bf16.msra.mxu1 %v10573_v54  ;;  %v10663_v53 = vld [vmem:[#allocation2 + $0x368] ss:$16 sps:$4 sm:$0xff]   ;;  %v10668_v54 = vld [vmem:[#allocation2 + $0x384] ss:$16 sps:$4 sm:$0xff]  }
 0x18a   :  { %833 = vmatprep.subr.bf16.mxu0 %v10578_v55  ;;  %886 = vmatprep.subr.bf16.mxu1 %v10581_v56  ;;  %v10671_v55 = vld [vmem:[#allocation2 + $0x38c] ss:$16 sps:$4 sm:$0xff]   ;;  %v10666_v56 = vld [vmem:[#allocation2 + $0x380] ss:$16 sps:$4 sm:$0xff]  }
 0x18d   :  { %834 = vmatpush1.bf16.msra.mxu0 %v10576_v57  ;;  %887 = vmatpush1.bf16.msra.mxu1 %v10579_v58  ;;  %v10669_v57 = vld [vmem:[#allocation2 + $0x388] ss:$16 sps:$4 sm:$0xff]   ;;  %v10674_v58 = vld [vmem:[#allocation2 + $0x3a4] ss:$16 sps:$4 sm:$0xff]  }
 0x18e   :  { %835 = vmatprep.subr.bf16.mxu0 %v10584_v59  ;;  %888 = vmatprep.subr.bf16.mxu1 %v10587_v60  ;;  %v10677_v59 = vld [vmem:[#allocation2 + $0x3ac] ss:$16 sps:$4 sm:$0xff]   ;;  %v10672_v60 = vld [vmem:[#allocation2 + $0x3a0] ss:$16 sps:$4 sm:$0xff]  }
 0x191   :  { %836 = vmatpush1.bf16.msra.mxu0 %v10582_v61  ;;  %889 = vmatpush1.bf16.msra.mxu1 %v10585_v62  ;;  %v10675_v61 = vld [vmem:[#allocation2 + $0x3a8] ss:$16 sps:$4 sm:$0xff]   ;;  %v10680_v62 = vld [vmem:[#allocation2 + $0x3c4] ss:$16 sps:$4 sm:$0xff]  }
 0x192   :  { %837 = vmatprep.subr.bf16.mxu0 %v10590_v63  ;;  %890 = vmatprep.subr.bf16.mxu1 %v10593_v1  ;;  %v10683_v63 = vld [vmem:[#allocation2 + $0x3cc] ss:$16 sps:$4 sm:$0xff]   ;;  %v10678_v1 = vld [vmem:[#allocation2 + $0x3c0] ss:$16 sps:$4 sm:$0xff]  }
 0x195   :  { %838 = vmatpush1.bf16.msra.mxu0 %v10588_v2  ;;  %891 = vmatpush1.bf16.msra.mxu1 %v10591_v3  ;;  %v10681_v2 = vld [vmem:[#allocation2 + $0x3c8] ss:$16 sps:$4 sm:$0xff]   ;;  %v10686_v3 = vld [vmem:[#allocation2 + $0x3e4] ss:$16 sps:$4 sm:$0xff]  }
 0x196   :  { %1121 = vmatprep.subr.bf16.mxu0 %v10596_v4  ;;  %1174 = vmatprep.subr.bf16.mxu1 %v10599_v5  ;;  %v10689_v4 = vld [vmem:[#allocation2 + $0x3ec] ss:$16 sps:$4 sm:$0xff]   ;;  %v10684_v5 = vld [vmem:[#allocation2 + $0x3e0] ss:$16 sps:$4 sm:$0xff]  }
 0x198   :  { %856 = vmatmul.mubr.bf16.vlgmr.msra.gmra.mrb[8].mxu0 %v12753_v35  ;;  %909 = vmatmul.mubr.bf16.vlgmr.msra.gmra.mrb[8].mxu1 %v12753_v35 }
 0x199   :  { %1122 = vmatpush1.bf16.msra.mxu0 %v10594_v6  ;;  %1175 = vmatpush1.bf16.msra.mxu1 %v10597_v7  ;;  %v10687_v6 = vld [vmem:[#allocation2 + $0x3e8] ss:$16 sps:$4 sm:$0xff]   ;;  %v10692_v7 = vld [vmem:[#allocation2 + $0x404] ss:$16 sps:$4 sm:$0xff]  }
 0x19a   :  { %1123 = vmatprep.subr.bf16.mxu0 %v10602_v8  ;;  %1176 = vmatprep.subr.bf16.mxu1 %v10605_v9  ;;  %v10695_v8 = vld [vmem:[#allocation2 + $0x40c] ss:$16 sps:$4 sm:$0xff]   ;;  %v10690_v9 = vld [vmem:[#allocation2 + $0x400] ss:$16 sps:$4 sm:$0xff]  }
 0x19b   :  { %865 = vmatprep.mubr.bf16.mxu0 %v12418_v0  ;;  %918 = vmatprep.mubr.bf16.mxu1 %v12418_v0 }
 0x19d   :  { %1124 = vmatpush1.bf16.msra.mxu0 %v10600_v10  ;;  %1177 = vmatpush1.bf16.msra.mxu1 %v10603_v11  ;;  %v10693_v10 = vld [vmem:[#allocation2 + $0x408] ss:$16 sps:$4 sm:$0xff]   ;;  %v10698_v11 = vld [vmem:[#allocation2 + $0x424] ss:$16 sps:$4 sm:$0xff]  }
 0x19e   :  { %1125 = vmatprep.subr.bf16.mxu0 %v10608_v12  ;;  %1178 = vmatprep.subr.bf16.mxu1 %v10611_v13  ;;  %v10701_v12 = vld [vmem:[#allocation2 + $0x42c] ss:$16 sps:$4 sm:$0xff]   ;;  %v10696_v13 = vld [vmem:[#allocation2 + $0x420] ss:$16 sps:$4 sm:$0xff]  }
 0x1a0   :  { %866 = vmatmul.mubr.bf16.gmra.mrb[12].mxu0 %v12762_v44  ;;  %919 = vmatmul.mubr.bf16.gmra.mrb[12].mxu1 %v12762_v44 }
 0x1a1   :  { %1126 = vmatpush1.bf16.msra.mxu0 %v10606_v14  ;;  %1179 = vmatpush1.bf16.msra.mxu1 %v10609_v15  ;;  %v10699_v14 = vld [vmem:[#allocation2 + $0x428] ss:$16 sps:$4 sm:$0xff]   ;;  %v10704_v15 = vld [vmem:[#allocation2 + $0x444] ss:$16 sps:$4 sm:$0xff]  }
 0x1a2   :  { %1127 = vmatprep.subr.bf16.mxu0 %v10614_v16  ;;  %1180 = vmatprep.subr.bf16.mxu1 %v10617_v17  ;;  %v10707_v16 = vld [vmem:[#allocation2 + $0x44c] ss:$16 sps:$4 sm:$0xff]   ;;  %v10702_v17 = vld [vmem:[#allocation2 + $0x440] ss:$16 sps:$4 sm:$0xff]  }
 0x1a3   :  { %1153 = vmatprep.mubr.bf16.mxu0 %v12418_v0  ;;  %1206 = vmatprep.mubr.bf16.mxu1 %v12418_v0 }
 0x1a5   :  { %1128 = vmatpush1.bf16.msra.mxu0 %v10612_v18  ;;  %1181 = vmatpush1.bf16.msra.mxu1 %v10615_v19  ;;  %v10705_v18 = vld [vmem:[#allocation2 + $0x448] ss:$16 sps:$4 sm:$0xff]   ;;  %v10710_v19 = vld [vmem:[#allocation2 + $0x464] ss:$16 sps:$4 sm:$0xff]  }
 0x1a6   :  { %1129 = vmatprep.subr.bf16.mxu0 %v10620_v20  ;;  %1182 = vmatprep.subr.bf16.mxu1 %v10623_v21  ;;  %v10713_v20 = vld [vmem:[#allocation2 + $0x46c] ss:$16 sps:$4 sm:$0xff]   ;;  %v10708_v21 = vld [vmem:[#allocation2 + $0x460] ss:$16 sps:$4 sm:$0xff]  }
 0x1a9   :  { %1130 = vmatpush1.bf16.msra.mxu0 %v10618_v22  ;;  %1183 = vmatpush1.bf16.msra.mxu1 %v10621_v23  ;;  %v10716_v22 = vld [vmem:[#allocation2 + $0x484] ss:$16 sps:$4 sm:$0xff]   ;;  %v10719_v23 = vld [vmem:[#allocation2 + $0x48c] ss:$16 sps:$4 sm:$0xff]  }
 0x1aa   :  { %1131 = vmatprep.subr.bf16.mxu0 %v10626_v24  ;;  %1184 = vmatprep.subr.bf16.mxu1 %v10629_v25  ;;  %v10714_v24 = vld [vmem:[#allocation2 + $0x480] ss:$16 sps:$4 sm:$0xff]   ;;  %v10717_v25 = vld [vmem:[#allocation2 + $0x488] ss:$16 sps:$4 sm:$0xff]  }
 0x1ad   :  { %1132 = vmatpush1.bf16.msra.mxu0 %v10624_v26  ;;  %1185 = vmatpush1.bf16.msra.mxu1 %v10627_v27  ;;  %v10722_v26 = vld [vmem:[#allocation2 + $0x4a4] ss:$16 sps:$4 sm:$0xff]   ;;  %v10725_v27 = vld [vmem:[#allocation2 + $0x4ac] ss:$16 sps:$4 sm:$0xff]  }
 0x1ae   :  { %1133 = vmatprep.subr.bf16.mxu0 %v10632_v28  ;;  %1186 = vmatprep.subr.bf16.mxu1 %v10635_v29  ;;  %v10720_v28 = vld [vmem:[#allocation2 + $0x4a0] ss:$16 sps:$4 sm:$0xff]   ;;  %v10728_v29 = vld [vmem:[#allocation2 + $0x4c4] ss:$16 sps:$4 sm:$0xff]  }
 0x1b1   :  { %1134 = vmatpush1.bf16.msra.mxu0 %v10630_v30  ;;  %1187 = vmatpush1.bf16.msra.mxu1 %v10633_v31  ;;  %v10731_v30 = vld [vmem:[#allocation2 + $0x4cc] ss:$16 sps:$4 sm:$0xff]   ;;  %v10726_v31 = vld [vmem:[#allocation2 + $0x4c0] ss:$16 sps:$4 sm:$0xff]  }
 0x1b2   :  { %1135 = vmatprep.subr.bf16.mxu0 %v10638_v32  ;;  %1188 = vmatprep.subr.bf16.mxu1 %v10641_v33  ;;  %v10729_v32 = vld [vmem:[#allocation2 + $0x4c8] ss:$16 sps:$4 sm:$0xff]   ;;  %v10734_v33 = vld [vmem:[#allocation2 + $0x4e4] ss:$16 sps:$4 sm:$0xff]  }
 0x1b5   :  { %1136 = vmatpush1.bf16.msra.mxu0 %v10636_v34  ;;  %1189 = vmatpush1.bf16.msra.mxu1 %v10639_v36  ;;  %v10737_v34 = vld [vmem:[#allocation2 + $0x4ec] ss:$16 sps:$4 sm:$0xff]   ;;  %v10732_v36 = vld [vmem:[#allocation2 + $0x4e0] ss:$16 sps:$4 sm:$0xff]  }
 0x1b6   :  { %1468 = vmatprep.subr.bf16.mxu0 %v10644_v37  ;;  %1521 = vmatprep.subr.bf16.mxu1 %v10647_v38  ;;  %v10735_v37 = vld [vmem:[#allocation2 + $0x4e8] ss:$16 sps:$4 sm:$0xff]   ;;  %v11954_v38 = vld [vmem:[%s13927_s13] sm:$0xff]  }
 0x1b8   :  { %1154 = vmatmul.mubr.bf16.vlgmr.msra.gmra.mrb[16].mxu0 %v12753_v35  ;;  %1207 = vmatmul.mubr.bf16.vlgmr.msra.gmra.mrb[16].mxu1 %v12753_v35 }
 0x1b9   :  { %1469 = vmatpush1.bf16.msra.mxu0 %v10642_v39  ;;  %1522 = vmatpush1.bf16.msra.mxu1 %v10645_v40  ;;  %v11955_v39 = vld [vmem:[%s13927_s13 + $0x8] sm:$0xff]  }
 0x1ba   :  { %1470 = vmatprep.subr.bf16.mxu0 %v10650_v41  ;;  %1523 = vmatprep.subr.bf16.mxu1 %v10653_v42  ;;  %v10738_v40 = vld [vmem:[#allocation10 + $0x400] ss:$16 sps:$4 sm:$0xff]   ;;  %v10740_v41 = vld [vmem:[#allocation10 + $0x404] ss:$16 sps:$4 sm:$0xff]   ;;  %v10741_v42 = vld [vmem:[#allocation10 + $0x408] ss:$16 sps:$4 sm:$0xff]  }
 0x1bb   :  { %1163 = vmatprep.mubr.bf16.mxu0 %v12418_v0  ;;  %1216 = vmatprep.mubr.bf16.mxu1 %v12418_v0 }
 0x1bd   :  { %1471 = vmatpush1.bf16.msra.mxu0 %v10648_v43  ;;  %1524 = vmatpush1.bf16.msra.mxu1 %v10651_v45  ;;  %v10743_v43 = vld [vmem:[#allocation10 + $0x40c] ss:$16 sps:$4 sm:$0xff]   ;;  %v10744_v45 = vld [vmem:[#allocation10 + $0x420] ss:$16 sps:$4 sm:$0xff]  }
 0x1be   :  { %1472 = vmatprep.subr.bf16.mxu0 %v10656_v46  ;;  %1525 = vmatprep.subr.bf16.mxu1 %v10659_v47  ;;  %v10746_v46 = vld [vmem:[#allocation10 + $0x424] ss:$16 sps:$4 sm:$0xff]   ;;  %v10747_v47 = vld [vmem:[#allocation10 + $0x428] ss:$16 sps:$4 sm:$0xff]  }
 0x1c0   :  { %1164 = vmatmul.mubr.bf16.gmra.mrb[20].mxu0 %v12762_v44  ;;  %1217 = vmatmul.mubr.bf16.gmra.mrb[20].mxu1 %v12762_v44 }
 0x1c1   :  { %1473 = vmatpush1.bf16.msra.mxu0 %v10654_v48  ;;  %1526 = vmatpush1.bf16.msra.mxu1 %v10657_v49  ;;  %v10749_v48 = vld [vmem:[#allocation10 + $0x42c] ss:$16 sps:$4 sm:$0xff]  }
 0x1c2   :  { %1474 = vmatprep.subr.bf16.mxu0 %v10662_v50  ;;  %1527 = vmatprep.subr.bf16.mxu1 %v10665_v51  ;;  %v10755_v49 = vld [vmem:[#allocation10 + $0x44c] ss:$16 sps:$4 sm:$0xff]   ;;  %v10750_v50 = vld [vmem:[#allocation10 + $0x440] ss:$16 sps:$4 sm:$0xff]   ;;  %v10753_v51 = vld [vmem:[#allocation10 + $0x448] ss:$16 sps:$4 sm:$0xff]  }
 0x1c3   :  { %1500 = vmatprep.mubr.bf16.mxu0 %v12418_v0  ;;  %1553 = vmatprep.mubr.bf16.mxu1 %v12418_v0 }
 0x1c5   :  { %1475 = vmatpush1.bf16.msra.mxu0 %v10660_v52  ;;  %1528 = vmatpush1.bf16.msra.mxu1 %v10663_v53  ;;  %v10756_v52 = vld [vmem:[#allocation10 + $0x460] ss:$16 sps:$4 sm:$0xff]   ;;  %v10758_v53 = vld [vmem:[#allocation10 + $0x464] ss:$16 sps:$4 sm:$0xff]  }
 0x1c6   :  { %1476 = vmatprep.subr.bf16.mxu0 %v10668_v54  ;;  %1529 = vmatprep.subr.bf16.mxu1 %v10671_v55  ;;  %v10759_v54 = vld [vmem:[#allocation10 + $0x468] ss:$16 sps:$4 sm:$0xff]   ;;  %v10761_v55 = vld [vmem:[#allocation10 + $0x46c] ss:$16 sps:$4 sm:$0xff]  }
 0x1c9   :  { %1477 = vmatpush1.bf16.msra.mxu0 %v10666_v56  ;;  %1530 = vmatpush1.bf16.msra.mxu1 %v10669_v57  ;;  %v10764_v56 = vld [vmem:[#allocation10 + $0x484] ss:$16 sps:$4 sm:$0xff]   ;;  %v10767_v57 = vld [vmem:[#allocation10 + $0x48c] ss:$16 sps:$4 sm:$0xff]  }
 0x1ca   :  { %1478 = vmatprep.subr.bf16.mxu0 %v10674_v58  ;;  %1531 = vmatprep.subr.bf16.mxu1 %v10677_v59  ;;  %v10762_v58 = vld [vmem:[#allocation10 + $0x480] ss:$16 sps:$4 sm:$0xff]   ;;  %v10765_v59 = vld [vmem:[#allocation10 + $0x488] ss:$16 sps:$4 sm:$0xff]  }
 0x1cd   :  { %1479 = vmatpush1.bf16.msra.mxu0 %v10672_v60  ;;  %1532 = vmatpush1.bf16.msra.mxu1 %v10675_v61  ;;  %v10770_v60 = vld [vmem:[#allocation10 + $0x4a4] ss:$16 sps:$4 sm:$0xff]   ;;  %v10773_v61 = vld [vmem:[#allocation10 + $0x4ac] ss:$16 sps:$4 sm:$0xff]  }
 0x1ce   :  { %1480 = vmatprep.subr.bf16.mxu0 %v10680_v62  ;;  %1533 = vmatprep.subr.bf16.mxu1 %v10683_v63  ;;  %v10768_v62 = vld [vmem:[#allocation10 + $0x4a0] ss:$16 sps:$4 sm:$0xff]   ;;  %v10771_v63 = vld [vmem:[#allocation10 + $0x4a8] ss:$16 sps:$4 sm:$0xff]  }
 0x1d1   :  { %1481 = vmatpush1.bf16.msra.mxu0 %v10678_v1  ;;  %1534 = vmatpush1.bf16.msra.mxu1 %v10681_v2  ;;  %v10776_v1 = vld [vmem:[#allocation10 + $0x4c4] ss:$16 sps:$4 sm:$0xff]   ;;  %v10774_v2 = vld [vmem:[#allocation10 + $0x4c0] ss:$16 sps:$4 sm:$0xff]  }
 0x1d2   :  { %1482 = vmatprep.subr.bf16.mxu0 %v10686_v3  ;;  %1535 = vmatprep.subr.bf16.mxu1 %v10689_v4  ;;  %v10777_v3 = vld [vmem:[#allocation10 + $0x4c8] ss:$16 sps:$4 sm:$0xff]   ;;  %v10779_v4 = vld [vmem:[#allocation10 + $0x4cc] ss:$16 sps:$4 sm:$0xff]  }
 0x1d5   :  { %1483 = vmatpush1.bf16.msra.mxu0 %v10684_v5  ;;  %1536 = vmatpush1.bf16.msra.mxu1 %v10687_v6  ;;  %v10782_v5 = vld [vmem:[#allocation10 + $0x4e4] ss:$16 sps:$4 sm:$0xff]   ;;  %v10785_v6 = vld [vmem:[#allocation10 + $0x4ec] ss:$16 sps:$4 sm:$0xff]  }
 0x1d6   :  { %1815 = vmatprep.subr.bf16.mxu0 %v10692_v7  ;;  %1868 = vmatprep.subr.bf16.mxu1 %v10695_v8  ;;  %v10780_v7 = vld [vmem:[#allocation10 + $0x4e0] ss:$16 sps:$4 sm:$0xff]   ;;  %v10783_v8 = vld [vmem:[#allocation10 + $0x4e8] ss:$16 sps:$4 sm:$0xff]  }
 0x1d8   :  { %1501 = vmatmul.mubr.bf16.vlgmr.msra.gmra.mrb[24].mxu0 %v12753_v35  ;;  %1554 = vmatmul.mubr.bf16.vlgmr.msra.gmra.mrb[24].mxu1 %v12753_v35  ;;  %v10711_v35 = vld [vmem:[#allocation2 + $0x468] ss:$16 sps:$4 sm:$0xff]  }
 0x1d9   :  { %1816 = vmatpush1.bf16.msra.mxu0 %v10690_v9  ;;  %1869 = vmatpush1.bf16.msra.mxu1 %v10693_v10  ;;  %v10788_v9 = vld [vmem:[#allocation10 + $0x504] ss:$16 sps:$4 sm:$0xff]   ;;  %v10791_v10 = vld [vmem:[#allocation10 + $0x50c] ss:$16 sps:$4 sm:$0xff]  }
 0x1da   :  { %1817 = vmatprep.subr.bf16.mxu0 %v10698_v11  ;;  %1870 = vmatprep.subr.bf16.mxu1 %v10701_v12  ;;  %v10786_v11 = vld [vmem:[#allocation10 + $0x500] ss:$16 sps:$4 sm:$0xff]   ;;  %v10789_v12 = vld [vmem:[#allocation10 + $0x508] ss:$16 sps:$4 sm:$0xff]  }
 0x1db   :  { %1510 = vmatprep.mubr.bf16.mxu0 %v12418_v0  ;;  %1563 = vmatprep.mubr.bf16.mxu1 %v12418_v0 }
 0x1dd   :  { %1818 = vmatpush1.bf16.msra.mxu0 %v10696_v13  ;;  %1871 = vmatpush1.bf16.msra.mxu1 %v10699_v14  ;;  %v644_v13 = vlaneseq  ;;  %v10794_v14 = vld [vmem:[#allocation10 + $0x524] ss:$16 sps:$4 sm:$0xff]  }
 0x1de   :  { %1819 = vmatprep.subr.bf16.mxu0 %v10704_v15  ;;  %1872 = vmatprep.subr.bf16.mxu1 %v10707_v16  ;;  %v10797_v15 = vld [vmem:[#allocation10 + $0x52c] ss:$16 sps:$4 sm:$0xff]   ;;  %v10792_v16 = vld [vmem:[#allocation10 + $0x520] ss:$16 sps:$4 sm:$0xff]  }
 0x1e0   :  { %1511 = vmatmul.mubr.bf16.gmra.mrb[28].mxu0 %v12762_v44  ;;  %1564 = vmatmul.mubr.bf16.gmra.mrb[28].mxu1 %v12762_v44  ;;  %v10723_v44 = vld [vmem:[#allocation2 + $0x4a8] ss:$16 sps:$4 sm:$0xff]  }
 0x1e1   :  { %1820 = vmatpush1.bf16.msra.mxu0 %v10702_v17  ;;  %1873 = vmatpush1.bf16.msra.mxu1 %v10705_v18  ;;  %v10795_v17 = vld [vmem:[#allocation10 + $0x528] ss:$16 sps:$4 sm:$0xff]   ;;  %v12800_v18 = vshrl.u32 %v644_v13, 7  ;;  %v10810_v13 = vld [vmem:[#allocation10 + $0x580] ss:$16 sps:$4 sm:$0xff]  }
 0x1e2   :  { %1821 = vmatprep.subr.bf16.mxu0 %v10710_v19  ;;  %1874 = vmatprep.subr.bf16.mxu1 %v10713_v20 }
 0x1e3   :  { %1847 = vmatprep.mubr.bf16.mxu0 %v12418_v0  ;;  %1900 = vmatprep.mubr.bf16.mxu1 %v12418_v0  ;;  %vm646_vm0 = vcmp.lt.s32.totalorder %v12800_v18, 7  ;;  %vm1243_vm1 = vcmp.lt.s32.totalorder %v12800_v18, 6  ;;  %vm1590_vm2 = vcmp.lt.s32.totalorder %v12800_v18, 5  ;;  %vm1937_vm3 = vcmp.lt.s32.totalorder %v12800_v18, 4 }
 0x1e5   :  { %1822 = vmatpush1.bf16.msra.mxu0 %v10708_v21  ;;  %1875 = vmatpush1.bf16.msra.mxu1 %v10711_v35 }
 0x1e6   :  { %1823 = vmatprep.subr.bf16.mxu0 %v10716_v22  ;;  %1876 = vmatprep.subr.bf16.mxu1 %v10719_v23 }
 0x1e9   :  { %1824 = vmatpush1.bf16.msra.mxu0 %v10714_v24  ;;  %1877 = vmatpush1.bf16.msra.mxu1 %v10717_v25 }
 0x1ea   :  { %1825 = vmatprep.subr.bf16.mxu0 %v10722_v26  ;;  %1878 = vmatprep.subr.bf16.mxu1 %v10725_v27 }
 0x1ed   :  { %1826 = vmatpush1.bf16.msra.mxu0 %v10720_v28  ;;  %1879 = vmatpush1.bf16.msra.mxu1 %v10723_v44 }
 0x1ee   :  { %1827 = vmatprep.subr.bf16.mxu0 %v10728_v29  ;;  %1880 = vmatprep.subr.bf16.mxu1 %v10731_v30 }
 0x1f1   :  { %1828 = vmatpush1.bf16.msra.mxu0 %v10726_v31  ;;  %1881 = vmatpush1.bf16.msra.mxu1 %v10729_v32 }
 0x1f2   :  { %1829 = vmatprep.subr.bf16.mxu0 %v10734_v33  ;;  %1882 = vmatprep.subr.bf16.mxu1 %v10737_v34  ;;  %v10800_v33 = vld [vmem:[#allocation10 + $0x544] ss:$16 sps:$4 sm:$0xff]   ;;  %v10803_v34 = vld [vmem:[#allocation10 + $0x54c] ss:$16 sps:$4 sm:$0xff]  }
 0x1f5   :  { %1830 = vmatpush1.bf16.msra.mxu0 %v10732_v36  ;;  %1883 = vmatpush1.bf16.msra.mxu1 %v10735_v37 }
 0x1f6   :  { %3020 = vmatprep.subr.bf16.mxu0 %v10740_v41  ;;  %3126 = vmatprep.subr.bf16.mxu1 %v10743_v43 }
 0x1f8   :  { %1848 = vmatmul.mubr.bf16.vlgmr.msra.gmra.mrb[32].mxu0 %v11954_v38  ;;  %1901 = vmatmul.mubr.bf16.vlgmr.msra.gmra.mrb[32].mxu1 %v11954_v38  ;;  %v10798_v38 = vld [vmem:[#allocation10 + $0x540] ss:$16 sps:$4 sm:$0xff]  }
 0x1f9   :  { %1857 = vmatprep.mubr.bf16.mxu0 %v12418_v0  ;;  %1910 = vmatprep.mubr.bf16.mxu1 %v12418_v0  ;;  %v10752_v0 = vld [vmem:[#allocation10 + $0x444] ss:$16 sps:$4 sm:$0xff]  }
 0x1fa   :  { %3021 = vmatpush1.bf16.msra.mxu0 %v10738_v40  ;;  %3127 = vmatpush1.bf16.msra.mxu1 %v10741_v42 }
 0x1fb   :  { %3022 = vmatprep.subr.bf16.mxu0 %v10746_v46  ;;  %3128 = vmatprep.subr.bf16.mxu1 %v10749_v48 }
 0x1fe   :  { %3023 = vmatpush1.bf16.msra.mxu0 %v10744_v45  ;;  %3129 = vmatpush1.bf16.msra.mxu1 %v10747_v47  ;;  %v10806_v45 = vld [vmem:[#allocation10 + $0x564] ss:$16 sps:$4 sm:$0xff]  }
 0x1ff   :  { %3024 = vmatprep.subr.bf16.mxu0 %v10752_v0  ;;  %3130 = vmatprep.subr.bf16.mxu1 %v10755_v49  ;;  %v10804_v49 = vld [vmem:[#allocation10 + $0x560] ss:$16 sps:$4 sm:$0xff]  }
 0x200   :  { %1858 = vmatmul.mubr.bf16.gmra.mrb[36].mxu0 %v11955_v39  ;;  %1911 = vmatmul.mubr.bf16.gmra.mrb[36].mxu1 %v11955_v39  ;;  %v10801_v39 = vld [vmem:[#allocation10 + $0x548] ss:$16 sps:$4 sm:$0xff]  }
 0x202   :  { %3025 = vmatpush1.bf16.msra.mxu0 %v10750_v50  ;;  %3131 = vmatpush1.bf16.msra.mxu1 %v10753_v51 }
 0x203   :  { %3026 = vmatprep.subr.bf16.mxu0 %v10758_v53  ;;  %3132 = vmatprep.subr.bf16.mxu1 %v10761_v55 }
 0x206   :  { %3027 = vmatpush1.bf16.msra.mxu0 %v10756_v52  ;;  %3133 = vmatpush1.bf16.msra.mxu1 %v10759_v54 }
 0x207   :  { %3028 = vmatprep.subr.bf16.mxu0 %v10764_v56  ;;  %3134 = vmatprep.subr.bf16.mxu1 %v10767_v57 }
 0x20a   :  { %3029 = vmatpush1.bf16.msra.mxu0 %v10762_v58  ;;  %3135 = vmatpush1.bf16.msra.mxu1 %v10765_v59 }
 0x20b   :  { %3030 = vmatprep.subr.bf16.mxu0 %v10770_v60  ;;  %3136 = vmatprep.subr.bf16.mxu1 %v10773_v61  ;;  %v10807_v60 = vld [vmem:[#allocation10 + $0x568] ss:$16 sps:$4 sm:$0xff]  }
 0x20e   :  { %3031 = vmatpush1.bf16.msra.mxu0 %v10768_v62  ;;  %3137 = vmatpush1.bf16.msra.mxu1 %v10771_v63 }
 0x20f   :  { %3032 = vmatprep.subr.bf16.mxu0 %v10776_v1  ;;  %3138 = vmatprep.subr.bf16.mxu1 %v10779_v4 }
 0x212   :  { %3033 = vmatpush1.bf16.msra.mxu0 %v10774_v2  ;;  %3139 = vmatpush1.bf16.msra.mxu1 %v10777_v3  ;;  %v10809_v2 = vld [vmem:[#allocation10 + $0x56c] ss:$16 sps:$4 sm:$0xff]  }
 0x213   :  { %3034 = vmatprep.subr.bf16.mxu0 %v10782_v5  ;;  %3140 = vmatprep.subr.bf16.mxu1 %v10785_v6 }
 0x216   :  { %3035 = vmatpush1.bf16.msra.mxu0 %v10780_v7  ;;  %3141 = vmatpush1.bf16.msra.mxu1 %v10783_v8 }
 0x217   :  { %3036 = vmatprep.subr.bf16.mxu0 %v10788_v9  ;;  %3142 = vmatprep.subr.bf16.mxu1 %v10791_v10 }
 0x21a   :  { %3037 = vmatpush1.bf16.msra.mxu0 %v10786_v11  ;;  %3143 = vmatpush1.bf16.msra.mxu1 %v10789_v12  ;;  %v10812_v11 = vld [vmem:[#allocation10 + $0x584] ss:$16 sps:$4 sm:$0xff]   ;;  %v10815_v12 = vld [vmem:[#allocation10 + $0x58c] ss:$16 sps:$4 sm:$0xff]  }
 0x21b   :  { %3038 = vmatprep.subr.bf16.mxu0 %v10794_v14  ;;  %3144 = vmatprep.subr.bf16.mxu1 %v10797_v15  ;;  %v10813_v14 = vld [vmem:[#allocation10 + $0x588] ss:$16 sps:$4 sm:$0xff]   ;;  %v10818_v15 = vld [vmem:[#allocation10 + $0x5a4] ss:$16 sps:$4 sm:$0xff]  }
 0x21e   :  { %3039 = vmatpush1.bf16.msra.mxu0 %v10792_v16  ;;  %3145 = vmatpush1.bf16.msra.mxu1 %v10795_v17  ;;  %v10821_v16 = vld [vmem:[#allocation10 + $0x5ac] ss:$16 sps:$4 sm:$0xff]   ;;  %v10816_v17 = vld [vmem:[#allocation10 + $0x5a0] ss:$16 sps:$4 sm:$0xff]  }
 0x21f   :  { %3040 = vmatprep.subr.bf16.mxu0 %v10800_v33  ;;  %3146 = vmatprep.subr.bf16.mxu1 %v10803_v34 }
 0x222   :  { %3041 = vmatpush1.bf16.msra.mxu0 %v10798_v38  ;;  %3147 = vmatpush1.bf16.msra.mxu1 %v10801_v39  ;;  %v10830_v39 = vld [vmem:[#allocation10 + $0x5e4] ss:$16 sps:$4 sm:$0xff]  }
 0x223   :  { %3042 = vmatprep.subr.bf16.mxu0 %v10806_v45  ;;  %3148 = vmatprep.subr.bf16.mxu1 %v10809_v2 }
 0x226   :  { %3043 = vmatpush1.bf16.msra.mxu0 %v10804_v49  ;;  %3149 = vmatpush1.bf16.msra.mxu1 %v10807_v60  ;;  %v10836_v49 = vld [vmem:[#allocation10 + $0x604] ss:$16 sps:$4 sm:$0xff]  }
 0x227   :  { %3044 = vmatprep.subr.bf16.mxu0 %v10812_v11  ;;  %3150 = vmatprep.subr.bf16.mxu1 %v10815_v12 }
 0x22a   :  { %3045 = vmatpush1.bf16.msra.mxu0 %v10810_v13  ;;  %3151 = vmatpush1.bf16.msra.mxu1 %v10813_v14 }
 0x22b   :  { %3046 = vmatprep.subr.bf16.mxu0 %v10818_v15  ;;  %3152 = vmatprep.subr.bf16.mxu1 %v10821_v16 }
 0x22e   :  { %3047 = vmatpush1.bf16.msra.mxu0 %v10816_v17 }
 0x24b   :  { %v556_v19 = vpop.f32.mrb[0].mxu0  ;;  %v12802_v20 = vpop.f32.mrb[0].mxu1 }
 0x24c   :  { %v628_v21 = vrot.slane %v556_v19, 1  ;;  %v558_v35 = vpop.f32.mrb[1].mxu0  ;;  %v630_v22 = vrot.slane %v12802_v20, 1  ;;  %v611_v23 = vpop.f32.mrb[1].mxu1  ;;  %v10819_v19 = vld [vmem:[#allocation10 + $0x5a8] ss:$16 sps:$4 sm:$0xff]  }
 0x24d   :  { %v560_v24 = vpop.f32.mrb[2].mxu0  ;;  %v631_v25 = vrot.slane %v611_v23, 1  ;;  %v613_v26 = vpop.f32.mrb[2].mxu1  ;;  %v629_v27 = vrot.slane %v558_v35, 1  ;;  %3153 = vmatpush1.bf16.msra.mxu1 %v10819_v19 }
 0x24e   :  { %v632_v28 = vrot.slane %v560_v24, 1  ;;  %v562_v44 = vpop.f32.mrb[3].mxu0  ;;  %v634_v29 = vrot.slane %v613_v26, 1  ;;  %v615_v30 = vpop.f32.mrb[3].mxu1  ;;  %v10827_v26 = vld [vmem:[#allocation10 + $0x5cc] ss:$16 sps:$4 sm:$0xff]  }
 0x24f   :  { %v633_v31 = vrot.slane %v562_v44, 1  ;;  %v635_v32 = vrot.slane %v615_v30, 1  ;;  %v10822_v30 = vld [vmem:[#allocation10 + $0x5c0] ss:$16 sps:$4 sm:$0xff]   ;;  %3154 = vmatprep.subr.bf16.mxu1 %v10827_v26 }
 0x250   :  { %v12808_v36 = vsel %vm646_vm0, %v628_v21, %v632_v28  ;;  %v12812_v37 = vsel %vm646_vm0, %v630_v22, %v634_v29 }
 0x251   :  { %v12816_v40 = vsel %vm646_vm0, %v629_v27, %v633_v31  ;;  %v12820_v41 = vsel %vm646_vm0, %v631_v25, %v635_v32 }
 0x253   :  { %v566_v42 = vpop.f32.mrb[4].mxu0  ;;  %v619_v43 = vpop.f32.mrb[4].mxu1 }
 0x254   :  { %v636_v46 = vrot.slane %v566_v42, 1  ;;  %v568_v47 = vpop.f32.mrb[5].mxu0  ;;  %v638_v48 = vrot.slane %v619_v43, 1  ;;  %v621_v0 = vpop.f32.mrb[5].mxu1  ;;  %v10831_v42 = vld [vmem:[#allocation10 + $0x5e8] ss:$16 sps:$4 sm:$0xff]  }
 0x255   :  { %v637_v50 = vrot.slane %v568_v47, 1  ;;  %v570_v51 = vpop.f32.mrb[6].mxu0  ;;  %v639_v52 = vrot.slane %v621_v0, 1  ;;  %v623_v53 = vpop.f32.mrb[6].mxu1 }
 0x256   :  { %v640_v54 = vrot.slane %v570_v51, 1  ;;  %v572_v55 = vpop.f32.mrb[7].mxu0  ;;  %v651_v56 = vsel %vm646_vm0, %v632_v28, %v636_v46  ;;  %v642_v57 = vrot.slane %v623_v53, 1  ;;  %v625_v58 = vpop.f32.mrb[7].mxu1  ;;  %v653_v59 = vsel %vm646_vm0, %v634_v29, %v638_v48 }
 0x257   :  { %v641_v61 = vrot.slane %v572_v55, 1  ;;  %v652_v62 = vsel %vm646_vm0, %v633_v31, %v637_v50  ;;  %v643_v63 = vrot.slane %v625_v58, 1  ;;  %v654_v1 = vsel %vm646_vm0, %v635_v32, %v639_v52  ;;  %v10825_v31 = vld [vmem:[#allocation10 + $0x5c8] ss:$16 sps:$4 sm:$0xff]  }
 0x258   :  { %v647_v3 = vsel %vm646_vm0, %v636_v46, %v640_v54  ;;  %v12834_v4 = vsel %vm646_vm0, %v640_v54, %v628_v21  ;;  %v649_v5 = vsel %vm646_vm0, %v638_v48, %v642_v57  ;;  %v12840_v6 = vsel %vm646_vm0, %v642_v57, %v630_v22  ;;  %3155 = vmatpush1.bf16.msra.mxu1 %v10825_v31 }
 0x259   :  { %v648_v7 = vsel %vm646_vm0, %v637_v50, %v641_v61  ;;  %v12846_v8 = vsel %vm646_vm0, %v641_v61, %v629_v27  ;;  %v650_v9 = vsel %vm646_vm0, %v639_v52, %v643_v63  ;;  %v12852_v10 = vsel %vm646_vm0, %v643_v63, %v631_v25  ;;  %v10824_v25 = vld [vmem:[#allocation10 + $0x5c4] ss:$16 sps:$4 sm:$0xff]   ;;  %v10839_v50 = vld [vmem:[#allocation10 + $0x60c] ss:$16 sps:$4 sm:$0xff]  }
 0x25a   :  { %3048 = vmatprep.subr.bf16.mxu0 %v10824_v25 }
 0x25b   :  { %3049 = vmatpush1.bf16.msra.mxu0 %v10822_v30 }
 0x25c   :  { %3050 = vmatprep.subr.bf16.mxu0 %v10830_v39 }
 0x26b   :  { %v857_v20 = vpop.f32.mrb[8].mxu0  ;;  %v910_v21 = vpop.f32.mrb[8].mxu1 }
 0x26c   :  { %v12855_v35 = vadd.f32 %v857_v20, %v12808_v36  ;;  %v859_v22 = vpop.f32.mrb[9].mxu0  ;;  %v12858_v23 = vadd.f32 %v910_v21, %v12812_v37  ;;  %v912_v24 = vpop.f32.mrb[9].mxu1 }
 0x26d   :  { %v12861_v27 = vadd.f32 %v859_v22, %v12816_v40  ;;  %v861_v28 = vpop.f32.mrb[10].mxu0  ;;  %v12864_v44 = vadd.f32 %v912_v24, %v12820_v41  ;;  %v914_v29 = vpop.f32.mrb[10].mxu1  ;;  %v10833_v40 = vld [vmem:[#allocation10 + $0x5ec] ss:$16 sps:$4 sm:$0xff]   ;;  %v10828_v41 = vld [vmem:[#allocation10 + $0x5e0] ss:$16 sps:$4 sm:$0xff]  }
 0x26e   :  { %v12866_v32 = vadd.f32 %v861_v28, %v651_v56  ;;  %v863_v33 = vpop.f32.mrb[11].mxu0  ;;  %v12868_v34 = vadd.f32 %v914_v29, %v653_v59  ;;  %v916_v36 = vpop.f32.mrb[11].mxu1  ;;  %3156 = vmatprep.subr.bf16.mxu1 %v10833_v40  ;;  %3051 = vmatpush1.bf16.msra.mxu0 %v10828_v41 }
 0x26f   :  { %v12870_v37 = vadd.f32 %v863_v33, %v652_v62  ;;  %v12872_v38 = vadd.f32 %v916_v36, %v654_v1  ;;  %3157 = vmatpush1.bf16.msra.mxu1 %v10831_v42  ;;  %3073 = vmatprep.subr.bf16.mxu0 %v10836_v49 }
 0x270   :  { %3179 = vmatprep.subr.bf16.mxu1 %v10839_v50 }
 0x273   :  { %v867_v43 = vpop.f32.mrb[12].mxu0  ;;  %v920_v45 = vpop.f32.mrb[12].mxu1 }
 0x274   :  { %v12874_v46 = vadd.f32 %v867_v43, %v647_v3  ;;  %v869_v47 = vpop.f32.mrb[13].mxu0  ;;  %v12876_v48 = vadd.f32 %v920_v45, %v649_v5  ;;  %v922_v0 = vpop.f32.mrb[13].mxu1 }
 0x275   :  { %v12878_v51 = vadd.f32 %v869_v47, %v648_v7  ;;  %v871_v52 = vpop.f32.mrb[14].mxu0  ;;  %v12880_v53 = vadd.f32 %v922_v0, %v650_v9  ;;  %v924_v54 = vpop.f32.mrb[14].mxu1 }
 0x276   :  { %v872_v55 = vadd.f32 %v871_v52, %v12834_v4  ;;  %v873_v56 = vpop.f32.mrb[15].mxu0  ;;  %v925_v57 = vadd.f32 %v924_v54, %v12840_v6  ;;  %v926_v58 = vpop.f32.mrb[15].mxu1 }
 0x277   :  { %v12885_v59 = vadd.f32 %v873_v56, %v12846_v8  ;;  %v12888_v60 = vadd.f32 %v926_v58, %v12852_v10 }
 0x28b   :  { %v1155_v61 = vpop.f32.mrb[16].mxu0  ;;  %v1208_v62 = vpop.f32.mrb[16].mxu1 }
 0x28c   :  { %v1227_v63 = vrot.slane %v1155_v61, 2  ;;  %v1229_v1 = vrot.slane %v1208_v62, 2  ;;  %v1157_v2 = vpop.f32.mrb[17].mxu0  ;;  %v1210_v3 = vpop.f32.mrb[17].mxu1 }
 0x28d   :  { %v1230_v5 = vrot.slane %v1210_v3, 2  ;;  %v1159_v4 = vpop.f32.mrb[18].mxu0  ;;  %v1212_v6 = vpop.f32.mrb[18].mxu1  ;;  %v1228_v8 = vrot.slane %v1157_v2, 2 }
 0x28e   :  { %v1231_v7 = vrot.slane %v1159_v4, 2  ;;  %v1233_v9 = vrot.slane %v1212_v6, 2  ;;  %v1161_v11 = vpop.f32.mrb[19].mxu0  ;;  %v1214_v12 = vpop.f32.mrb[19].mxu1 }
 0x28f   :  { %v1232_v13 = vrot.slane %v1161_v11, 2  ;;  %v1234_v14 = vrot.slane %v1214_v12, 2 }
 0x290   :  { %v1252_v10 = vsel %vm1243_vm1, %v1227_v63, %v1231_v7  ;;  %v1254_v15 = vsel %vm1243_vm1, %v1229_v1, %v1233_v9 }
 0x291   :  { %v12896_v16 = vadd.f32 %v1252_v10, %v12855_v35  ;;  %v12899_v17 = vadd.f32 %v1254_v15, %v12858_v23  ;;  %v1253_v19 = vsel %vm1243_vm1, %v1228_v8, %v1232_v13  ;;  %v1255_v20 = vsel %vm1243_vm1, %v1230_v5, %v1234_v14 }
 0x292   :  { %v12906_v21 = vadd.f32 %v1253_v19, %v12861_v27  ;;  %v12909_v22 = vadd.f32 %v1255_v20, %v12864_v44 }
 0x293   :  { %v1165_v24 = vpop.f32.mrb[20].mxu0  ;;  %v1218_v25 = vpop.f32.mrb[20].mxu1 }
 0x294   :  { %v1235_v26 = vrot.slane %v1165_v24, 2  ;;  %v1237_v35 = vrot.slane %v1218_v25, 2  ;;  %v1167_v28 = vpop.f32.mrb[21].mxu0  ;;  %v1220_v29 = vpop.f32.mrb[21].mxu1 }
 0x295   :  { %v1236_v23 = vrot.slane %v1167_v28, 2  ;;  %v1238_v30 = vrot.slane %v1220_v29, 2  ;;  %v1169_v31 = vpop.f32.mrb[22].mxu0  ;;  %v1222_v33 = vpop.f32.mrb[22].mxu1 }
 0x296   :  { %v1248_v36 = vsel %vm1243_vm1, %v1231_v7, %v1235_v26  ;;  %v1250_v27 = vsel %vm1243_vm1, %v1233_v9, %v1237_v35  ;;  %v1239_v39 = vrot.slane %v1169_v31, 2  ;;  %v1241_v40 = vrot.slane %v1222_v33, 2  ;;  %v1171_v44 = vpop.f32.mrb[23].mxu0  ;;  %v1224_v41 = vpop.f32.mrb[23].mxu1 }
 0x297   :  { %v12916_v42 = vadd.f32 %v1248_v36, %v12866_v32  ;;  %v12919_v43 = vadd.f32 %v1250_v27, %v12868_v34  ;;  %v1249_v45 = vsel %vm1243_vm1, %v1232_v13, %v1236_v23  ;;  %v1251_v47 = vsel %vm1243_vm1, %v1234_v14, %v1238_v30 }
 0x298   :  { %v12926_v0 = vadd.f32 %v1249_v45, %v12870_v37  ;;  %v12929_v49 = vadd.f32 %v1251_v47, %v12872_v38  ;;  %v1244_v50 = vsel %vm1243_vm1, %v1235_v26, %v1239_v39  ;;  %v1256_v32 = vsel %vm1243_vm1, %v1239_v39, %v1227_v63 }
 0x299   :  { %v12936_v34 = vadd.f32 %v1244_v50, %v12874_v46  ;;  %v12938_v52 = vadd.f32 %v1256_v32, %v872_v55  ;;  %v1246_v54 = vsel %vm1243_vm1, %v1237_v35, %v1241_v40  ;;  %v1258_v37 = vsel %vm1243_vm1, %v1241_v40, %v1229_v1 }
 0x29a   :  { %v12945_v38 = vadd.f32 %v1246_v54, %v12876_v48  ;;  %v12947_v56 = vadd.f32 %v1258_v37, %v925_v57  ;;  %v1240_v58 = vrot.slane %v1171_v44, 2  ;;  %v1242_v61 = vrot.slane %v1224_v41, 2 }
 0x29c   :  { %v1245_v62 = vsel %vm1243_vm1, %v1236_v23, %v1240_v58  ;;  %v1257_v46 = vsel %vm1243_vm1, %v1240_v58, %v1228_v8  ;;  %v1247_v55 = vsel %vm1243_vm1, %v1238_v30, %v1242_v61  ;;  %v1259_v63 = vsel %vm1243_vm1, %v1242_v61, %v1230_v5 }
 0x29d   :  { %v12958_v1 = vadd.f32 %v1245_v62, %v12878_v51  ;;  %v12961_v48 = vadd.f32 %v1257_v46, %v12885_v59  ;;  %v12964_v57 = vadd.f32 %v1247_v55, %v12880_v53  ;;  %v12967_v2 = vadd.f32 %v1259_v63, %v12888_v60 }
 0x2ab   :  { %v1502_v3 = vpop.f32.mrb[24].mxu0  ;;  %v1555_v4 = vpop.f32.mrb[24].mxu1 }
 0x2ac   :  { %v1574_v6 = vrot.slane %v1502_v3, 3  ;;  %v1576_v7 = vrot.slane %v1555_v4, 3  ;;  %v1504_v9 = vpop.f32.mrb[25].mxu0  ;;  %v1557_v11 = vpop.f32.mrb[25].mxu1 }
 0x2ad   :  { %v1577_v12 = vrot.slane %v1557_v11, 3  ;;  %v1506_v5 = vpop.f32.mrb[26].mxu0  ;;  %v1559_v51 = vpop.f32.mrb[26].mxu1  ;;  %v1575_v53 = vrot.slane %v1504_v9, 3  ;;  %v13051_v11 = vsub.s32 0, %v12800_v18 }
 0x2ae   :  { %v1578_v8 = vrot.slane %v1506_v5, 3  ;;  %v1580_v59 = vrot.slane %v1559_v51, 3  ;;  %v1508_v13 = vpop.f32.mrb[27].mxu0  ;;  %v1561_v14 = vpop.f32.mrb[27].mxu1  ;;  %v1970_v5 = vld [vmem:[#allocation5] sm:$0xf] }
 0x2af   :  { %v1579_v10 = vrot.slane %v1508_v13, 3  ;;  %v1581_v15 = vrot.slane %v1561_v14, 3  ;;  %v13054_v51 = vsub.s32 2, %v12800_v18 }
 0x2b0   :  { %v1599_v60 = vsel %vm1590_vm2, %v1574_v6, %v1578_v8  ;;  %v1601_v19 = vsel %vm1590_vm2, %v1576_v7, %v1580_v59 }
 0x2b1   :  { %v12975_v20 = vadd.f32 %v1599_v60, %v12896_v16  ;;  %v12978_v24 = vadd.f32 %v1601_v19, %v12899_v17  ;;  %v1600_v25 = vsel %vm1590_vm2, %v1575_v53, %v1579_v10  ;;  %v1602_v26 = vsel %vm1590_vm2, %v1577_v12, %v1581_v15 }
 0x2b2   :  { %v12985_v35 = vadd.f32 %v1600_v25, %v12906_v21  ;;  %v12988_v28 = vadd.f32 %v1602_v26, %v12909_v22  ;;  %v13077_v19 = vrot.slane %v1970_v5, %v13054_v51 }
 0x2b3   :  { %v1512_v29 = vpop.f32.mrb[28].mxu0  ;;  %v1565_v23 = vpop.f32.mrb[28].mxu1 }
 0x2b4   :  { %v1582_v30 = vrot.slane %v1512_v29, 3  ;;  %v1584_v16 = vrot.slane %v1565_v23, 3  ;;  %v1514_v31 = vpop.f32.mrb[29].mxu0  ;;  %v1567_v33 = vpop.f32.mrb[29].mxu1 }
 0x2b5   :  { %v1583_v17 = vrot.slane %v1514_v31, 3  ;;  %v1585_v36 = vrot.slane %v1567_v33, 3  ;;  %v1516_v27 = vpop.f32.mrb[30].mxu0  ;;  %v1569_v39 = vpop.f32.mrb[30].mxu1 }
 0x2b6   :  { %v1595_v40 = vsel %vm1590_vm2, %v1578_v8, %v1582_v30  ;;  %v1597_v21 = vsel %vm1590_vm2, %v1580_v59, %v1584_v16  ;;  %v1586_v44 = vrot.slane %v1516_v27, 3  ;;  %v1588_v41 = vrot.slane %v1569_v39, 3  ;;  %v1518_v22 = vpop.f32.mrb[31].mxu0  ;;  %v1571_v45 = vpop.f32.mrb[31].mxu1  ;;  %v2062_v8 = vld [vmem:[#allocation8] sm:$0xf] }
 0x2b7   :  { %v12995_v47 = vadd.f32 %v1595_v40, %v12916_v42  ;;  %v12998_v50 = vadd.f32 %v1597_v21, %v12919_v43  ;;  %v1596_v32 = vsel %vm1590_vm2, %v1579_v10, %v1583_v17  ;;  %v1598_v54 = vsel %vm1590_vm2, %v1581_v15, %v1585_v36 }
 0x2b8   :  { %v13005_v37 = vadd.f32 %v1596_v32, %v12926_v0  ;;  %v13008_v58 = vadd.f32 %v1598_v54, %v12929_v49  ;;  %v1591_v61 = vsel %vm1590_vm2, %v1582_v30, %v1586_v44  ;;  %v1603_v42 = vsel %vm1590_vm2, %v1586_v44, %v1574_v6 }
 0x2b9   :  { %v13015_v43 = vadd.f32 %v1591_v61, %v12936_v34  ;;  %v13018_v62 = vadd.f32 %v1603_v42, %v12938_v52  ;;  %v1593_v46 = vsel %vm1590_vm2, %v1584_v16, %v1588_v41  ;;  %v1605_v0 = vsel %vm1590_vm2, %v1588_v41, %v1576_v7 }
 0x2ba   :  { %v13025_v49 = vadd.f32 %v1593_v46, %v12945_v38  ;;  %v13028_v55 = vadd.f32 %v1605_v0, %v12947_v56  ;;  %v1587_v63 = vrot.slane %v1518_v22, 3  ;;  %v1589_v3 = vrot.slane %v1571_v45, 3 }
 0x2bb   :  { %v13105_v41 = vrot.slane %v2062_v8, %v13054_v51 }
 0x2bc   :  { %v1592_v34 = vsel %vm1590_vm2, %v1583_v17, %v1587_v63  ;;  %v1604_v52 = vsel %vm1590_vm2, %v1587_v63, %v1575_v53  ;;  %v1594_v4 = vsel %vm1590_vm2, %v1585_v36, %v1589_v3  ;;  %v1606_v6 = vsel %vm1590_vm2, %v1589_v3, %v1577_v12 }
 0x2bd   :  { %v13039_v38 = vadd.f32 %v1592_v34, %v12958_v1  ;;  %v13042_v56 = vadd.f32 %v1604_v52, %v12961_v48  ;;  %v13045_v7 = vadd.f32 %v1594_v4, %v12964_v57  ;;  %v13048_v9 = vadd.f32 %v1606_v6, %v12967_v2  ;;  %v2024_v48 = vld [vmem:[#allocation7] sm:$0xf] }
 0x2be   :  { %v13057_v12 = vsub.s32 1, %v12800_v18  ;;  %v13060_v1 = vsub.s32 3, %v12800_v18  ;;  %v13073_v53 = vrot.slane %v1970_v5, %v13051_v11  ;;  %v13087_v30 = vrot.slane %v2024_v48, %v13051_v11  ;;  %v7328_v18 = vld [vmem:[#allocation19] sm:$0xf] }
 0x2bf   :  { %v13091_v36 = vrot.slane %v2062_v8, %v13051_v11  ;;  %v13102_v44 = vrot.slane %v2024_v48, %v13054_v51 }
 0x2c0   :  { %v13080_v25 = vrot.slane %v1970_v5, %v13057_v12  ;;  %v13083_v26 = vrot.slane %v1970_v5, %v13060_v1  ;;  %v13119_v42 = vrot.slane %v2024_v48, %v13057_v12  ;;  %v13122_v46 = vrot.slane %v2062_v8, %v13057_v12 }
 0x2c1   :  { %v13128_v63 = vrot.slane %v2024_v48, %v13060_v1  ;;  %v13131_v3 = vrot.slane %v2062_v8, %v13060_v1 }
 0x2cb   :  { %v13062_v57 = vpop.f32.mrb[32].mxu0  ;;  %v13064_v59 = vpop.f32.mrb[32].mxu1 }
 0x2cc   :  { %v1923_v2 = vrot.slane %v13064_v59, 4  ;;  %v13067_v13 = vpop.f32.mrb[33].mxu0  ;;  %v13069_v14 = vpop.f32.mrb[33].mxu1  ;;  %v1921_v29 = vrot.slane %v13062_v57, 4 }
 0x2cd   :  { %v13916_v10 = vrot.slane %v13069_v14, 4  ;;  %v1853_v15 = vpop.f32.mrb[34].mxu0  ;;  %v1906_v60 = vpop.f32.mrb[34].mxu1  ;;  %v13918_v17 = vrot.slane %v13067_v13, 4 }
 0x2ce   :  { %v1925_v23 = vrot.slane %v1853_v15, 4  ;;  %v1927_v16 = vrot.slane %v1906_v60, 4  ;;  %v1855_v31 = vpop.f32.mrb[35].mxu0  ;;  %v1908_v33 = vpop.f32.mrb[35].mxu1 }
 0x2cf   :  { %v1926_v27 = vrot.slane %v1855_v31, 4  ;;  %v1928_v39 = vrot.slane %v1908_v33, 4 }
 0x2d0   :  { %v1946_v40 = vsel %vm1937_vm3, %v1921_v29, %v1925_v23  ;;  %v1948_v21 = vsel %vm1937_vm3, %v1923_v2, %v1927_v16 }
 0x2d1   :  { %v1954_v22 = vadd.f32 %v1946_v40, %v12975_v20  ;;  %v1956_v45 = vadd.f32 %v1948_v21, %v12978_v24  ;;  %v1947_v32 = vsel %vm1937_vm3, %v13918_v17, %v1926_v27  ;;  %v1949_v54 = vsel %vm1937_vm3, %v13916_v10, %v1928_v39 }
 0x2d2   :  { %v1955_v61 = vadd.f32 %v1947_v32, %v12985_v35  ;;  %v1957_v20 = vadd.f32 %v1949_v54, %v12988_v28 }
 0x2d3   :  { %v1992_v24 = vadd.f32 %v13073_v53, %v1954_v22  ;;  %v1994_v0 = vadd.f32 %v13077_v19, %v1956_v45  ;;  %v1859_v34 = vpop.f32.mrb[36].mxu0  ;;  %v13133_v35 = vpop.f32.mrb[36].mxu1 }
 0x2d4   :  { %v1993_v52 = vadd.f32 %v13080_v25, %v1955_v61  ;;  %v1995_v4 = vadd.f32 %v13083_v26, %v1957_v20  ;;  %v1929_v6 = vrot.slane %v1859_v34, 4  ;;  %v1931_v28 = vrot.slane %v13133_v35, 4  ;;  %v13138_v5 = vpop.f32.mrb[37].mxu0  ;;  %v13140_v15 = vpop.f32.mrb[37].mxu1 }
 0x2d5   :  { %v2008_v60 = vmax.f32 %v1992_v24, 0.0  ;;  %v2010_v48 = vmax.f32 %v1994_v0, 0.0  ;;  %v13919_v31 = vrot.slane %v13138_v5, 4  ;;  %v13917_v8 = vrot.slane %v13140_v15, 4  ;;  %v1863_v33 = vpop.f32.mrb[38].mxu0  ;;  %v1916_v40 = vpop.f32.mrb[38].mxu1 }
 0x2d6   :  { %v2009_v21 = vmax.f32 %v1993_v52, 0.0  ;;  %v2011_v22 = vmax.f32 %v1995_v4, 0.0  ;;  %v1942_v45 = vsel %vm1937_vm3, %v1925_v23, %v1929_v6  ;;  %v1944_v32 = vsel %vm1937_vm3, %v1927_v16, %v1931_v28  ;;  %v13148_v54 = vpop.f32.mrb[39].mxu0  ;;  %v13150_v61 = vpop.f32.mrb[39].mxu1 }
 0x2d7   :  { %v2046_v20 = vmul.f32 %v13087_v30, %v2008_v60  ;;  %v2048_v24 = vmul.f32 %v13102_v44, %v2010_v48  ;;  %v1958_v0 = vadd.f32 %v1942_v45, %v12995_v47  ;;  %v1960_v34 = vadd.f32 %v1944_v32, %v12998_v50 }
 0x2d8   :  { %v2047_v35 = vmul.f32 %v13119_v42, %v2009_v21  ;;  %v2049_v52 = vmul.f32 %v13128_v63, %v2011_v22  ;;  %v1943_v23 = vsel %vm1937_vm3, %v1926_v27, %v13919_v31  ;;  %v1945_v16 = vsel %vm1937_vm3, %v1928_v39, %v13917_v8 }
 0x2d9   :  { %v2084_v4 = vadd.f32 %v13091_v36, %v2046_v20  ;;  %v2086_v47 = vadd.f32 %v13105_v41, %v2048_v24  ;;  %v1996_v50 = vadd.f32 %v13073_v53, %v1958_v0  ;;  %v1998_v60 = vadd.f32 %v13077_v19, %v1960_v34 }
 0x2da   :  { %v2085_v48 = vadd.f32 %v13122_v46, %v2047_v35  ;;  %v2087_v21 = vadd.f32 %v13131_v3, %v2049_v52  ;;  %v1959_v22 = vadd.f32 %v1943_v23, %v13005_v37  ;;  %v1961_v27 = vadd.f32 %v1945_v16, %v13008_v58 }
 0x2db   :  { %v2100_v45 = vmax.f32 %v2084_v4, 0.0  ;;  %v2102_v32 = vmax.f32 %v2086_v47, 0.0  ;;  %v2012_v10 = vmax.f32 %v1996_v50, 0.0  ;;  %v2014_v39 = vmax.f32 %v1998_v60, 0.0 }
 0x2dc   :  { %v2101_v8 = vmax.f32 %v2085_v48, 0.0  ;;  %v2103_v20 = vmax.f32 %v2087_v21, 0.0  ;;  %v1997_v24 = vadd.f32 %v13080_v25, %v1959_v22  ;;  %v1999_v0 = vadd.f32 %v13083_v26, %v1961_v27 }
 0x2dd   :  { %v2050_v34 = vmul.f32 %v13087_v30, %v2012_v10  ;;  %v2052_v35 = vmul.f32 %v13102_v44, %v2014_v39  ;;  %v1933_v17 = vrot.slane %v1863_v33, 4  ;;  %v1935_v52 = vrot.slane %v1916_v40, 4 }
 0x2de   :  { %v2013_v31 = vmax.f32 %v1997_v24, 0.0  ;;  %v2015_v37 = vmax.f32 %v1999_v0, 0.0  ;;  %v1934_v58 = vrot.slane %v13148_v54, 4  ;;  %v1936_v23 = vrot.slane %v13150_v61, 4 }
 0x2df   :  { %v2088_v16 = vadd.f32 %v13091_v36, %v2050_v34  ;;  %v2090_v4 = vadd.f32 %v13105_v41, %v2052_v35  ;;  %v1938_v47 = vsel %vm1937_vm3, %v1929_v6, %v1933_v17  ;;  %v1950_v10 = vsel %vm1937_vm3, %v1933_v17, %v1921_v29 }
 0x2e0   :  { %v2051_v33 = vmul.f32 %v13119_v42, %v2013_v31  ;;  %v2053_v40 = vmul.f32 %v13128_v63, %v2015_v37  ;;  %v1962_v54 = vadd.f32 %v1938_v47, %v13015_v43  ;;  %v1966_v61 = vadd.f32 %v1950_v10, %v13018_v62  ;;  %v10842_v37 = vld [vmem:[#allocation10 + $0x624] ss:$16 sps:$4 sm:$0xff]  }
 0x2e1   :  { %v2104_v50 = vmax.f32 %v2088_v16, 0.0  ;;  %v2106_v60 = vmax.f32 %v2090_v4, 0.0  ;;  %v1940_v48 = vsel %vm1937_vm3, %v1931_v28, %v1935_v52  ;;  %v1952_v57 = vsel %vm1937_vm3, %v1935_v52, %v1923_v2 }
 0x2e2   :  { %v2089_v29 = vadd.f32 %v13122_v46, %v2051_v33  ;;  %v2091_v17 = vadd.f32 %v13131_v3, %v2053_v40  ;;  %v2000_v6 = vadd.f32 %v13073_v53, %v1962_v54  ;;  %v2004_v43 = vadd.f32 %v13073_v53, %v1966_v61  ;;  %v10843_v54 = vld [vmem:[#allocation10 + $0x628] ss:$16 sps:$4 sm:$0xff]  }
 0x2e3   :  { %v13202_v31 = vpack.c.bf16 %v2104_v50, %v2100_v45  ;;  %v13204_v62 = vpack.c.bf16 %v2106_v60, %v2102_v32  ;;  %v1964_v21 = vadd.f32 %v1940_v48, %v13025_v49  ;;  %v1968_v28 = vadd.f32 %v1952_v57, %v13028_v55  ;;  %v10834_v32 = vld [vmem:[#allocation10 + $0x600] ss:$16 sps:$4 sm:$0xff]   ;;  %v10837_v55 = vld [vmem:[#allocation10 + $0x608] ss:$16 sps:$4 sm:$0xff]  }
 0x2e4   :  { %v2105_v59 = vmax.f32 %v2089_v29, 0.0  ;;  %v2107_v22 = vmax.f32 %v2091_v17, 0.0  ;;  %v2016_v27 = vmax.f32 %v2000_v6, 0.0  ;;  %v2020_v2 = vmax.f32 %v2004_v43, 0.0  ;;  %v10851_v17 = vld [vmem:[#allocation10 + $0x64c] ss:$16 sps:$4 sm:$0xff]  }
 0x2e5   :  { %v2002_v39 = vadd.f32 %v13077_v19, %v1964_v21  ;;  %v2006_v24 = vadd.f32 %v13077_v19, %v1968_v28  ;;  %v13928_v0 = vrot.slane %v13138_v5, 4  ;;  %v13929_v45 = vrot.slane %v13067_v13, 4  ;;  %v10845_v5 = vld [vmem:[#allocation10 + $0x62c] ss:$16 sps:$4 sm:$0xff]  }
 0x2e6   :  { %v13218_v34 = vpack.c.bf16 %v2105_v59, %v2101_v8  ;;  %v13220_v35 = vpack.c.bf16 %v2107_v22, %v2103_v20  ;;  %v2054_v52 = vmul.f32 %v13087_v30, %v2016_v27  ;;  %v2058_v19 = vmul.f32 %v13087_v30, %v2020_v2  ;;  %v10846_v22 = vld [vmem:[#allocation10 + $0x640] ss:$16 sps:$4 sm:$0xff]   ;;  %v10849_v27 = vld [vmem:[#allocation10 + $0x648] ss:$16 sps:$4 sm:$0xff]  }
 0x2e7   :  { %v1939_v53 = vsel %vm1937_vm3, %v13928_v0, %v1934_v58  ;;  %v1951_v49 = vsel %vm1937_vm3, %v1934_v58, %v13929_v45  ;;  %v2018_v16 = vmax.f32 %v2002_v39, 0.0  ;;  %v2022_v4 = vmax.f32 %v2006_v24, 0.0  ;;  %v10854_v24 = vld [vmem:[#allocation10 + $0x664] ss:$16 sps:$4 sm:$0xff]   ;;  %v10857_v0 = vld [vmem:[#allocation10 + $0x66c] ss:$16 sps:$4 sm:$0xff]  }
 0x2e8   :  { %v1963_v47 = vadd.f32 %v1939_v53, %v13039_v38  ;;  %v1967_v13 = vadd.f32 %v1951_v49, %v13042_v56  ;;  %v2092_v58 = vadd.f32 %v13091_v36, %v2054_v52  ;;  %v2096_v10 = vadd.f32 %v13091_v36, %v2058_v19  ;;  %3052 = vmatprep.mubr.bf16.mxu0 %v13218_v34 }
 0x2e9   :  { %v13930_v8 = vrot.slane %v13140_v15, 4  ;;  %v13931_v33 = vrot.slane %v13069_v14, 4  ;;  %v2056_v38 = vmul.f32 %v13102_v44, %v2018_v16  ;;  %v2060_v56 = vmul.f32 %v13102_v44, %v2022_v4  ;;  %3158 = vmatprep.mubr.bf16.mxu1 %v13218_v34  ;;  %v10840_v15 = vld [vmem:[#allocation10 + $0x620] ss:$16 sps:$4 sm:$0xff]   ;;  %3053 = vmatmul.mubr.bf16.vlgmr.msra.gmra.mrb[40].mxu0 %v13202_v31  ;;  %v10863_v16 = vld [vmem:[#allocation10 + $0x68c] ss:$16 sps:$4 sm:$0xff]  }
 0x2ea   :  { %v2001_v40 = vadd.f32 %v13080_v25, %v1963_v47  ;;  %v2005_v36 = vadd.f32 %v13080_v25, %v1967_v13  ;;  %v2108_v61 = vmax.f32 %v2092_v58, 0.0  ;;  %v2112_v50 = vmax.f32 %v2096_v10, 0.0  ;;  %3159 = vmatmul.mubr.bf16.vlgmr.msra.gmra.mrb[40].mxu1 %v13202_v31  ;;  %3074 = vmatpush1.bf16.msra.mxu0 %v10834_v32  ;;  %v10861_v47 = vld [vmem:[#allocation10 + $0x688] ss:$16 sps:$4 sm:$0xff]   ;;  %v10866_v13 = vld [vmem:[#allocation10 + $0x6a4] ss:$16 sps:$4 sm:$0xff]  }
 0x2eb   :  { %v1941_v20 = vsel %vm1937_vm3, %v13930_v8, %v1936_v23  ;;  %v1953_v30 = vsel %vm1937_vm3, %v1936_v23, %v13931_v33  ;;  %v2094_v44 = vadd.f32 %v13105_v41, %v2056_v38  ;;  %v2098_v60 = vadd.f32 %v13105_v41, %v2060_v56  ;;  %3180 = vmatpush1.bf16.msra.mxu1 %v10837_v55  ;;  %v10869_v58 = vld [vmem:[#allocation10 + $0x6ac] ss:$16 sps:$4 sm:$0xff]   ;;  %v10864_v10 = vld [vmem:[#allocation10 + $0x6a0] ss:$16 sps:$4 sm:$0xff]   ;;  %v10867_v8 = vld [vmem:[#allocation10 + $0x6a8] ss:$16 sps:$4 sm:$0xff]  }
 0x2ec   :  { %v1965_v14 = vadd.f32 %v1941_v20, %v13045_v7  ;;  %v1969_v23 = vadd.f32 %v1953_v30, %v13048_v9  ;;  %v2017_v48 = vmax.f32 %v2001_v40, 0.0  ;;  %v2021_v25 = vmax.f32 %v2005_v36, 0.0  ;;  %3075 = vmatprep.subr.bf16.mxu0 %v10842_v37  ;;  %3181 = vmatprep.subr.bf16.mxu1 %v10845_v5  ;;  %v10848_v9 = vld [vmem:[#allocation10 + $0x644] ss:$16 sps:$4 sm:$0xff]   ;;  %v10852_v37 = vld [vmem:[#allocation10 + $0x660] ss:$16 sps:$4 sm:$0xff]  }
 0x2ed   :  { %v13248_v57 = vpack.c.bf16 %v2112_v50, %v2108_v61  ;;  %v2110_v6 = vmax.f32 %v2094_v44, 0.0  ;;  %v2114_v43 = vmax.f32 %v2098_v60, 0.0  ;;  %v10855_v5 = vld [vmem:[#allocation10 + $0x668] ss:$16 sps:$4 sm:$0xff]   ;;  %v10872_v20 = vld [vmem:[#allocation10 + $0x6c4] ss:$16 sps:$4 sm:$0xff]  }
 0x2ee   :  { %v2003_v29 = vadd.f32 %v13083_v26, %v1965_v14  ;;  %v2007_v7 = vadd.f32 %v13083_v26, %v1969_v23  ;;  %v2055_v21 = vmul.f32 %v13119_v42, %v2017_v48  ;;  %v2059_v41 = vmul.f32 %v13119_v42, %v2021_v25  ;;  %3076 = vmatpush1.bf16.msra.mxu0 %v10840_v15  ;;  %v10875_v33 = vld [vmem:[#allocation10 + $0x6cc] ss:$16 sps:$4 sm:$0xff]   ;;  %v10870_v30 = vld [vmem:[#allocation10 + $0x6c0] ss:$16 sps:$4 sm:$0xff]   ;;  %v10873_v38 = vld [vmem:[#allocation10 + $0x6c8] ss:$16 sps:$4 sm:$0xff]  }
 0x2ef   :  { %v13254_v2 = vpack.c.bf16 %v2114_v43, %v2110_v6  ;;  %3182 = vmatpush1.bf16.msra.mxu1 %v10843_v54  ;;  %3077 = vmatprep.subr.bf16.mxu0 %v10848_v9  ;;  %v10878_v56 = vld [vmem:[#allocation10 + $0x6e4] ss:$16 sps:$4 sm:$0xff]   ;;  %v10881_v40 = vld [vmem:[#allocation10 + $0x6ec] ss:$16 sps:$4 sm:$0xff]   ;;  %v10876_v36 = vld [vmem:[#allocation10 + $0x6e0] ss:$16 sps:$4 sm:$0xff]  }
 0x2f0   :  { %v2019_v28 = vmax.f32 %v2003_v29, 0.0  ;;  %v2023_v59 = vmax.f32 %v2007_v7, 0.0  ;;  %v2093_v39 = vadd.f32 %v13122_v46, %v2055_v21  ;;  %v2097_v26 = vadd.f32 %v13122_v46, %v2059_v41  ;;  %3183 = vmatprep.subr.bf16.mxu1 %v10851_v17  ;;  %v10879_v15 = vld [vmem:[#allocation10 + $0x6e8] ss:$16 sps:$4 sm:$0xff]   ;;  %v10884_v54 = vld [vmem:[#allocation10 + $0x704] ss:$16 sps:$4 sm:$0xff]  }
 0x2f1   :  { %v10887_v61 = vld [vmem:[#allocation10 + $0x70c] ss:$16 sps:$4 sm:$0xff]   ;;  %v10882_v50 = vld [vmem:[#allocation10 + $0x700] ss:$16 sps:$4 sm:$0xff]   ;;  %v10885_v14 = vld [vmem:[#allocation10 + $0x708] ss:$16 sps:$4 sm:$0xff]  }
 0x2f2   :  { %v2057_v53 = vmul.f32 %v13128_v63, %v2019_v28  ;;  %v2061_v45 = vmul.f32 %v13128_v63, %v2023_v59  ;;  %v2109_v42 = vmax.f32 %v2093_v39, 0.0  ;;  %v2113_v49 = vmax.f32 %v2097_v26, 0.0  ;;  %3078 = vmatpush1.bf16.msra.mxu0 %v10846_v22  ;;  %v10860_v63 = vld [vmem:[#allocation10 + $0x684] ss:$16 sps:$4 sm:$0xff]   ;;  %v10893_v44 = vld [vmem:[#allocation10 + $0x72c] ss:$16 sps:$4 sm:$0xff]  }
 0x2f3   :  { %3184 = vmatpush1.bf16.msra.mxu1 %v10849_v27  ;;  %3079 = vmatprep.subr.bf16.mxu0 %v10854_v24  ;;  %v10890_v23 = vld [vmem:[#allocation10 + $0x724] ss:$16 sps:$4 sm:$0xff]   ;;  %v10888_v60 = vld [vmem:[#allocation10 + $0x720] ss:$16 sps:$4 sm:$0xff]   ;;  %v10891_v48 = vld [vmem:[#allocation10 + $0x728] ss:$16 sps:$4 sm:$0xff]  }
 0x2f4   :  { %v2095_v32 = vadd.f32 %v13131_v3, %v2057_v53  ;;  %v2099_v55 = vadd.f32 %v13131_v3, %v2061_v45  ;;  %v13262_v52 = vpack.c.bf16 %v2113_v49, %v2109_v42  ;;  %3185 = vmatprep.subr.bf16.mxu1 %v10857_v0  ;;  %v10858_v3 = vld [vmem:[#allocation10 + $0x680] ss:$16 sps:$4 sm:$0xff]   ;;  %v10896_v25 = vld [vmem:[#allocation10 + $0x744] ss:$16 sps:$4 sm:$0xff]   ;;  %v10899_v29 = vld [vmem:[#allocation10 + $0x74c] ss:$16 sps:$4 sm:$0xff]  }
 0x2f5   :  { %v10894_v7 = vld [vmem:[#allocation10 + $0x740] ss:$16 sps:$4 sm:$0xff]   ;;  %v10897_v9 = vld [vmem:[#allocation10 + $0x748] ss:$16 sps:$4 sm:$0xff]   ;;  %v10902_v17 = vld [vmem:[#allocation10 + $0x764] ss:$16 sps:$4 sm:$0xff]  }
 0x2f6   :  { %v2111_v46 = vmax.f32 %v2095_v32, 0.0  ;;  %v2115_v19 = vmax.f32 %v2099_v55, 0.0  ;;  %3062 = vmatprep.mubr.bf16.mxu0 %v13262_v52  ;;  %3168 = vmatprep.mubr.bf16.mxu1 %v13262_v52  ;;  %v10905_v6 = vld [vmem:[#allocation10 + $0x76c] ss:$16 sps:$4 sm:$0xff]   ;;  %v10900_v43 = vld [vmem:[#allocation10 + $0x760] ss:$16 sps:$4 sm:$0xff]  }
 0x2f7   :  { %3063 = vmatmul.mubr.bf16.gmra.mrb[44].mxu0 %v13248_v57  ;;  %3169 = vmatmul.mubr.bf16.gmra.mrb[44].mxu1 %v13248_v57  ;;  %v10903_v21 = vld [vmem:[#allocation10 + $0x768] ss:$16 sps:$4 sm:$0xff]   ;;  %v10908_v41 = vld [vmem:[#allocation10 + $0x784] ss:$16 sps:$4 sm:$0xff]   ;;  %v10911_v28 = vld [vmem:[#allocation10 + $0x78c] ss:$16 sps:$4 sm:$0xff]  }
 0x2f8   :  { %v13266_v4 = vpack.c.bf16 %v2115_v19, %v2111_v46  ;;  %3105 = vmatprep.mubr.bf16.mxu0 %v13220_v35  ;;  %3211 = vmatprep.mubr.bf16.mxu1 %v13220_v35  ;;  %v10906_v59 = vld [vmem:[#allocation10 + $0x780] ss:$16 sps:$4 sm:$0xff]   ;;  %v10909_v22 = vld [vmem:[#allocation10 + $0x788] ss:$16 sps:$4 sm:$0xff]   ;;  %v10914_v27 = vld [vmem:[#allocation10 + $0x7a4] ss:$16 sps:$4 sm:$0xff]  }
 0x2f9   :  { %3080 = vmatpush1.bf16.msra.mxu0 %v10852_v37  ;;  %3186 = vmatpush1.bf16.msra.mxu1 %v10855_v5  ;;  %v10917_v39 = vld [vmem:[#allocation10 + $0x7ac] ss:$16 sps:$4 sm:$0xff]   ;;  %v10912_v26 = vld [vmem:[#allocation10 + $0x7a0] ss:$16 sps:$4 sm:$0xff]   ;;  %v10915_v24 = vld [vmem:[#allocation10 + $0x7a8] ss:$16 sps:$4 sm:$0xff]  }
 0x2fa   :  { %3081 = vmatprep.subr.bf16.mxu0 %v10860_v63  ;;  %3187 = vmatprep.subr.bf16.mxu1 %v10863_v16  ;;  %v10920_v0 = vld [vmem:[#allocation10 + $0x7c4] ss:$16 sps:$4 sm:$0xff]   ;;  %v10923_v53 = vld [vmem:[#allocation10 + $0x7cc] ss:$16 sps:$4 sm:$0xff]   ;;  %v10918_v45 = vld [vmem:[#allocation10 + $0x7c0] ss:$16 sps:$4 sm:$0xff]  }
 0x2fb   :  { %v10921_v42 = vld [vmem:[#allocation10 + $0x7c8] ss:$16 sps:$4 sm:$0xff]   ;;  %v10926_v49 = vld [vmem:[#allocation10 + $0x7e4] ss:$16 sps:$4 sm:$0xff]   ;;  %v10929_v32 = vld [vmem:[#allocation10 + $0x7ec] ss:$16 sps:$4 sm:$0xff]  }
 0x2fc   :  { %v10924_v55 = vld [vmem:[#allocation10 + $0x7e0] ss:$16 sps:$4 sm:$0xff]   ;;  %v10927_v46 = vld [vmem:[#allocation10 + $0x7e8] ss:$16 sps:$4 sm:$0xff]   ;;  %v10932_v19 = vld [vmem:[#allocation10 + $0x4] ss:$16 sps:$4 sm:$0xff]  }
 0x2fd   :  { %3082 = vmatpush1.bf16.msra.mxu0 %v10858_v3  ;;  %3188 = vmatpush1.bf16.msra.mxu1 %v10861_v47  ;;  %v10935_v37 = vld [vmem:[#allocation10 + $0xc] ss:$16 sps:$4 sm:$0xff]   ;;  %v10930_v5 = vld [vmem:[#allocation10] ss:$16 sps:$4 sm:$0xff]   ;;  %v10933_v63 = vld [vmem:[#allocation10 + $0x8] ss:$16 sps:$4 sm:$0xff]  }
 0x2fe   :  { %3083 = vmatprep.subr.bf16.mxu0 %v10866_v13  ;;  %3189 = vmatprep.subr.bf16.mxu1 %v10869_v58  ;;  %v10938_v16 = vld [vmem:[#allocation10 + $0x24] ss:$16 sps:$4 sm:$0xff]   ;;  %v10941_v3 = vld [vmem:[#allocation10 + $0x2c] ss:$16 sps:$4 sm:$0xff]   ;;  %v10936_v47 = vld [vmem:[#allocation10 + $0x20] ss:$16 sps:$4 sm:$0xff]  }
 0x2ff   :  { %v10939_v13 = vld [vmem:[#allocation10 + $0x28] ss:$16 sps:$4 sm:$0xff]   ;;  %v10944_v58 = vld [vmem:[#allocation10 + $0x44] ss:$16 sps:$4 sm:$0xff]  }
 0x301   :  { %3084 = vmatpush1.bf16.msra.mxu0 %v10864_v10  ;;  %3190 = vmatpush1.bf16.msra.mxu1 %v10867_v8  ;;  %v10947_v10 = vld [vmem:[#allocation10 + $0x4c] ss:$16 sps:$4 sm:$0xff]   ;;  %v10942_v8 = vld [vmem:[#allocation10 + $0x40] ss:$16 sps:$4 sm:$0xff]  }
 0x302   :  { %3085 = vmatprep.subr.bf16.mxu0 %v10872_v20  ;;  %3191 = vmatprep.subr.bf16.mxu1 %v10875_v33  ;;  %v10945_v20 = vld [vmem:[#allocation10 + $0x48] ss:$16 sps:$4 sm:$0xff]   ;;  %v10950_v33 = vld [vmem:[#allocation10 + $0x64] ss:$16 sps:$4 sm:$0xff]  }
 0x305   :  { %3086 = vmatpush1.bf16.msra.mxu0 %v10870_v30  ;;  %3192 = vmatpush1.bf16.msra.mxu1 %v10873_v38  ;;  %v10953_v30 = vld [vmem:[#allocation10 + $0x6c] ss:$16 sps:$4 sm:$0xff]   ;;  %v10948_v38 = vld [vmem:[#allocation10 + $0x60] ss:$16 sps:$4 sm:$0xff]  }
 0x306   :  { %3087 = vmatprep.subr.bf16.mxu0 %v10878_v56  ;;  %3193 = vmatprep.subr.bf16.mxu1 %v10881_v40  ;;  %v10951_v56 = vld [vmem:[#allocation10 + $0x68] ss:$16 sps:$4 sm:$0xff]   ;;  %v10956_v40 = vld [vmem:[#allocation10 + $0x84] ss:$16 sps:$4 sm:$0xff]  }
 0x309   :  { %3088 = vmatpush1.bf16.msra.mxu0 %v10876_v36  ;;  %3194 = vmatpush1.bf16.msra.mxu1 %v10879_v15  ;;  %v10959_v36 = vld [vmem:[#allocation10 + $0x8c] ss:$16 sps:$4 sm:$0xff]   ;;  %v10954_v15 = vld [vmem:[#allocation10 + $0x80] ss:$16 sps:$4 sm:$0xff]  }
 0x30a   :  { %3089 = vmatprep.subr.bf16.mxu0 %v10884_v54  ;;  %3195 = vmatprep.subr.bf16.mxu1 %v10887_v61  ;;  %v10957_v54 = vld [vmem:[#allocation10 + $0x88] ss:$16 sps:$4 sm:$0xff]   ;;  %v10962_v61 = vld [vmem:[#allocation10 + $0xa4] ss:$16 sps:$4 sm:$0xff]  }
 0x30d   :  { %3090 = vmatpush1.bf16.msra.mxu0 %v10882_v50  ;;  %3196 = vmatpush1.bf16.msra.mxu1 %v10885_v14  ;;  %v10965_v50 = vld [vmem:[#allocation10 + $0xac] ss:$16 sps:$4 sm:$0xff]   ;;  %v10960_v14 = vld [vmem:[#allocation10 + $0xa0] ss:$16 sps:$4 sm:$0xff]  }
 0x30e   :  { %3091 = vmatprep.subr.bf16.mxu0 %v10890_v23  ;;  %3197 = vmatprep.subr.bf16.mxu1 %v10893_v44  ;;  %v10963_v23 = vld [vmem:[#allocation10 + $0xa8] ss:$16 sps:$4 sm:$0xff]   ;;  %v10968_v44 = vld [vmem:[#allocation10 + $0xc4] ss:$16 sps:$4 sm:$0xff]  }
 0x311   :  { %3092 = vmatpush1.bf16.msra.mxu0 %v10888_v60  ;;  %3198 = vmatpush1.bf16.msra.mxu1 %v10891_v48  ;;  %v10971_v60 = vld [vmem:[#allocation10 + $0xcc] ss:$16 sps:$4 sm:$0xff]   ;;  %v10966_v48 = vld [vmem:[#allocation10 + $0xc0] ss:$16 sps:$4 sm:$0xff]  }
 0x312   :  { %3093 = vmatprep.subr.bf16.mxu0 %v10896_v25  ;;  %3199 = vmatprep.subr.bf16.mxu1 %v10899_v29  ;;  %v10969_v25 = vld [vmem:[#allocation10 + $0xc8] ss:$16 sps:$4 sm:$0xff]   ;;  %v10974_v29 = vld [vmem:[#allocation10 + $0xe4] ss:$16 sps:$4 sm:$0xff]  }
 0x315   :  { %3094 = vmatpush1.bf16.msra.mxu0 %v10894_v7  ;;  %3200 = vmatpush1.bf16.msra.mxu1 %v10897_v9  ;;  %v10977_v7 = vld [vmem:[#allocation10 + $0xec] ss:$16 sps:$4 sm:$0xff]   ;;  %v10972_v9 = vld [vmem:[#allocation10 + $0xe0] ss:$16 sps:$4 sm:$0xff]  }
 0x316   :  { %3095 = vmatprep.subr.bf16.mxu0 %v10902_v17  ;;  %3201 = vmatprep.subr.bf16.mxu1 %v10905_v6  ;;  %v10975_v17 = vld [vmem:[#allocation10 + $0xe8] ss:$16 sps:$4 sm:$0xff]   ;;  %v10980_v6 = vld [vmem:[#allocation10 + $0x104] ss:$16 sps:$4 sm:$0xff]  }
 0x319   :  { %3096 = vmatpush1.bf16.msra.mxu0 %v10900_v43  ;;  %3202 = vmatpush1.bf16.msra.mxu1 %v10903_v21  ;;  %v10983_v43 = vld [vmem:[#allocation10 + $0x10c] ss:$16 sps:$4 sm:$0xff]   ;;  %v10978_v21 = vld [vmem:[#allocation10 + $0x100] ss:$16 sps:$4 sm:$0xff]  }
 0x31a   :  { %3097 = vmatprep.subr.bf16.mxu0 %v10908_v41  ;;  %3203 = vmatprep.subr.bf16.mxu1 %v10911_v28  ;;  %v10981_v41 = vld [vmem:[#allocation10 + $0x108] ss:$16 sps:$4 sm:$0xff]   ;;  %v10986_v28 = vld [vmem:[#allocation10 + $0x124] ss:$16 sps:$4 sm:$0xff]  }
 0x31d   :  { %3098 = vmatpush1.bf16.msra.mxu0 %v10906_v59  ;;  %3204 = vmatpush1.bf16.msra.mxu1 %v10909_v22  ;;  %v10989_v59 = vld [vmem:[#allocation10 + $0x12c] ss:$16 sps:$4 sm:$0xff]   ;;  %v10984_v22 = vld [vmem:[#allocation10 + $0x120] ss:$16 sps:$4 sm:$0xff]  }
 0x31e   :  { %3099 = vmatprep.subr.bf16.mxu0 %v10914_v27  ;;  %3205 = vmatprep.subr.bf16.mxu1 %v10917_v39  ;;  %v10987_v27 = vld [vmem:[#allocation10 + $0x128] ss:$16 sps:$4 sm:$0xff]   ;;  %v10992_v39 = vld [vmem:[#allocation10 + $0x144] ss:$16 sps:$4 sm:$0xff]  }
 0x321   :  { %3100 = vmatpush1.bf16.msra.mxu0 %v10912_v26  ;;  %3206 = vmatpush1.bf16.msra.mxu1 %v10915_v24  ;;  %v10995_v26 = vld [vmem:[#allocation10 + $0x14c] ss:$16 sps:$4 sm:$0xff]   ;;  %v10990_v24 = vld [vmem:[#allocation10 + $0x140] ss:$16 sps:$4 sm:$0xff]  }
 0x322   :  { %3101 = vmatprep.subr.bf16.mxu0 %v10920_v0  ;;  %3207 = vmatprep.subr.bf16.mxu1 %v10923_v53  ;;  %v10993_v0 = vld [vmem:[#allocation10 + $0x148] ss:$16 sps:$4 sm:$0xff]   ;;  %v10998_v53 = vld [vmem:[#allocation10 + $0x164] ss:$16 sps:$4 sm:$0xff]  }
 0x325   :  { %3102 = vmatpush1.bf16.msra.mxu0 %v10918_v45  ;;  %3208 = vmatpush1.bf16.msra.mxu1 %v10921_v42  ;;  %v11001_v45 = vld [vmem:[#allocation10 + $0x16c] ss:$16 sps:$4 sm:$0xff]   ;;  %v10996_v42 = vld [vmem:[#allocation10 + $0x160] ss:$16 sps:$4 sm:$0xff]  }
 0x326   :  { %3103 = vmatprep.subr.bf16.mxu0 %v10926_v49  ;;  %3209 = vmatprep.subr.bf16.mxu1 %v10929_v32  ;;  %v10999_v49 = vld [vmem:[#allocation10 + $0x168] ss:$16 sps:$4 sm:$0xff]   ;;  %v11004_v32 = vld [vmem:[#allocation10 + $0x184] ss:$16 sps:$4 sm:$0xff]  }
 0x329   :  { %3104 = vmatpush1.bf16.msra.mxu0 %v10924_v55  ;;  %3210 = vmatpush1.bf16.msra.mxu1 %v10927_v46  ;;  %v11007_v55 = vld [vmem:[#allocation10 + $0x18c] ss:$16 sps:$4 sm:$0xff]   ;;  %v11002_v46 = vld [vmem:[#allocation10 + $0x180] ss:$16 sps:$4 sm:$0xff]  }
 0x32a   :  { %3904 = vmatprep.subr.bf16.mxu0 %v10932_v19  ;;  %4010 = vmatprep.subr.bf16.mxu1 %v10935_v37  ;;  %v11005_v19 = vld [vmem:[#allocation10 + $0x188] ss:$16 sps:$4 sm:$0xff]   ;;  %v11010_v37 = vld [vmem:[#allocation10 + $0x1a4] ss:$16 sps:$4 sm:$0xff]  }
 0x32c   :  { %3106 = vmatmul.mubr.bf16.vlgmr.msra.gmra.mrb[40].mxu0 %v13204_v62  ;;  %3212 = vmatmul.mubr.bf16.vlgmr.msra.gmra.mrb[40].mxu1 %v13204_v62 }
 0x32d   :  { %3115 = vmatprep.mubr.bf16.mxu0 %v13266_v4  ;;  %3221 = vmatprep.mubr.bf16.mxu1 %v13266_v4 }
 0x32e   :  { %3905 = vmatpush1.bf16.msra.mxu0 %v10930_v5  ;;  %4011 = vmatpush1.bf16.msra.mxu1 %v10933_v63  ;;  %v11013_v5 = vld [vmem:[#allocation10 + $0x1ac] ss:$16 sps:$4 sm:$0xff]   ;;  %v11008_v63 = vld [vmem:[#allocation10 + $0x1a0] ss:$16 sps:$4 sm:$0xff]  }
 0x32f   :  { %3906 = vmatprep.subr.bf16.mxu0 %v10938_v16  ;;  %4012 = vmatprep.subr.bf16.mxu1 %v10941_v3  ;;  %v11011_v16 = vld [vmem:[#allocation10 + $0x1a8] ss:$16 sps:$4 sm:$0xff]   ;;  %v11016_v3 = vld [vmem:[#allocation10 + $0x1c4] ss:$16 sps:$4 sm:$0xff]  }
 0x332   :  { %3907 = vmatpush1.bf16.msra.mxu0 %v10936_v47  ;;  %4013 = vmatpush1.bf16.msra.mxu1 %v10939_v13  ;;  %v11019_v47 = vld [vmem:[#allocation10 + $0x1cc] ss:$16 sps:$4 sm:$0xff]   ;;  %v11014_v13 = vld [vmem:[#allocation10 + $0x1c0] ss:$16 sps:$4 sm:$0xff]  }
 0x333   :  { %3908 = vmatprep.subr.bf16.mxu0 %v10944_v58  ;;  %4014 = vmatprep.subr.bf16.mxu1 %v10947_v10  ;;  %v11017_v58 = vld [vmem:[#allocation10 + $0x1c8] ss:$16 sps:$4 sm:$0xff]   ;;  %v11022_v10 = vld [vmem:[#allocation10 + $0x1e4] ss:$16 sps:$4 sm:$0xff]  }
 0x334   :  { %3116 = vmatmul.mubr.bf16.gmra.mrb[44].mxu0 %v13254_v2  ;;  %3222 = vmatmul.mubr.bf16.gmra.mrb[44].mxu1 %v13254_v2 }
 0x335   :  { %3936 = vmatprep.mubr.bf16.mxu0 %v13218_v34  ;;  %4042 = vmatprep.mubr.bf16.mxu1 %v13218_v34 }
 0x336   :  { %3909 = vmatpush1.bf16.msra.mxu0 %v10942_v8  ;;  %4015 = vmatpush1.bf16.msra.mxu1 %v10945_v20  ;;  %v11025_v8 = vld [vmem:[#allocation10 + $0x1ec] ss:$16 sps:$4 sm:$0xff]   ;;  %v11020_v20 = vld [vmem:[#allocation10 + $0x1e0] ss:$16 sps:$4 sm:$0xff]  }
 0x337   :  { %3910 = vmatprep.subr.bf16.mxu0 %v10950_v33  ;;  %4016 = vmatprep.subr.bf16.mxu1 %v10953_v30  ;;  %v11023_v33 = vld [vmem:[#allocation10 + $0x1e8] ss:$16 sps:$4 sm:$0xff]   ;;  %v11028_v30 = vld [vmem:[#allocation10 + $0x204] ss:$16 sps:$4 sm:$0xff]  }
 0x33a   :  { %3911 = vmatpush1.bf16.msra.mxu0 %v10948_v38  ;;  %4017 = vmatpush1.bf16.msra.mxu1 %v10951_v56  ;;  %v11031_v38 = vld [vmem:[#allocation10 + $0x20c] ss:$16 sps:$4 sm:$0xff]   ;;  %v11026_v56 = vld [vmem:[#allocation10 + $0x200] ss:$16 sps:$4 sm:$0xff]  }
 0x33b   :  { %3912 = vmatprep.subr.bf16.mxu0 %v10956_v40  ;;  %4018 = vmatprep.subr.bf16.mxu1 %v10959_v36  ;;  %v11029_v40 = vld [vmem:[#allocation10 + $0x208] ss:$16 sps:$4 sm:$0xff]   ;;  %v11034_v36 = vld [vmem:[#allocation10 + $0x224] ss:$16 sps:$4 sm:$0xff]  }
 0x33e   :  { %3913 = vmatpush1.bf16.msra.mxu0 %v10954_v15  ;;  %4019 = vmatpush1.bf16.msra.mxu1 %v10957_v54  ;;  %v11037_v15 = vld [vmem:[#allocation10 + $0x22c] ss:$16 sps:$4 sm:$0xff]   ;;  %v11032_v54 = vld [vmem:[#allocation10 + $0x220] ss:$16 sps:$4 sm:$0xff]  }
 0x33f   :  { %3914 = vmatprep.subr.bf16.mxu0 %v10962_v61  ;;  %4020 = vmatprep.subr.bf16.mxu1 %v10965_v50  ;;  %v11035_v61 = vld [vmem:[#allocation10 + $0x228] ss:$16 sps:$4 sm:$0xff]   ;;  %v11040_v50 = vld [vmem:[#allocation10 + $0x244] ss:$16 sps:$4 sm:$0xff]  }
 0x342   :  { %3915 = vmatpush1.bf16.msra.mxu0 %v10960_v14  ;;  %4021 = vmatpush1.bf16.msra.mxu1 %v10963_v23  ;;  %v11043_v14 = vld [vmem:[#allocation10 + $0x24c] ss:$16 sps:$4 sm:$0xff]   ;;  %v11038_v23 = vld [vmem:[#allocation10 + $0x240] ss:$16 sps:$4 sm:$0xff]  }
 0x343   :  { %3916 = vmatprep.subr.bf16.mxu0 %v10968_v44  ;;  %4022 = vmatprep.subr.bf16.mxu1 %v10971_v60  ;;  %v11041_v44 = vld [vmem:[#allocation10 + $0x248] ss:$16 sps:$4 sm:$0xff]   ;;  %v11046_v60 = vld [vmem:[#allocation10 + $0x264] ss:$16 sps:$4 sm:$0xff]  }
 0x346   :  { %3917 = vmatpush1.bf16.msra.mxu0 %v10966_v48  ;;  %4023 = vmatpush1.bf16.msra.mxu1 %v10969_v25  ;;  %v11049_v48 = vld [vmem:[#allocation10 + $0x26c] ss:$16 sps:$4 sm:$0xff]   ;;  %v11044_v25 = vld [vmem:[#allocation10 + $0x260] ss:$16 sps:$4 sm:$0xff]  }
 0x347   :  { %3918 = vmatprep.subr.bf16.mxu0 %v10974_v29  ;;  %4024 = vmatprep.subr.bf16.mxu1 %v10977_v7  ;;  %v11047_v29 = vld [vmem:[#allocation10 + $0x268] ss:$16 sps:$4 sm:$0xff]   ;;  %v11052_v7 = vld [vmem:[#allocation10 + $0x284] ss:$16 sps:$4 sm:$0xff]  }
 0x34a   :  { %3919 = vmatpush1.bf16.msra.mxu0 %v10972_v9  ;;  %4025 = vmatpush1.bf16.msra.mxu1 %v10975_v17  ;;  %v11055_v9 = vld [vmem:[#allocation10 + $0x28c] ss:$16 sps:$4 sm:$0xff]   ;;  %v11050_v17 = vld [vmem:[#allocation10 + $0x280] ss:$16 sps:$4 sm:$0xff]  }
 0x34b   :  { %3920 = vmatprep.subr.bf16.mxu0 %v10980_v6  ;;  %4026 = vmatprep.subr.bf16.mxu1 %v10983_v43  ;;  %v11053_v6 = vld [vmem:[#allocation10 + $0x288] ss:$16 sps:$4 sm:$0xff]   ;;  %v11058_v43 = vld [vmem:[#allocation10 + $0x2a4] ss:$16 sps:$4 sm:$0xff]  }
 0x34e   :  { %3921 = vmatpush1.bf16.msra.mxu0 %v10978_v21  ;;  %4027 = vmatpush1.bf16.msra.mxu1 %v10981_v41  ;;  %v11061_v21 = vld [vmem:[#allocation10 + $0x2ac] ss:$16 sps:$4 sm:$0xff]   ;;  %v11056_v41 = vld [vmem:[#allocation10 + $0x2a0] ss:$16 sps:$4 sm:$0xff]  }
 0x34f   :  { %3922 = vmatprep.subr.bf16.mxu0 %v10986_v28  ;;  %4028 = vmatprep.subr.bf16.mxu1 %v10989_v59  ;;  %v11059_v28 = vld [vmem:[#allocation10 + $0x2a8] ss:$16 sps:$4 sm:$0xff]   ;;  %v11064_v59 = vld [vmem:[#allocation10 + $0x2c4] ss:$16 sps:$4 sm:$0xff]  }
 0x352   :  { %3923 = vmatpush1.bf16.msra.mxu0 %v10984_v22  ;;  %4029 = vmatpush1.bf16.msra.mxu1 %v10987_v27  ;;  %v11067_v22 = vld [vmem:[#allocation10 + $0x2cc] ss:$16 sps:$4 sm:$0xff]   ;;  %v11062_v27 = vld [vmem:[#allocation10 + $0x2c0] ss:$16 sps:$4 sm:$0xff]  }
 0x353   :  { %3924 = vmatprep.subr.bf16.mxu0 %v10992_v39  ;;  %4030 = vmatprep.subr.bf16.mxu1 %v10995_v26  ;;  %v11065_v39 = vld [vmem:[#allocation10 + $0x2c8] ss:$16 sps:$4 sm:$0xff]   ;;  %v11070_v26 = vld [vmem:[#allocation10 + $0x2e4] ss:$16 sps:$4 sm:$0xff]  }
 0x356   :  { %3925 = vmatpush1.bf16.msra.mxu0 %v10990_v24  ;;  %4031 = vmatpush1.bf16.msra.mxu1 %v10993_v0  ;;  %v11073_v24 = vld [vmem:[#allocation10 + $0x2ec] ss:$16 sps:$4 sm:$0xff]   ;;  %v11068_v0 = vld [vmem:[#allocation10 + $0x2e0] ss:$16 sps:$4 sm:$0xff]  }
 0x357   :  { %3926 = vmatprep.subr.bf16.mxu0 %v10998_v53  ;;  %4032 = vmatprep.subr.bf16.mxu1 %v11001_v45  ;;  %v11071_v53 = vld [vmem:[#allocation10 + $0x2e8] ss:$16 sps:$4 sm:$0xff]   ;;  %v11076_v45 = vld [vmem:[#allocation10 + $0x304] ss:$16 sps:$4 sm:$0xff]  }
 0x35a   :  { %3927 = vmatpush1.bf16.msra.mxu0 %v10996_v42  ;;  %4033 = vmatpush1.bf16.msra.mxu1 %v10999_v49  ;;  %v11079_v42 = vld [vmem:[#allocation10 + $0x30c] ss:$16 sps:$4 sm:$0xff]   ;;  %v11074_v49 = vld [vmem:[#allocation10 + $0x300] ss:$16 sps:$4 sm:$0xff]  }
 0x35b   :  { %3928 = vmatprep.subr.bf16.mxu0 %v11004_v32  ;;  %4034 = vmatprep.subr.bf16.mxu1 %v11007_v55  ;;  %v11077_v32 = vld [vmem:[#allocation10 + $0x308] ss:$16 sps:$4 sm:$0xff]   ;;  %v11082_v55 = vld [vmem:[#allocation10 + $0x324] ss:$16 sps:$4 sm:$0xff]  }
 0x35e   :  { %3929 = vmatpush1.bf16.msra.mxu0 %v11002_v46  ;;  %4035 = vmatpush1.bf16.msra.mxu1 %v11005_v19  ;;  %v11085_v46 = vld [vmem:[#allocation10 + $0x32c] ss:$16 sps:$4 sm:$0xff]   ;;  %v11080_v19 = vld [vmem:[#allocation10 + $0x320] ss:$16 sps:$4 sm:$0xff]  }
 0x35f   :  { %3930 = vmatprep.subr.bf16.mxu0 %v11010_v37  ;;  %4036 = vmatprep.subr.bf16.mxu1 %v11013_v5  ;;  %v11083_v37 = vld [vmem:[#allocation10 + $0x328] ss:$16 sps:$4 sm:$0xff]   ;;  %v11088_v5 = vld [vmem:[#allocation10 + $0x344] ss:$16 sps:$4 sm:$0xff]  }
 0x362   :  { %3931 = vmatpush1.bf16.msra.mxu0 %v11008_v63  ;;  %4037 = vmatpush1.bf16.msra.mxu1 %v11011_v16  ;;  %v11091_v63 = vld [vmem:[#allocation10 + $0x34c] ss:$16 sps:$4 sm:$0xff]   ;;  %v11086_v16 = vld [vmem:[#allocation10 + $0x340] ss:$16 sps:$4 sm:$0xff]  }
 0x363   :  { %3932 = vmatprep.subr.bf16.mxu0 %v11016_v3  ;;  %4038 = vmatprep.subr.bf16.mxu1 %v11019_v47  ;;  %v11089_v3 = vld [vmem:[#allocation10 + $0x348] ss:$16 sps:$4 sm:$0xff]   ;;  %v11094_v47 = vld [vmem:[#allocation10 + $0x364] ss:$16 sps:$4 sm:$0xff]  }
 0x366   :  { %3933 = vmatpush1.bf16.msra.mxu0 %v11014_v13  ;;  %4039 = vmatpush1.bf16.msra.mxu1 %v11017_v58  ;;  %v11097_v13 = vld [vmem:[#allocation10 + $0x36c] ss:$16 sps:$4 sm:$0xff]   ;;  %v11092_v58 = vld [vmem:[#allocation10 + $0x360] ss:$16 sps:$4 sm:$0xff]  }
 0x367   :  { %3934 = vmatprep.subr.bf16.mxu0 %v11022_v10  ;;  %4040 = vmatprep.subr.bf16.mxu1 %v11025_v8  ;;  %v11095_v10 = vld [vmem:[#allocation10 + $0x368] ss:$16 sps:$4 sm:$0xff]   ;;  %v11100_v8 = vld [vmem:[#allocation10 + $0x384] ss:$16 sps:$4 sm:$0xff]  }
 0x36a   :  { %3935 = vmatpush1.bf16.msra.mxu0 %v11020_v20  ;;  %4041 = vmatpush1.bf16.msra.mxu1 %v11023_v33  ;;  %v11103_v20 = vld [vmem:[#allocation10 + $0x38c] ss:$16 sps:$4 sm:$0xff]   ;;  %v11098_v33 = vld [vmem:[#allocation10 + $0x380] ss:$16 sps:$4 sm:$0xff]  }
 0x36b   :  { %3957 = vmatprep.subr.bf16.mxu0 %v11028_v30  ;;  %4063 = vmatprep.subr.bf16.mxu1 %v11031_v38  ;;  %v11101_v30 = vld [vmem:[#allocation10 + $0x388] ss:$16 sps:$4 sm:$0xff]   ;;  %v11106_v38 = vld [vmem:[#allocation10 + $0x3a4] ss:$16 sps:$4 sm:$0xff]  }
 0x36d   :  { %3937 = vmatmul.mubr.bf16.vlgmr.msra.gmra.mrb[48].mxu0 %v13202_v31  ;;  %4043 = vmatmul.mubr.bf16.vlgmr.msra.gmra.mrb[48].mxu1 %v13202_v31 }
 0x36e   :  { %3946 = vmatprep.mubr.bf16.mxu0 %v13262_v52  ;;  %3958 = vmatpush1.bf16.msra.mxu0 %v11026_v56  ;;  %v11109_v56 = vld [vmem:[#allocation10 + $0x3ac] ss:$16 sps:$4 sm:$0xff]  }
 0x36f   :  { %4052 = vmatprep.mubr.bf16.mxu1 %v13262_v52  ;;  %4064 = vmatpush1.bf16.msra.mxu1 %v11029_v40  ;;  %v11104_v40 = vld [vmem:[#allocation10 + $0x3a0] ss:$16 sps:$4 sm:$0xff]  }
 0x370   :  { %3959 = vmatprep.subr.bf16.mxu0 %v11034_v36  ;;  %4065 = vmatprep.subr.bf16.mxu1 %v11037_v15  ;;  %v11107_v36 = vld [vmem:[#allocation10 + $0x3a8] ss:$16 sps:$4 sm:$0xff]   ;;  %v11112_v15 = vld [vmem:[#allocation10 + $0x3c4] ss:$16 sps:$4 sm:$0xff]  }
 0x372   :  { %3960 = vmatpush1.bf16.msra.mxu0 %v11032_v54  ;;  %v11115_v54 = vld [vmem:[#allocation10 + $0x3cc] ss:$16 sps:$4 sm:$0xff]  }
 0x373   :  { %4066 = vmatpush1.bf16.msra.mxu1 %v11035_v61  ;;  %3961 = vmatprep.subr.bf16.mxu0 %v11040_v50  ;;  %v11110_v61 = vld [vmem:[#allocation10 + $0x3c0] ss:$16 sps:$4 sm:$0xff]   ;;  %v11113_v50 = vld [vmem:[#allocation10 + $0x3c8] ss:$16 sps:$4 sm:$0xff]  }
 0x374   :  { %4067 = vmatprep.subr.bf16.mxu1 %v11043_v14  ;;  %v11118_v14 = vld [vmem:[#allocation10 + $0x3e4] ss:$16 sps:$4 sm:$0xff]  }
 0x375   :  { %3947 = vmatmul.mubr.bf16.gmra.mrb[52].mxu0 %v13248_v57  ;;  %4053 = vmatmul.mubr.bf16.gmra.mrb[52].mxu1 %v13248_v57 }
 0x376   :  { %3962 = vmatpush1.bf16.msra.mxu0 %v11038_v23  ;;  %3989 = vmatprep.mubr.bf16.mxu0 %v13220_v35  ;;  %v11121_v23 = vld [vmem:[#allocation10 + $0x3ec] ss:$16 sps:$4 sm:$0xff]  }
 0x377   :  { %4068 = vmatpush1.bf16.msra.mxu1 %v11041_v44  ;;  %4095 = vmatprep.mubr.bf16.mxu1 %v13220_v35  ;;  %v11116_v44 = vld [vmem:[#allocation10 + $0x3e0] ss:$16 sps:$4 sm:$0xff]  }
 0x378   :  { %3963 = vmatprep.subr.bf16.mxu0 %v11046_v60  ;;  %4069 = vmatprep.subr.bf16.mxu1 %v11049_v48  ;;  %v11119_v60 = vld [vmem:[#allocation10 + $0x3e8] ss:$16 sps:$4 sm:$0xff]   ;;  %v11124_v48 = vld [vmem:[#allocation10 + $0x804] ss:$16 sps:$4 sm:$0xff]  }
 0x37a   :  { %3964 = vmatpush1.bf16.msra.mxu0 %v11044_v25  ;;  %v11127_v25 = vld [vmem:[#allocation10 + $0x80c] ss:$16 sps:$4 sm:$0xff]  }
 0x37b   :  { %4070 = vmatpush1.bf16.msra.mxu1 %v11047_v29  ;;  %3965 = vmatprep.subr.bf16.mxu0 %v11052_v7  ;;  %v11122_v29 = vld [vmem:[#allocation10 + $0x800] ss:$16 sps:$4 sm:$0xff]   ;;  %v11125_v7 = vld [vmem:[#allocation10 + $0x808] ss:$16 sps:$4 sm:$0xff]  }
 0x37c   :  { %4071 = vmatprep.subr.bf16.mxu1 %v11055_v9  ;;  %v11130_v9 = vld [vmem:[#allocation10 + $0x824] ss:$16 sps:$4 sm:$0xff]  }
 0x37e   :  { %3966 = vmatpush1.bf16.msra.mxu0 %v11050_v17  ;;  %v11133_v17 = vld [vmem:[#allocation10 + $0x82c] ss:$16 sps:$4 sm:$0xff]  }
 0x37f   :  { %4072 = vmatpush1.bf16.msra.mxu1 %v11053_v6  ;;  %3967 = vmatprep.subr.bf16.mxu0 %v11058_v43  ;;  %v11128_v6 = vld [vmem:[#allocation10 + $0x820] ss:$16 sps:$4 sm:$0xff]   ;;  %v11131_v43 = vld [vmem:[#allocation10 + $0x828] ss:$16 sps:$4 sm:$0xff]  }
 0x380   :  { %4073 = vmatprep.subr.bf16.mxu1 %v11061_v21  ;;  %v11136_v21 = vld [vmem:[#allocation10 + $0x844] ss:$16 sps:$4 sm:$0xff]  }
 0x382   :  { %3968 = vmatpush1.bf16.msra.mxu0 %v11056_v41  ;;  %v11139_v41 = vld [vmem:[#allocation10 + $0x84c] ss:$16 sps:$4 sm:$0xff]  }
 0x383   :  { %4074 = vmatpush1.bf16.msra.mxu1 %v11059_v28  ;;  %3969 = vmatprep.subr.bf16.mxu0 %v11064_v59  ;;  %v11134_v28 = vld [vmem:[#allocation10 + $0x840] ss:$16 sps:$4 sm:$0xff]   ;;  %v11137_v59 = vld [vmem:[#allocation10 + $0x848] ss:$16 sps:$4 sm:$0xff]  }
 0x384   :  { %4075 = vmatprep.subr.bf16.mxu1 %v11067_v22  ;;  %v11142_v22 = vld [vmem:[#allocation10 + $0x864] ss:$16 sps:$4 sm:$0xff]  }
 0x386   :  { %3970 = vmatpush1.bf16.msra.mxu0 %v11062_v27  ;;  %v11145_v27 = vld [vmem:[#allocation10 + $0x86c] ss:$16 sps:$4 sm:$0xff]  }
 0x387   :  { %4076 = vmatpush1.bf16.msra.mxu1 %v11065_v39  ;;  %3971 = vmatprep.subr.bf16.mxu0 %v11070_v26  ;;  %v11140_v39 = vld [vmem:[#allocation10 + $0x860] ss:$16 sps:$4 sm:$0xff]   ;;  %v11143_v26 = vld [vmem:[#allocation10 + $0x868] ss:$16 sps:$4 sm:$0xff]  }
 0x388   :  { %4077 = vmatprep.subr.bf16.mxu1 %v11073_v24  ;;  %v11148_v24 = vld [vmem:[#allocation10 + $0x884] ss:$16 sps:$4 sm:$0xff]  }
 0x38a   :  { %3972 = vmatpush1.bf16.msra.mxu0 %v11068_v0  ;;  %v11151_v0 = vld [vmem:[#allocation10 + $0x88c] ss:$16 sps:$4 sm:$0xff]  }
 0x38b   :  { %4078 = vmatpush1.bf16.msra.mxu1 %v11071_v53  ;;  %3973 = vmatprep.subr.bf16.mxu0 %v11076_v45  ;;  %v11146_v53 = vld [vmem:[#allocation10 + $0x880] ss:$16 sps:$4 sm:$0xff]   ;;  %v11149_v45 = vld [vmem:[#allocation10 + $0x888] ss:$16 sps:$4 sm:$0xff]  }
 0x38c   :  { %4079 = vmatprep.subr.bf16.mxu1 %v11079_v42  ;;  %v11154_v42 = vld [vmem:[#allocation10 + $0x8a4] ss:$16 sps:$4 sm:$0xff]  }
 0x38e   :  { %3974 = vmatpush1.bf16.msra.mxu0 %v11074_v49  ;;  %v11157_v49 = vld [vmem:[#allocation10 + $0x8ac] ss:$16 sps:$4 sm:$0xff]  }
 0x38f   :  { %4080 = vmatpush1.bf16.msra.mxu1 %v11077_v32  ;;  %3975 = vmatprep.subr.bf16.mxu0 %v11082_v55  ;;  %v11152_v32 = vld [vmem:[#allocation10 + $0x8a0] ss:$16 sps:$4 sm:$0xff]   ;;  %v11160_v55 = vld [vmem:[#allocation10 + $0x8c4] ss:$16 sps:$4 sm:$0xff]  }
 0x390   :  { %4081 = vmatprep.subr.bf16.mxu1 %v11085_v46  ;;  %v11163_v46 = vld [vmem:[#allocation10 + $0x8cc] ss:$16 sps:$4 sm:$0xff]  }
 0x392   :  { %3976 = vmatpush1.bf16.msra.mxu0 %v11080_v19  ;;  %v11158_v19 = vld [vmem:[#allocation10 + $0x8c0] ss:$16 sps:$4 sm:$0xff]  }
 0x393   :  { %4082 = vmatpush1.bf16.msra.mxu1 %v11083_v37  ;;  %3977 = vmatprep.subr.bf16.mxu0 %v11088_v5  ;;  %v11161_v37 = vld [vmem:[#allocation10 + $0x8c8] ss:$16 sps:$4 sm:$0xff]   ;;  %v11166_v5 = vld [vmem:[#allocation10 + $0x8e4] ss:$16 sps:$4 sm:$0xff]  }
 0x394   :  { %4083 = vmatprep.subr.bf16.mxu1 %v11091_v63  ;;  %v11169_v63 = vld [vmem:[#allocation10 + $0x8ec] ss:$16 sps:$4 sm:$0xff]  }
 0x396   :  { %3978 = vmatpush1.bf16.msra.mxu0 %v11086_v16  ;;  %v11164_v16 = vld [vmem:[#allocation10 + $0x8e0] ss:$16 sps:$4 sm:$0xff]  }
 0x397   :  { %4084 = vmatpush1.bf16.msra.mxu1 %v11089_v3  ;;  %3979 = vmatprep.subr.bf16.mxu0 %v11094_v47  ;;  %v11167_v3 = vld [vmem:[#allocation10 + $0x8e8] ss:$16 sps:$4 sm:$0xff]   ;;  %v11172_v47 = vld [vmem:[#allocation10 + $0x904] ss:$16 sps:$4 sm:$0xff]  }
 0x398   :  { %4085 = vmatprep.subr.bf16.mxu1 %v11097_v13  ;;  %v11175_v13 = vld [vmem:[#allocation10 + $0x90c] ss:$16 sps:$4 sm:$0xff]  }
 0x39a   :  { %3980 = vmatpush1.bf16.msra.mxu0 %v11092_v58  ;;  %v11170_v58 = vld [vmem:[#allocation10 + $0x900] ss:$16 sps:$4 sm:$0xff]  }
 0x39b   :  { %4086 = vmatpush1.bf16.msra.mxu1 %v11095_v10  ;;  %3981 = vmatprep.subr.bf16.mxu0 %v11100_v8  ;;  %v11173_v10 = vld [vmem:[#allocation10 + $0x908] ss:$16 sps:$4 sm:$0xff]   ;;  %v11178_v8 = vld [vmem:[#allocation10 + $0x924] ss:$16 sps:$4 sm:$0xff]  }
 0x39c   :  { %4087 = vmatprep.subr.bf16.mxu1 %v11103_v20  ;;  %v11181_v20 = vld [vmem:[#allocation10 + $0x92c] ss:$16 sps:$4 sm:$0xff]  }
 0x39e   :  { %3982 = vmatpush1.bf16.msra.mxu0 %v11098_v33  ;;  %v11176_v33 = vld [vmem:[#allocation10 + $0x920] ss:$16 sps:$4 sm:$0xff]  }
 0x39f   :  { %4088 = vmatpush1.bf16.msra.mxu1 %v11101_v30  ;;  %3983 = vmatprep.subr.bf16.mxu0 %v11106_v38  ;;  %v11179_v30 = vld [vmem:[#allocation10 + $0x928] ss:$16 sps:$4 sm:$0xff]   ;;  %v11184_v38 = vld [vmem:[#allocation10 + $0x944] ss:$16 sps:$4 sm:$0xff]  }
 0x3a0   :  { %4089 = vmatprep.subr.bf16.mxu1 %v11109_v56  ;;  %v11187_v56 = vld [vmem:[#allocation10 + $0x94c] ss:$16 sps:$4 sm:$0xff]  }
 0x3a2   :  { %3984 = vmatpush1.bf16.msra.mxu0 %v11104_v40  ;;  %v11182_v40 = vld [vmem:[#allocation10 + $0x940] ss:$16 sps:$4 sm:$0xff]  }
 0x3a3   :  { %4090 = vmatpush1.bf16.msra.mxu1 %v11107_v36  ;;  %3985 = vmatprep.subr.bf16.mxu0 %v11112_v15  ;;  %v11185_v36 = vld [vmem:[#allocation10 + $0x948] ss:$16 sps:$4 sm:$0xff]   ;;  %v11190_v15 = vld [vmem:[#allocation10 + $0x964] ss:$16 sps:$4 sm:$0xff]  }
 0x3a4   :  { %4091 = vmatprep.subr.bf16.mxu1 %v11115_v54  ;;  %v11193_v54 = vld [vmem:[#allocation10 + $0x96c] ss:$16 sps:$4 sm:$0xff]  }
 0x3a6   :  { %3986 = vmatpush1.bf16.msra.mxu0 %v11110_v61  ;;  %v11188_v61 = vld [vmem:[#allocation10 + $0x960] ss:$16 sps:$4 sm:$0xff]  }
 0x3a7   :  { %4092 = vmatpush1.bf16.msra.mxu1 %v11113_v50  ;;  %3987 = vmatprep.subr.bf16.mxu0 %v11118_v14  ;;  %v11191_v50 = vld [vmem:[#allocation10 + $0x968] ss:$16 sps:$4 sm:$0xff]   ;;  %v11196_v14 = vld [vmem:[#allocation10 + $0x984] ss:$16 sps:$4 sm:$0xff]  }
 0x3a8   :  { %4093 = vmatprep.subr.bf16.mxu1 %v11121_v23  ;;  %v11199_v23 = vld [vmem:[#allocation10 + $0x98c] ss:$16 sps:$4 sm:$0xff]  }
 0x3aa   :  { %3988 = vmatpush1.bf16.msra.mxu0 %v11116_v44  ;;  %v11194_v44 = vld [vmem:[#allocation10 + $0x980] ss:$16 sps:$4 sm:$0xff]  }
 0x3ab   :  { %4094 = vmatpush1.bf16.msra.mxu1 %v11119_v60  ;;  %4884 = vmatprep.subr.bf16.mxu0 %v11124_v48  ;;  %v11197_v60 = vld [vmem:[#allocation10 + $0x988] ss:$16 sps:$4 sm:$0xff]   ;;  %v11202_v48 = vld [vmem:[#allocation10 + $0x9a4] ss:$16 sps:$4 sm:$0xff]  }
 0x3ac   :  { %4990 = vmatprep.subr.bf16.mxu1 %v11127_v25  ;;  %v11205_v25 = vld [vmem:[#allocation10 + $0x9ac] ss:$16 sps:$4 sm:$0xff]  }
 0x3ad   :  { %3990 = vmatmul.mubr.bf16.vlgmr.msra.gmra.mrb[48].mxu0 %v13204_v62 }
 0x3ae   :  { %4096 = vmatmul.mubr.bf16.vlgmr.msra.gmra.mrb[48].mxu1 %v13204_v62  ;;  %3999 = vmatprep.mubr.bf16.mxu0 %v13266_v4 }
 0x3af   :  { %4105 = vmatprep.mubr.bf16.mxu1 %v13266_v4  ;;  %4885 = vmatpush1.bf16.msra.mxu0 %v11122_v29  ;;  %v11200_v29 = vld [vmem:[#allocation10 + $0x9a0] ss:$16 sps:$4 sm:$0xff]  }
 0x3b0   :  { %4991 = vmatpush1.bf16.msra.mxu1 %v11125_v7  ;;  %4886 = vmatprep.subr.bf16.mxu0 %v11130_v9  ;;  %v11203_v7 = vld [vmem:[#allocation10 + $0x9a8] ss:$16 sps:$4 sm:$0xff]   ;;  %v11208_v9 = vld [vmem:[#allocation10 + $0x9c4] ss:$16 sps:$4 sm:$0xff]  }
 0x3b1   :  { %4992 = vmatprep.subr.bf16.mxu1 %v11133_v17  ;;  %v11211_v17 = vld [vmem:[#allocation10 + $0x9cc] ss:$16 sps:$4 sm:$0xff]  }
 0x3b3   :  { %4887 = vmatpush1.bf16.msra.mxu0 %v11128_v6  ;;  %v11206_v6 = vld [vmem:[#allocation10 + $0x9c0] ss:$16 sps:$4 sm:$0xff]  }
 0x3b4   :  { %4993 = vmatpush1.bf16.msra.mxu1 %v11131_v43  ;;  %4888 = vmatprep.subr.bf16.mxu0 %v11136_v21  ;;  %v11209_v43 = vld [vmem:[#allocation10 + $0x9c8] ss:$16 sps:$4 sm:$0xff]   ;;  %v11214_v21 = vld [vmem:[#allocation10 + $0x9e4] ss:$16 sps:$4 sm:$0xff]  }
 0x3b5   :  { %4000 = vmatmul.mubr.bf16.gmra.mrb[52].mxu0 %v13254_v2  ;;  %4994 = vmatprep.subr.bf16.mxu1 %v11139_v41  ;;  %v11217_v41 = vld [vmem:[#allocation10 + $0x9ec] ss:$16 sps:$4 sm:$0xff]  }
 0x3b6   :  { %4106 = vmatmul.mubr.bf16.gmra.mrb[52].mxu1 %v13254_v2  ;;  %4916 = vmatprep.mubr.bf16.mxu0 %v13218_v34 }
 0x3b7   :  { %4889 = vmatpush1.bf16.msra.mxu0 %v11134_v28  ;;  %5022 = vmatprep.mubr.bf16.mxu1 %v13218_v34  ;;  %v11155_v34 = vld [vmem:[#allocation10 + $0x8a8] ss:$16 sps:$4 sm:$0xff]   ;;  %v11212_v28 = vld [vmem:[#allocation10 + $0x9e0] ss:$16 sps:$4 sm:$0xff]  }
 0x3b8   :  { %4995 = vmatpush1.bf16.msra.mxu1 %v11137_v59  ;;  %4890 = vmatprep.subr.bf16.mxu0 %v11142_v22  ;;  %v11215_v59 = vld [vmem:[#allocation10 + $0x9e8] ss:$16 sps:$4 sm:$0xff]   ;;  %v11220_v22 = vld [vmem:[#allocation10 + $0xa04] ss:$16 sps:$4 sm:$0xff]  }
 0x3b9   :  { %4996 = vmatprep.subr.bf16.mxu1 %v11145_v27  ;;  %v11223_v27 = vld [vmem:[#allocation10 + $0xa0c] ss:$16 sps:$4 sm:$0xff]  }
 0x3bb   :  { %4891 = vmatpush1.bf16.msra.mxu0 %v11140_v39  ;;  %v11218_v39 = vld [vmem:[#allocation10 + $0xa00] ss:$16 sps:$4 sm:$0xff]  }
 0x3bc   :  { %4997 = vmatpush1.bf16.msra.mxu1 %v11143_v26  ;;  %4892 = vmatprep.subr.bf16.mxu0 %v11148_v24  ;;  %v11221_v26 = vld [vmem:[#allocation10 + $0xa08] ss:$16 sps:$4 sm:$0xff]   ;;  %v11226_v24 = vld [vmem:[#allocation10 + $0xa24] ss:$16 sps:$4 sm:$0xff]  }
 0x3bd   :  { %4998 = vmatprep.subr.bf16.mxu1 %v11151_v0  ;;  %v11229_v0 = vld [vmem:[#allocation10 + $0xa2c] ss:$16 sps:$4 sm:$0xff]  }
 0x3bf   :  { %4893 = vmatpush1.bf16.msra.mxu0 %v11146_v53  ;;  %v11224_v53 = vld [vmem:[#allocation10 + $0xa20] ss:$16 sps:$4 sm:$0xff]  }
 0x3c0   :  { %4999 = vmatpush1.bf16.msra.mxu1 %v11149_v45  ;;  %4894 = vmatprep.subr.bf16.mxu0 %v11154_v42  ;;  %v11227_v45 = vld [vmem:[#allocation10 + $0xa28] ss:$16 sps:$4 sm:$0xff]   ;;  %v11232_v42 = vld [vmem:[#allocation10 + $0xa44] ss:$16 sps:$4 sm:$0xff]  }
 0x3c1   :  { %5000 = vmatprep.subr.bf16.mxu1 %v11157_v49  ;;  %v11235_v49 = vld [vmem:[#allocation10 + $0xa4c] ss:$16 sps:$4 sm:$0xff]  }
 0x3c3   :  { %4895 = vmatpush1.bf16.msra.mxu0 %v11152_v32  ;;  %v11230_v32 = vld [vmem:[#allocation10 + $0xa40] ss:$16 sps:$4 sm:$0xff]  }
 0x3c4   :  { %5001 = vmatpush1.bf16.msra.mxu1 %v11155_v34  ;;  %4896 = vmatprep.subr.bf16.mxu0 %v11160_v55  ;;  %v11233_v34 = vld [vmem:[#allocation10 + $0xa48] ss:$16 sps:$4 sm:$0xff]   ;;  %v11238_v55 = vld [vmem:[#allocation10 + $0xa64] ss:$16 sps:$4 sm:$0xff]  }
 0x3c5   :  { %5002 = vmatprep.subr.bf16.mxu1 %v11163_v46  ;;  %v11239_v46 = vld [vmem:[#allocation10 + $0xa68] ss:$16 sps:$4 sm:$0xff]  }
 0x3c7   :  { %4897 = vmatpush1.bf16.msra.mxu0 %v11158_v19  ;;  %v11244_v19 = vld [vmem:[#allocation10 + $0xa84] ss:$16 sps:$4 sm:$0xff]  }
 0x3c8   :  { %5003 = vmatpush1.bf16.msra.mxu1 %v11161_v37  ;;  %4898 = vmatprep.subr.bf16.mxu0 %v11166_v5  ;;  %v11247_v37 = vld [vmem:[#allocation10 + $0xa8c] ss:$16 sps:$4 sm:$0xff]   ;;  %v11242_v5 = vld [vmem:[#allocation10 + $0xa80] ss:$16 sps:$4 sm:$0xff]  }
 0x3c9   :  { %5004 = vmatprep.subr.bf16.mxu1 %v11169_v63  ;;  %v11245_v63 = vld [vmem:[#allocation10 + $0xa88] ss:$16 sps:$4 sm:$0xff]  }
 0x3cb   :  { %4899 = vmatpush1.bf16.msra.mxu0 %v11164_v16  ;;  %v11250_v16 = vld [vmem:[#allocation10 + $0xaa4] ss:$16 sps:$4 sm:$0xff]  }
 0x3cc   :  { %5005 = vmatpush1.bf16.msra.mxu1 %v11167_v3  ;;  %4900 = vmatprep.subr.bf16.mxu0 %v11172_v47 }
 0x3cd   :  { %5006 = vmatprep.subr.bf16.mxu1 %v11175_v13 }
 0x3cf   :  { %4901 = vmatpush1.bf16.msra.mxu0 %v11170_v58  ;;  %v11248_v58 = vld [vmem:[#allocation10 + $0xaa0] ss:$16 sps:$4 sm:$0xff]  }
 0x3d0   :  { %5007 = vmatpush1.bf16.msra.mxu1 %v11173_v10  ;;  %4902 = vmatprep.subr.bf16.mxu0 %v11178_v8  ;;  %v11251_v10 = vld [vmem:[#allocation10 + $0xaa8] ss:$16 sps:$4 sm:$0xff]  }
 0x3d1   :  { %5008 = vmatprep.subr.bf16.mxu1 %v11181_v20 }
 0x3d3   :  { %4903 = vmatpush1.bf16.msra.mxu0 %v11176_v33  ;;  %v11256_v33 = vld [vmem:[#allocation10 + $0xac4] ss:$16 sps:$4 sm:$0xff]  }
 0x3d4   :  { %5009 = vmatpush1.bf16.msra.mxu1 %v11179_v30  ;;  %4904 = vmatprep.subr.bf16.mxu0 %v11184_v38  ;;  %v11259_v30 = vld [vmem:[#allocation10 + $0xacc] ss:$16 sps:$4 sm:$0xff]  }
 0x3d5   :  { %5010 = vmatprep.subr.bf16.mxu1 %v11187_v56 }
 0x3d7   :  { %4905 = vmatpush1.bf16.msra.mxu0 %v11182_v40 }
 0x3d8   :  { %5011 = vmatpush1.bf16.msra.mxu1 %v11185_v36  ;;  %4906 = vmatprep.subr.bf16.mxu0 %v11190_v15 }
 0x3d9   :  { %5012 = vmatprep.subr.bf16.mxu1 %v11193_v54 }
 0x3db   :  { %4907 = vmatpush1.bf16.msra.mxu0 %v11188_v61 }
 0x3dc   :  { %5013 = vmatpush1.bf16.msra.mxu1 %v11191_v50  ;;  %4908 = vmatprep.subr.bf16.mxu0 %v11196_v14 }
 0x3dd   :  { %5014 = vmatprep.subr.bf16.mxu1 %v11199_v23 }
 0x3df   :  { %4909 = vmatpush1.bf16.msra.mxu0 %v11194_v44  ;;  %v11254_v44 = vld [vmem:[#allocation10 + $0xac0] ss:$16 sps:$4 sm:$0xff]  }
 0x3e0   :  { %5015 = vmatpush1.bf16.msra.mxu1 %v11197_v60  ;;  %4910 = vmatprep.subr.bf16.mxu0 %v11202_v48 }
 0x3e1   :  { %5016 = vmatprep.subr.bf16.mxu1 %v11205_v25  ;;  %v11257_v25 = vld [vmem:[#allocation10 + $0xac8] ss:$16 sps:$4 sm:$0xff]  }
 0x3e3   :  { %4911 = vmatpush1.bf16.msra.mxu0 %v11200_v29  ;;  %v11262_v29 = vld [vmem:[#allocation10 + $0xae4] ss:$16 sps:$4 sm:$0xff]  }
 0x3e4   :  { %5017 = vmatpush1.bf16.msra.mxu1 %v11203_v7  ;;  %4912 = vmatprep.subr.bf16.mxu0 %v11208_v9 }
 0x3e5   :  { %5018 = vmatprep.subr.bf16.mxu1 %v11211_v17  ;;  %v11265_v17 = vld [vmem:[#allocation10 + $0xaec] ss:$16 sps:$4 sm:$0xff]  }
 0x3e7   :  { %4913 = vmatpush1.bf16.msra.mxu0 %v11206_v6 }
 0x3e8   :  { %5019 = vmatpush1.bf16.msra.mxu1 %v11209_v43  ;;  %4914 = vmatprep.subr.bf16.mxu0 %v11214_v21  ;;  %v11260_v21 = vld [vmem:[#allocation10 + $0xae0] ss:$16 sps:$4 sm:$0xff]  }
 0x3e9   :  { %5020 = vmatprep.subr.bf16.mxu1 %v11217_v41 }
 0x3eb   :  { %4915 = vmatpush1.bf16.msra.mxu0 %v11212_v28 }
 0x3ec   :  { %5021 = vmatpush1.bf16.msra.mxu1 %v11215_v59  ;;  %4937 = vmatprep.subr.bf16.mxu0 %v11220_v22 }
 0x3ed   :  { %5043 = vmatprep.subr.bf16.mxu1 %v11223_v27  ;;  %v11263_v27 = vld [vmem:[#allocation10 + $0xae8] ss:$16 sps:$4 sm:$0xff]  }
 0x3ee   :  { %4917 = vmatmul.mubr.bf16.vlgmr.msra.gmra.mrb[56].mxu0 %v13202_v31 }
 0x3ef   :  { %5023 = vmatmul.mubr.bf16.vlgmr.msra.gmra.mrb[56].mxu1 %v13202_v31  ;;  %4926 = vmatprep.mubr.bf16.mxu0 %v13262_v52  ;;  %v11241_v31 = vld [vmem:[#allocation10 + $0xa6c] ss:$16 sps:$4 sm:$0xff]  }
 0x3f0   :  { %4938 = vmatpush1.bf16.msra.mxu0 %v11218_v39  ;;  %5032 = vmatprep.mubr.bf16.mxu1 %v13262_v52  ;;  %v11236_v52 = vld [vmem:[#allocation10 + $0xa60] ss:$16 sps:$4 sm:$0xff]  }
 0x3f1   :  { %5044 = vmatpush1.bf16.msra.mxu1 %v11221_v26  ;;  %4939 = vmatprep.subr.bf16.mxu0 %v11226_v24 }
 0x3f2   :  { %5045 = vmatprep.subr.bf16.mxu1 %v11229_v0 }
 0x3f4   :  { %4940 = vmatpush1.bf16.msra.mxu0 %v11224_v53  ;;  %v11268_v53 = vld [vmem:[#allocation10 + $0xb04] ss:$16 sps:$4 sm:$0xff]  }
 0x3f5   :  { %5046 = vmatpush1.bf16.msra.mxu1 %v11227_v45  ;;  %4941 = vmatprep.subr.bf16.mxu0 %v11232_v42 }
 0x3f6   :  { %4927 = vmatmul.mubr.bf16.gmra.mrb[60].mxu0 %v13248_v57  ;;  %5047 = vmatprep.subr.bf16.mxu1 %v11235_v49 }
 0x3f7   :  { %5033 = vmatmul.mubr.bf16.gmra.mrb[60].mxu1 %v13248_v57  ;;  %4969 = vmatprep.mubr.bf16.mxu0 %v13220_v35  ;;  %v11253_v57 = vld [vmem:[#allocation10 + $0xaac] ss:$16 sps:$4 sm:$0xff]  }
 0x3f8   :  { %4942 = vmatpush1.bf16.msra.mxu0 %v11230_v32  ;;  %5075 = vmatprep.mubr.bf16.mxu1 %v13220_v35 }
 0x3f9   :  { %5048 = vmatpush1.bf16.msra.mxu1 %v11233_v34  ;;  %4943 = vmatprep.subr.bf16.mxu0 %v11238_v55  ;;  %v11271_v34 = vld [vmem:[#allocation10 + $0xb0c] ss:$16 sps:$4 sm:$0xff]  }
 0x3fa   :  { %5049 = vmatprep.subr.bf16.mxu1 %v11241_v31 }
 0x3fc   :  { %4944 = vmatpush1.bf16.msra.mxu0 %v11236_v52 }
 0x3fd   :  { %5050 = vmatpush1.bf16.msra.mxu1 %v11239_v46  ;;  %4945 = vmatprep.subr.bf16.mxu0 %v11244_v19 }
 0x3fe   :  { %5051 = vmatprep.subr.bf16.mxu1 %v11247_v37 }
 0x3ff   :  { %v13304_v3 = vpop.f32.mrb[40].mxu0  ;;  %v13306_v47 = vpop.f32.mrb[40].mxu1 }
 0x400   :  { %4946 = vmatpush1.bf16.msra.mxu0 %v11242_v5  ;;  %v13308_v35 = vpop.f32.mrb[41].mxu0  ;;  %v13310_v13 = vpop.f32.mrb[41].mxu1  ;;  %v3232_v38 = vrot.slane %v13304_v3, 1  ;;  %v3234_v56 = vrot.slane %v13306_v47, 1  ;;  %v11266_v5 = vld [vmem:[#allocation10 + $0xb00] ss:$16 sps:$4 sm:$0xff]  }
 0x401   :  { %5052 = vmatpush1.bf16.msra.mxu1 %v11245_v63  ;;  %4947 = vmatprep.subr.bf16.mxu0 %v11250_v16  ;;  %v3111_v8 = vpop.f32.mrb[42].mxu0  ;;  %v3217_v20 = vpop.f32.mrb[42].mxu1  ;;  %v3233_v61 = vrot.slane %v13308_v35, 1  ;;  %v3235_v50 = vrot.slane %v13310_v13, 1  ;;  %v11269_v47 = vld [vmem:[#allocation10 + $0xb08] ss:$16 sps:$4 sm:$0xff]  }
 0x402   :  { %5053 = vmatprep.subr.bf16.mxu1 %v11253_v57  ;;  %v3236_v40 = vrot.slane %v3111_v8, 1  ;;  %v3238_v36 = vrot.slane %v3217_v20, 1  ;;  %v3113_v15 = vpop.f32.mrb[43].mxu0  ;;  %v3219_v54 = vpop.f32.mrb[43].mxu1  ;;  %v11274_v35 = vld [vmem:[#allocation10 + $0xb24] ss:$16 sps:$4 sm:$0xff]  }
 0x403   :  { %v3237_v14 = vrot.slane %v3113_v15, 1  ;;  %v3239_v23 = vrot.slane %v3219_v54, 1  ;;  %v11277_v8 = vld [vmem:[#allocation10 + $0xb2c] ss:$16 sps:$4 sm:$0xff]   ;;  %v11286_v15 = vld [vmem:[#allocation10 + $0xb64] ss:$16 sps:$4 sm:$0xff]  }
 0x404   :  { %4948 = vmatpush1.bf16.msra.mxu0 %v11248_v58  ;;  %v13318_v60 = vsel %vm646_vm0, %v3232_v38, %v3236_v40  ;;  %v13322_v48 = vsel %vm646_vm0, %v3234_v56, %v3238_v36  ;;  %v11289_v54 = vld [vmem:[#allocation10 + $0xb6c] ss:$16 sps:$4 sm:$0xff]  }
 0x405   :  { %5054 = vmatpush1.bf16.msra.mxu1 %v11251_v10  ;;  %4949 = vmatprep.subr.bf16.mxu0 %v11256_v33  ;;  %v13326_v7 = vsel %vm646_vm0, %v3233_v61, %v3237_v14  ;;  %v13330_v9 = vsel %vm646_vm0, %v3235_v50, %v3239_v23  ;;  %v11272_v33 = vld [vmem:[#allocation10 + $0xb20] ss:$16 sps:$4 sm:$0xff]  }
 0x406   :  { %5055 = vmatprep.subr.bf16.mxu1 %v11259_v30  ;;  %v11275_v30 = vld [vmem:[#allocation10 + $0xb28] ss:$16 sps:$4 sm:$0xff]  }
 0x407   :  { %v3117_v6 = vpop.f32.mrb[44].mxu0  ;;  %v3223_v43 = vpop.f32.mrb[44].mxu1 }
 0x408   :  { %4950 = vmatpush1.bf16.msra.mxu0 %v11254_v44  ;;  %v3240_v41 = vrot.slane %v3117_v6, 1  ;;  %v3242_v28 = vrot.slane %v3223_v43, 1  ;;  %v3119_v59 = vpop.f32.mrb[45].mxu0  ;;  %v3225_v22 = vpop.f32.mrb[45].mxu1  ;;  %v11290_v44 = vld [vmem:[#allocation10 + $0xb80] ss:$16 sps:$4 sm:$0xff]  }
 0x409   :  { %5056 = vmatpush1.bf16.msra.mxu1 %v11257_v25  ;;  %v3241_v39 = vrot.slane %v3119_v59, 1  ;;  %v3243_v26 = vrot.slane %v3225_v22, 1  ;;  %4951 = vmatprep.subr.bf16.mxu0 %v11262_v29  ;;  %v3121_v24 = vpop.f32.mrb[46].mxu0  ;;  %v3227_v0 = vpop.f32.mrb[46].mxu1  ;;  %v11293_v25 = vld [vmem:[#allocation10 + $0xb88] ss:$16 sps:$4 sm:$0xff]  }
 0x40a   :  { %5057 = vmatprep.subr.bf16.mxu1 %v11265_v17  ;;  %v3244_v45 = vrot.slane %v3121_v24, 1  ;;  %v3246_v42 = vrot.slane %v3227_v0, 1  ;;  %v3123_v49 = vpop.f32.mrb[47].mxu0  ;;  %v3229_v32 = vpop.f32.mrb[47].mxu1  ;;  %v13334_v55 = vsel %vm646_vm0, %v3236_v40, %v3240_v41  ;;  %v13338_v31 = vsel %vm646_vm0, %v3238_v36, %v3242_v28  ;;  %v11278_v40 = vld [vmem:[#allocation10 + $0xb40] ss:$16 sps:$4 sm:$0xff]  }
 0x40b   :  { %v3245_v52 = vrot.slane %v3123_v49, 1  ;;  %v3247_v46 = vrot.slane %v3229_v32, 1  ;;  %v13342_v19 = vsel %vm646_vm0, %v3237_v14, %v3241_v39  ;;  %v13346_v37 = vsel %vm646_vm0, %v3239_v23, %v3243_v26  ;;  %v11281_v36 = vld [vmem:[#allocation10 + $0xb48] ss:$16 sps:$4 sm:$0xff]   ;;  %v11292_v14 = vld [vmem:[#allocation10 + $0xb84] ss:$16 sps:$4 sm:$0xff]  }
 0x40c   :  { %4952 = vmatpush1.bf16.msra.mxu0 %v11260_v21  ;;  %v13350_v63 = vsel %vm646_vm0, %v3240_v41, %v3244_v45  ;;  %v13354_v16 = vsel %vm646_vm0, %v3242_v28, %v3246_v42  ;;  %v13358_v57 = vsel %vm646_vm0, %v3244_v45, %v3232_v38  ;;  %v13362_v3 = vsel %vm646_vm0, %v3246_v42, %v3234_v56  ;;  %v11280_v38 = vld [vmem:[#allocation10 + $0xb44] ss:$16 sps:$4 sm:$0xff]   ;;  %v11283_v56 = vld [vmem:[#allocation10 + $0xb4c] ss:$16 sps:$4 sm:$0xff]   ;;  %v11296_v6 = vld [vmem:[#allocation10 + $0xba0] ss:$16 sps:$4 sm:$0xff]  }
 0x40d   :  { %5058 = vmatpush1.bf16.msra.mxu1 %v11263_v27  ;;  %4953 = vmatprep.subr.bf16.mxu0 %v11268_v53  ;;  %v13366_v13 = vsel %vm646_vm0, %v3241_v39, %v3245_v52  ;;  %v13370_v58 = vsel %vm646_vm0, %v3243_v26, %v3247_v46  ;;  %v13374_v10 = vsel %vm646_vm0, %v3245_v52, %v3233_v61  ;;  %v11284_v61 = vld [vmem:[#allocation10 + $0xb60] ss:$16 sps:$4 sm:$0xff]   ;;  %v11295_v23 = vld [vmem:[#allocation10 + $0xb8c] ss:$16 sps:$4 sm:$0xff]   ;;  %v11298_v29 = vld [vmem:[#allocation10 + $0xba4] ss:$16 sps:$4 sm:$0xff]  }
 0x40e   :  { %5059 = vmatprep.subr.bf16.mxu1 %v11271_v34  ;;  %v13378_v20 = vsel %vm646_vm0, %v3247_v46, %v3235_v50  ;;  %v11287_v50 = vld [vmem:[#allocation10 + $0xb68] ss:$16 sps:$4 sm:$0xff]   ;;  %v11301_v17 = vld [vmem:[#allocation10 + $0xbac] ss:$16 sps:$4 sm:$0xff]   ;;  %v11304_v21 = vld [vmem:[#allocation10 + $0xbc4] ss:$16 sps:$4 sm:$0xff]  }
 0x40f   :  { %v11299_v43 = vld [vmem:[#allocation10 + $0xba8] ss:$16 sps:$4 sm:$0xff]   ;;  %v11307_v41 = vld [vmem:[#allocation10 + $0xbcc] ss:$16 sps:$4 sm:$0xff]   ;;  %v11302_v28 = vld [vmem:[#allocation10 + $0xbc0] ss:$16 sps:$4 sm:$0xff]  }
 0x410   :  { %4954 = vmatpush1.bf16.msra.mxu0 %v11266_v5  ;;  %v11305_v59 = vld [vmem:[#allocation10 + $0xbc8] ss:$16 sps:$4 sm:$0xff]   ;;  %v11310_v22 = vld [vmem:[#allocation10 + $0xbe4] ss:$16 sps:$4 sm:$0xff]   ;;  %v11313_v27 = vld [vmem:[#allocation10 + $0xbec] ss:$16 sps:$4 sm:$0xff]  }
 0x411   :  { %5060 = vmatpush1.bf16.msra.mxu1 %v11269_v47  ;;  %4955 = vmatprep.subr.bf16.mxu0 %v11274_v35  ;;  %v11308_v39 = vld [vmem:[#allocation10 + $0xbe0] ss:$16 sps:$4 sm:$0xff]   ;;  %v11311_v26 = vld [vmem:[#allocation10 + $0xbe8] ss:$16 sps:$4 sm:$0xff]   ;;  %v11314_v53 = vld [vmem:[#allocation16 + $0x400] ss:$16 sps:$4 sm:$0xff]  }
 0x412   :  { %5061 = vmatprep.subr.bf16.mxu1 %v11277_v8  ;;  %v11316_v24 = vld [vmem:[#allocation16 + $0x404] ss:$16 sps:$4 sm:$0xff]   ;;  %v11319_v0 = vld [vmem:[#allocation16 + $0x40c] ss:$16 sps:$4 sm:$0xff]   ;;  %v11317_v45 = vld [vmem:[#allocation16 + $0x408] ss:$16 sps:$4 sm:$0xff]  }
 0x413   :  { %v11322_v42 = vld [vmem:[#allocation16 + $0x424] ss:$16 sps:$4 sm:$0xff]   ;;  %v11325_v49 = vld [vmem:[#allocation16 + $0x42c] ss:$16 sps:$4 sm:$0xff]   ;;  %v11320_v32 = vld [vmem:[#allocation16 + $0x420] ss:$16 sps:$4 sm:$0xff]  }
 0x414   :  { %4956 = vmatpush1.bf16.msra.mxu0 %v11272_v33  ;;  %v11323_v34 = vld [vmem:[#allocation16 + $0x428] ss:$16 sps:$4 sm:$0xff]   ;;  %v11328_v52 = vld [vmem:[#allocation16 + $0x444] ss:$16 sps:$4 sm:$0xff]   ;;  %v11331_v46 = vld [vmem:[#allocation16 + $0x44c] ss:$16 sps:$4 sm:$0xff]  }
 0x415   :  { %5062 = vmatpush1.bf16.msra.mxu1 %v11275_v30  ;;  %4957 = vmatprep.subr.bf16.mxu0 %v11280_v38  ;;  %v11326_v5 = vld [vmem:[#allocation16 + $0x440] ss:$16 sps:$4 sm:$0xff]   ;;  %v11329_v47 = vld [vmem:[#allocation16 + $0x448] ss:$16 sps:$4 sm:$0xff]   ;;  %v11334_v35 = vld [vmem:[#allocation16 + $0x464] ss:$16 sps:$4 sm:$0xff]  }
 0x416   :  { %5063 = vmatprep.subr.bf16.mxu1 %v11283_v56  ;;  %v11335_v8 = vld [vmem:[#allocation16 + $0x468] ss:$16 sps:$4 sm:$0xff]   ;;  %v11340_v33 = vld [vmem:[#allocation16 + $0x484] ss:$16 sps:$4 sm:$0xff]   ;;  %v11343_v30 = vld [vmem:[#allocation16 + $0x48c] ss:$16 sps:$4 sm:$0xff]  }
 0x417   :  { %v11338_v38 = vld [vmem:[#allocation16 + $0x480] ss:$16 sps:$4 sm:$0xff]   ;;  %v11341_v56 = vld [vmem:[#allocation16 + $0x488] ss:$16 sps:$4 sm:$0xff]  }
 0x418   :  { %4958 = vmatpush1.bf16.msra.mxu0 %v11278_v40  ;;  %v11346_v40 = vld [vmem:[#allocation16 + $0x4a4] ss:$16 sps:$4 sm:$0xff]  }
 0x419   :  { %5064 = vmatpush1.bf16.msra.mxu1 %v11281_v36  ;;  %4959 = vmatprep.subr.bf16.mxu0 %v11286_v15  ;;  %v11349_v36 = vld [vmem:[#allocation16 + $0x4ac] ss:$16 sps:$4 sm:$0xff]   ;;  %v11344_v15 = vld [vmem:[#allocation16 + $0x4a0] ss:$16 sps:$4 sm:$0xff]  }
 0x41a   :  { %5065 = vmatprep.subr.bf16.mxu1 %v11289_v54  ;;  %v11352_v54 = vld [vmem:[#allocation16 + $0x4c4] ss:$16 sps:$4 sm:$0xff]  }
 0x41c   :  { %4960 = vmatpush1.bf16.msra.mxu0 %v11284_v61  ;;  %v11355_v61 = vld [vmem:[#allocation16 + $0x4cc] ss:$16 sps:$4 sm:$0xff]  }
 0x41d   :  { %5066 = vmatpush1.bf16.msra.mxu1 %v11287_v50  ;;  %4961 = vmatprep.subr.bf16.mxu0 %v11292_v14  ;;  %v11350_v50 = vld [vmem:[#allocation16 + $0x4c0] ss:$16 sps:$4 sm:$0xff]   ;;  %v11353_v14 = vld [vmem:[#allocation16 + $0x4c8] ss:$16 sps:$4 sm:$0xff]  }
 0x41e   :  { %5067 = vmatprep.subr.bf16.mxu1 %v11295_v23  ;;  %v11358_v23 = vld [vmem:[#allocation16 + $0x4e4] ss:$16 sps:$4 sm:$0xff]  }
 0x420   :  { %4962 = vmatpush1.bf16.msra.mxu0 %v11290_v44  ;;  %v11361_v44 = vld [vmem:[#allocation16 + $0x4ec] ss:$16 sps:$4 sm:$0xff]  }
 0x421   :  { %5068 = vmatpush1.bf16.msra.mxu1 %v11293_v25  ;;  %4963 = vmatprep.subr.bf16.mxu0 %v11298_v29  ;;  %v11356_v25 = vld [vmem:[#allocation16 + $0x4e0] ss:$16 sps:$4 sm:$0xff]   ;;  %v11359_v29 = vld [vmem:[#allocation16 + $0x4e8] ss:$16 sps:$4 sm:$0xff]  }
 0x422   :  { %5069 = vmatprep.subr.bf16.mxu1 %v11301_v17  ;;  %v11364_v17 = vld [vmem:[#allocation16 + $0x504] ss:$16 sps:$4 sm:$0xff]  }
 0x424   :  { %4964 = vmatpush1.bf16.msra.mxu0 %v11296_v6  ;;  %v11367_v6 = vld [vmem:[#allocation16 + $0x50c] ss:$16 sps:$4 sm:$0xff]  }
 0x425   :  { %5070 = vmatpush1.bf16.msra.mxu1 %v11299_v43  ;;  %4965 = vmatprep.subr.bf16.mxu0 %v11304_v21  ;;  %v11362_v43 = vld [vmem:[#allocation16 + $0x500] ss:$16 sps:$4 sm:$0xff]   ;;  %v11365_v21 = vld [vmem:[#allocation16 + $0x508] ss:$16 sps:$4 sm:$0xff]  }
 0x426   :  { %5071 = vmatprep.subr.bf16.mxu1 %v11307_v41  ;;  %v11370_v41 = vld [vmem:[#allocation16 + $0x524] ss:$16 sps:$4 sm:$0xff]  }
 0x428   :  { %4966 = vmatpush1.bf16.msra.mxu0 %v11302_v28  ;;  %v11373_v28 = vld [vmem:[#allocation16 + $0x52c] ss:$16 sps:$4 sm:$0xff]  }
 0x429   :  { %5072 = vmatpush1.bf16.msra.mxu1 %v11305_v59  ;;  %4967 = vmatprep.subr.bf16.mxu0 %v11310_v22  ;;  %v11368_v59 = vld [vmem:[#allocation16 + $0x520] ss:$16 sps:$4 sm:$0xff]   ;;  %v11371_v22 = vld [vmem:[#allocation16 + $0x528] ss:$16 sps:$4 sm:$0xff]  }
 0x42a   :  { %5073 = vmatprep.subr.bf16.mxu1 %v11313_v27 }
 0x42c   :  { %4968 = vmatpush1.bf16.msra.mxu0 %v11308_v39 }
 0x42d   :  { %5074 = vmatpush1.bf16.msra.mxu1 %v11311_v26  ;;  %6178 = vmatprep.subr.bf16.mxu0 %v11316_v24 }
 0x42e   :  { %6284 = vmatprep.subr.bf16.mxu1 %v11319_v0 }
 0x42f   :  { %4970 = vmatmul.mubr.bf16.vlgmr.msra.gmra.mrb[56].mxu0 %v13204_v62 }
 0x430   :  { %5076 = vmatmul.mubr.bf16.vlgmr.msra.gmra.mrb[56].mxu1 %v13204_v62  ;;  %4979 = vmatprep.mubr.bf16.mxu0 %v13266_v4  ;;  %v11337_v62 = vld [vmem:[#allocation16 + $0x46c] ss:$16 sps:$4 sm:$0xff]  }
 0x431   :  { %5085 = vmatprep.mubr.bf16.mxu1 %v13266_v4  ;;  %6179 = vmatpush1.bf16.msra.mxu0 %v11314_v53  ;;  %v11332_v4 = vld [vmem:[#allocation16 + $0x460] ss:$16 sps:$4 sm:$0xff]  }
 0x432   :  { %6285 = vmatpush1.bf16.msra.mxu1 %v11317_v45  ;;  %6180 = vmatprep.subr.bf16.mxu0 %v11322_v42 }
 0x433   :  { %6286 = vmatprep.subr.bf16.mxu1 %v11325_v49 }
 0x435   :  { %6181 = vmatpush1.bf16.msra.mxu0 %v11320_v32 }
 0x436   :  { %6287 = vmatpush1.bf16.msra.mxu1 %v11323_v34  ;;  %6182 = vmatprep.subr.bf16.mxu0 %v11328_v52 }
 0x437   :  { %4980 = vmatmul.mubr.bf16.gmra.mrb[60].mxu0 %v13254_v2  ;;  %6288 = vmatprep.subr.bf16.mxu1 %v11331_v46 }
 0x438   :  { %5086 = vmatmul.mubr.bf16.gmra.mrb[60].mxu1 %v13254_v2  ;;  %v11347_v2 = vld [vmem:[#allocation16 + $0x4a8] ss:$16 sps:$4 sm:$0xff]  }
 0x439   :  { %6183 = vmatpush1.bf16.msra.mxu0 %v11326_v5  ;;  %v11374_v5 = vld [vmem:[#allocation16 + $0x540] ss:$16 sps:$4 sm:$0xff]  }
 0x43a   :  { %6289 = vmatpush1.bf16.msra.mxu1 %v11329_v47  ;;  %6184 = vmatprep.subr.bf16.mxu0 %v11334_v35  ;;  %v11376_v47 = vld [vmem:[#allocation16 + $0x544] ss:$16 sps:$4 sm:$0xff]   ;;  %v11377_v35 = vld [vmem:[#allocation16 + $0x548] ss:$16 sps:$4 sm:$0xff]  }
 0x43b   :  { %6290 = vmatprep.subr.bf16.mxu1 %v11337_v62 }
 0x43d   :  { %6185 = vmatpush1.bf16.msra.mxu0 %v11332_v4 }
 0x43e   :  { %6291 = vmatpush1.bf16.msra.mxu1 %v11335_v8  ;;  %6186 = vmatprep.subr.bf16.mxu0 %v11340_v33 }
 0x43f   :  { %6292 = vmatprep.subr.bf16.mxu1 %v11343_v30 }
 0x441   :  { %6187 = vmatpush1.bf16.msra.mxu0 %v11338_v38 }
 0x442   :  { %6293 = vmatpush1.bf16.msra.mxu1 %v11341_v56  ;;  %6188 = vmatprep.subr.bf16.mxu0 %v11346_v40 }
 0x443   :  { %6294 = vmatprep.subr.bf16.mxu1 %v11349_v36 }
 0x445   :  { %6189 = vmatpush1.bf16.msra.mxu0 %v11344_v15  ;;  %v11382_v15 = vld [vmem:[#allocation16 + $0x564] ss:$16 sps:$4 sm:$0xff]  }
 0x446   :  { %6295 = vmatpush1.bf16.msra.mxu1 %v11347_v2  ;;  %6190 = vmatprep.subr.bf16.mxu0 %v11352_v54  ;;  %v11385_v2 = vld [vmem:[#allocation16 + $0x56c] ss:$16 sps:$4 sm:$0xff]   ;;  %v11380_v54 = vld [vmem:[#allocation16 + $0x560] ss:$16 sps:$4 sm:$0xff]  }
 0x447   :  { %6296 = vmatprep.subr.bf16.mxu1 %v11355_v61  ;;  %v11391_v61 = vld [vmem:[#allocation16 + $0x58c] ss:$16 sps:$4 sm:$0xff]  }
 0x449   :  { %6191 = vmatpush1.bf16.msra.mxu0 %v11350_v50  ;;  %v11386_v50 = vld [vmem:[#allocation16 + $0x580] ss:$16 sps:$4 sm:$0xff]  }
 0x44a   :  { %6297 = vmatpush1.bf16.msra.mxu1 %v11353_v14  ;;  %6192 = vmatprep.subr.bf16.mxu0 %v11358_v23  ;;  %v11397_v14 = vld [vmem:[#allocation16 + $0x5ac] ss:$16 sps:$4 sm:$0xff]   ;;  %v11395_v23 = vld [vmem:[#allocation16 + $0x5a8] ss:$16 sps:$4 sm:$0xff]  }
 0x44b   :  { %6298 = vmatprep.subr.bf16.mxu1 %v11361_v44  ;;  %v11400_v44 = vld [vmem:[#allocation16 + $0x5c4] ss:$16 sps:$4 sm:$0xff]  }
 0x44d   :  { %6193 = vmatpush1.bf16.msra.mxu0 %v11356_v25  ;;  %v11403_v25 = vld [vmem:[#allocation16 + $0x5cc] ss:$16 sps:$4 sm:$0xff]  }
 0x44e   :  { %6299 = vmatpush1.bf16.msra.mxu1 %v11359_v29  ;;  %6194 = vmatprep.subr.bf16.mxu0 %v11364_v17  ;;  %v11398_v29 = vld [vmem:[#allocation16 + $0x5c0] ss:$16 sps:$4 sm:$0xff]   ;;  %v11401_v17 = vld [vmem:[#allocation16 + $0x5c8] ss:$16 sps:$4 sm:$0xff]  }
 0x44f   :  { %6300 = vmatprep.subr.bf16.mxu1 %v11367_v6  ;;  %v11406_v6 = vld [vmem:[#allocation16 + $0x5e4] ss:$16 sps:$4 sm:$0xff]  }
 0x451   :  { %6195 = vmatpush1.bf16.msra.mxu0 %v11362_v43  ;;  %v11409_v43 = vld [vmem:[#allocation16 + $0x5ec] ss:$16 sps:$4 sm:$0xff]  }
 0x452   :  { %6301 = vmatpush1.bf16.msra.mxu1 %v11365_v21  ;;  %6196 = vmatprep.subr.bf16.mxu0 %v11370_v41  ;;  %v11404_v21 = vld [vmem:[#allocation16 + $0x5e0] ss:$16 sps:$4 sm:$0xff]   ;;  %v11407_v41 = vld [vmem:[#allocation16 + $0x5e8] ss:$16 sps:$4 sm:$0xff]  }
 0x453   :  { %6302 = vmatprep.subr.bf16.mxu1 %v11373_v28  ;;  %v11412_v28 = vld [vmem:[#allocation16 + $0x604] ss:$16 sps:$4 sm:$0xff]  }
 0x455   :  { %6197 = vmatpush1.bf16.msra.mxu0 %v11368_v59  ;;  %v11415_v59 = vld [vmem:[#allocation16 + $0x60c] ss:$16 sps:$4 sm:$0xff]  }
 0x456   :  { %6303 = vmatpush1.bf16.msra.mxu1 %v11371_v22  ;;  %6198 = vmatprep.subr.bf16.mxu0 %v11376_v47  ;;  %v5144_v22 = vld [vmem:[#allocation11] sm:$0xf] }
 0x459   :  { %6199 = vmatpush1.bf16.msra.mxu0 %v11374_v5 }
 0x45a   :  { %6200 = vmatprep.subr.bf16.mxu0 %v11382_v15 }
 0x45d   :  { %6201 = vmatpush1.bf16.msra.mxu0 %v11380_v54 }
 0x480   :  { %v3991_v27 = vpop.f32.mrb[48].mxu0 }
 0x481   :  { %v13387_v39 = vadd.f32 %v3991_v27, %v13318_v60  ;;  %v4097_v26 = vpop.f32.mrb[48].mxu1  ;;  %v3993_v24 = vpop.f32.mrb[49].mxu0  ;;  %v5198_v27 = vld [vmem:[#allocation13] sm:$0xf] }
 0x482   :  { %v13390_v0 = vadd.f32 %v4097_v26, %v13322_v48  ;;  %v13393_v53 = vadd.f32 %v3993_v24, %v13326_v7  ;;  %v4099_v45 = vpop.f32.mrb[49].mxu1  ;;  %v3995_v42 = vpop.f32.mrb[50].mxu0  ;;  %v5236_v26 = vld [vmem:[#allocation14] sm:$0xf]  ;;  %v13446_v5 = vrot.slane %v5198_v27, %v13051_v11 }
 0x483   :  { %v13396_v49 = vadd.f32 %v4099_v45, %v13330_v9  ;;  %v13399_v32 = vadd.f32 %v3995_v42, %v13334_v55  ;;  %v4101_v34 = vpop.f32.mrb[50].mxu1  ;;  %v3997_v52 = vpop.f32.mrb[51].mxu0  ;;  %v11379_v9 = vld [vmem:[#allocation16 + $0x54c] ss:$16 sps:$4 sm:$0xff]   ;;  %v13449_v47 = vrot.slane %v5236_v26, %v13051_v11 }
 0x484   :  { %v13402_v60 = vadd.f32 %v4101_v34, %v13338_v31  ;;  %v13405_v46 = vadd.f32 %v3997_v52, %v13342_v19  ;;  %v4103_v48 = vpop.f32.mrb[51].mxu1  ;;  %6304 = vmatprep.subr.bf16.mxu1 %v11379_v9 }
 0x485   :  { %v13408_v7 = vadd.f32 %v4103_v48, %v13346_v37  ;;  %6305 = vmatpush1.bf16.msra.mxu1 %v11377_v35  ;;  %v13443_v48 = vrot.slane %v5144_v22, %v13051_v11  ;;  %v13452_v35 = vrot.slane %v5144_v22, %v13054_v51 }
 0x486   :  { %6306 = vmatprep.subr.bf16.mxu1 %v11385_v2 }
 0x488   :  { %v4001_v62 = vpop.f32.mrb[52].mxu0 }
 0x489   :  { %v13411_v55 = vadd.f32 %v4001_v62, %v13350_v63  ;;  %v4107_v31 = vpop.f32.mrb[52].mxu1  ;;  %v4003_v4 = vpop.f32.mrb[53].mxu0 }
 0x48a   :  { %v13414_v19 = vadd.f32 %v4107_v31, %v13354_v16  ;;  %v13417_v37 = vadd.f32 %v4003_v4, %v13366_v13  ;;  %v4109_v8 = vpop.f32.mrb[53].mxu1  ;;  %v4005_v33 = vpop.f32.mrb[54].mxu0  ;;  %v13456_v4 = vrot.slane %v5198_v27, %v13054_v51 }
 0x48b   :  { %v13420_v30 = vadd.f32 %v4109_v8, %v13370_v58  ;;  %v13423_v38 = vadd.f32 %v4005_v33, %v13358_v57  ;;  %v4111_v56 = vpop.f32.mrb[54].mxu1  ;;  %v4007_v63 = vpop.f32.mrb[55].mxu0  ;;  %v11383_v58 = vld [vmem:[#allocation16 + $0x568] ss:$16 sps:$4 sm:$0xff]   ;;  %v11388_v57 = vld [vmem:[#allocation16 + $0x584] ss:$16 sps:$4 sm:$0xff]   ;;  %v13459_v8 = vrot.slane %v5236_v26, %v13054_v51 }
 0x48c   :  { %v13426_v40 = vadd.f32 %v4111_v56, %v13362_v3  ;;  %v13429_v36 = vadd.f32 %v4007_v63, %v13374_v10  ;;  %v4113_v16 = vpop.f32.mrb[55].mxu1  ;;  %6307 = vmatpush1.bf16.msra.mxu1 %v11383_v58  ;;  %v11389_v3 = vld [vmem:[#allocation16 + $0x588] ss:$16 sps:$4 sm:$0xff]   ;;  %6202 = vmatprep.subr.bf16.mxu0 %v11388_v57  ;;  %v11394_v10 = vld [vmem:[#allocation16 + $0x5a4] ss:$16 sps:$4 sm:$0xff]   ;;  %v13469_v57 = vrot.slane %v5144_v22, %v13057_v12 }
 0x48d   :  { %v13432_v13 = vadd.f32 %v4113_v16, %v13378_v20  ;;  %6308 = vmatprep.subr.bf16.mxu1 %v11391_v61  ;;  %6203 = vmatpush1.bf16.msra.mxu0 %v11386_v50  ;;  %v11392_v20 = vld [vmem:[#allocation16 + $0x5a0] ss:$16 sps:$4 sm:$0xff]  }
 0x48e   :  { %6204 = vmatprep.subr.bf16.mxu0 %v11394_v10 }
 0x490   :  { %6309 = vmatpush1.bf16.msra.mxu1 %v11389_v3 }
 0x491   :  { %6310 = vmatprep.subr.bf16.mxu1 %v11397_v14  ;;  %6205 = vmatpush1.bf16.msra.mxu0 %v11392_v20  ;;  %v13481_v14 = vrot.slane %v5144_v22, %v13060_v1 }
 0x492   :  { %6206 = vmatprep.subr.bf16.mxu0 %v11400_v44  ;;  %v13486_v44 = vrot.slane %v5198_v27, %v13057_v12 }
 0x494   :  { %6311 = vmatpush1.bf16.msra.mxu1 %v11395_v23 }
 0x495   :  { %6312 = vmatprep.subr.bf16.mxu1 %v11403_v25  ;;  %6207 = vmatpush1.bf16.msra.mxu0 %v11398_v29 }
 0x496   :  { %6208 = vmatprep.subr.bf16.mxu0 %v11406_v6 }
 0x498   :  { %6313 = vmatpush1.bf16.msra.mxu1 %v11401_v17  ;;  %v13495_v17 = vrot.slane %v5198_v27, %v13060_v1 }
 0x499   :  { %6314 = vmatprep.subr.bf16.mxu1 %v11409_v43  ;;  %6209 = vmatpush1.bf16.msra.mxu0 %v11404_v21 }
 0x49a   :  { %6231 = vmatprep.subr.bf16.mxu0 %v11412_v28 }
 0x49c   :  { %6315 = vmatpush1.bf16.msra.mxu1 %v11407_v41 }
 0x49d   :  { %6337 = vmatprep.subr.bf16.mxu1 %v11415_v59  ;;  %v13503_v59 = vrot.slane %v5236_v26, %v13060_v1 }
 0x502   :  { %v13434_v24 = vpop.f32.mrb[56].mxu0 }
 0x503   :  { %v13436_v45 = vpop.f32.mrb[56].mxu1  ;;  %v13438_v42 = vpop.f32.mrb[57].mxu0  ;;  %v5096_v9 = vrot.slane %v13434_v24, 2 }
 0x504   :  { %v13440_v34 = vpop.f32.mrb[57].mxu1  ;;  %v4975_v52 = vpop.f32.mrb[58].mxu0  ;;  %v5098_v56 = vrot.slane %v13436_v45, 2  ;;  %v5097_v63 = vrot.slane %v13438_v42, 2 }
 0x505   :  { %v5100_v62 = vrot.slane %v4975_v52, 2  ;;  %v5081_v31 = vpop.f32.mrb[58].mxu1  ;;  %v4977_v33 = vpop.f32.mrb[59].mxu0  ;;  %v5099_v54 = vrot.slane %v13440_v34, 2 }
 0x506   :  { %v5102_v16 = vrot.slane %v5081_v31, 2  ;;  %v5101_v15 = vrot.slane %v4977_v33, 2  ;;  %v5083_v2 = vpop.f32.mrb[59].mxu1 }
 0x507   :  { %v5120_v58 = vsel %vm1243_vm1, %v5096_v9, %v5100_v62  ;;  %v5103_v61 = vrot.slane %v5083_v2, 2 }
 0x508   :  { %v5128_v50 = vadd.f32 %v13387_v39, %v5120_v58  ;;  %v5122_v3 = vsel %vm1243_vm1, %v5098_v56, %v5102_v16  ;;  %v5121_v10 = vsel %vm1243_vm1, %v5097_v63, %v5101_v15 }
 0x509   :  { %v5130_v20 = vadd.f32 %v13390_v0, %v5122_v3  ;;  %v5129_v23 = vadd.f32 %v13393_v53, %v5121_v10  ;;  %v5123_v39 = vsel %vm1243_vm1, %v5099_v54, %v5103_v61  ;;  %v13498_v0 = vrot.slane %v5236_v26, %v13057_v12 }
 0x50a   :  { %v5166_v25 = vadd.f32 %v13443_v48, %v5128_v50  ;;  %v5131_v29 = vadd.f32 %v13396_v49, %v5123_v39  ;;  %v4981_v6 = vpop.f32.mrb[60].mxu0 }
 0x50b   :  { %v5168_v53 = vadd.f32 %v13452_v35, %v5130_v20  ;;  %v5167_v43 = vadd.f32 %v13469_v57, %v5129_v23  ;;  %v5104_v21 = vrot.slane %v4981_v6, 2  ;;  %v5087_v41 = vpop.f32.mrb[60].mxu1  ;;  %v4983_v28 = vpop.f32.mrb[61].mxu0 }
 0x50c   :  { %v5182_v22 = vmax.f32 %v5166_v25, 0.0  ;;  %v5169_v49 = vadd.f32 %v13481_v14, %v5131_v29  ;;  %v5106_v52 = vrot.slane %v5087_v41, 2  ;;  %v5105_v27 = vrot.slane %v4983_v28, 2  ;;  %v13506_v31 = vpop.f32.mrb[61].mxu1  ;;  %v4985_v33 = vpop.f32.mrb[62].mxu0 }
 0x50d   :  { %v5184_v2 = vmax.f32 %v5168_v53, 0.0  ;;  %v5183_v58 = vmax.f32 %v5167_v43, 0.0  ;;  %v5116_v50 = vsel %vm1243_vm1, %v5100_v62, %v5104_v21  ;;  %v5107_v3 = vrot.slane %v13506_v31, 2  ;;  %v5091_v10 = vpop.f32.mrb[62].mxu1  ;;  %v4987_v20 = vpop.f32.mrb[63].mxu0 }
 0x50e   :  { %v5220_v26 = vmul.f32 %v13446_v5, %v5182_v22  ;;  %v5185_v23 = vmax.f32 %v5169_v49, 0.0  ;;  %v5132_v39 = vadd.f32 %v13399_v32, %v5116_v50  ;;  %v5118_v25 = vsel %vm1243_vm1, %v5102_v16, %v5106_v52  ;;  %v5093_v29 = vpop.f32.mrb[63].mxu1 }
 0x50f   :  { %v5222_v6 = vmul.f32 %v13456_v4, %v5184_v2  ;;  %v5221_v53 = vmul.f32 %v13486_v44, %v5183_v58  ;;  %v5134_v43 = vadd.f32 %v13402_v60, %v5118_v25  ;;  %v5117_v62 = vsel %vm1243_vm1, %v5101_v15, %v5105_v27 }
 0x510   :  { %v5258_v41 = vadd.f32 %v13449_v47, %v5220_v26  ;;  %v13522_v28 = vmul.f32 %v13495_v17, %v5185_v23  ;;  %v5170_v32 = vadd.f32 %v13443_v48, %v5132_v39  ;;  %v5133_v22 = vadd.f32 %v13405_v46, %v5117_v62 }
 0x511   :  { %v13527_v16 = vadd.f32 %v13459_v8, %v5222_v6  ;;  %v5172_v49 = vadd.f32 %v13452_v35, %v5134_v43  ;;  %v5119_v60 = vsel %vm1243_vm1, %v5103_v61, %v5107_v3  ;;  %v5108_v31 = vrot.slane %v4985_v33, 2 }
 0x512   :  { %v5186_v2 = vmax.f32 %v5170_v32, 0.0  ;;  %v5171_v15 = vadd.f32 %v13469_v57, %v5133_v22  ;;  %v5135_v58 = vadd.f32 %v13408_v7, %v5119_v60  ;;  %v5110_v50 = vrot.slane %v5091_v10, 2 }
 0x513   :  { %v5188_v26 = vmax.f32 %v5172_v49, 0.0  ;;  %v5112_v23 = vsel %vm1243_vm1, %v5104_v21, %v5108_v31  ;;  %v5124_v46 = vsel %vm1243_vm1, %v5108_v31, %v5096_v9  ;;  %v5109_v39 = vrot.slane %v4987_v20, 2 }
 0x514   :  { %v5224_v25 = vmul.f32 %v13446_v5, %v5186_v2  ;;  %v5187_v61 = vmax.f32 %v5171_v15, 0.0  ;;  %v5173_v33 = vadd.f32 %v13481_v14, %v5135_v58  ;;  %v5136_v6 = vadd.f32 %v13411_v55, %v5112_v23 }
 0x515   :  { %v5226_v7 = vmul.f32 %v13456_v4, %v5188_v26  ;;  %v5140_v10 = vadd.f32 %v13423_v38, %v5124_v46  ;;  %v5114_v21 = vsel %vm1243_vm1, %v5106_v52, %v5110_v50  ;;  %v5126_v24 = vsel %vm1243_vm1, %v5110_v50, %v5098_v56 }
 0x516   :  { %v5262_v9 = vadd.f32 %v13449_v47, %v5224_v25  ;;  %v5225_v20 = vmul.f32 %v13486_v44, %v5187_v61  ;;  %v5189_v43 = vmax.f32 %v5173_v33, 0.0  ;;  %v5174_v62 = vadd.f32 %v13443_v48, %v5136_v6  ;;  %v11413_v25 = vld [vmem:[#allocation16 + $0x608] ss:$16 sps:$4 sm:$0xff]   ;;  %v11418_v33 = vld [vmem:[#allocation16 + $0x624] ss:$16 sps:$4 sm:$0xff]  }
 0x517   :  { %v5264_v55 = vadd.f32 %v13459_v8, %v5226_v7  ;;  %v5178_v32 = vadd.f32 %v13443_v48, %v5140_v10  ;;  %v5138_v38 = vadd.f32 %v13414_v19, %v5114_v21  ;;  %v5142_v52 = vadd.f32 %v13426_v40, %v5126_v24  ;;  %v11421_v6 = vld [vmem:[#allocation16 + $0x62c] ss:$16 sps:$4 sm:$0xff]  }
 0x518   :  { %v5227_v45 = vmul.f32 %v13495_v17, %v5189_v43  ;;  %v5190_v22 = vmax.f32 %v5174_v62, 0.0  ;;  %v5113_v56 = vsel %vm1243_vm1, %v5105_v27, %v5109_v39  ;;  %v5125_v49 = vsel %vm1243_vm1, %v5109_v39, %v5097_v63  ;;  %v11416_v43 = vld [vmem:[#allocation16 + $0x620] ss:$16 sps:$4 sm:$0xff]   ;;  %v11419_v62 = vld [vmem:[#allocation16 + $0x628] ss:$16 sps:$4 sm:$0xff]  }
 0x519   :  { %v5194_v60 = vmax.f32 %v5178_v32, 0.0  ;;  %v5176_v31 = vadd.f32 %v13452_v35, %v5138_v38  ;;  %v5180_v48 = vadd.f32 %v13452_v35, %v5142_v52  ;;  %v5137_v19 = vadd.f32 %v13417_v37, %v5113_v56 }
 0x51a   :  { %v5228_v40 = vmul.f32 %v13446_v5, %v5190_v22  ;;  %v5141_v2 = vadd.f32 %v13429_v36, %v5125_v49  ;;  %v5111_v15 = vrot.slane %v5093_v29, 2  ;;  %v5259_v58 = vadd.f32 %v13498_v0, %v5221_v53  ;;  %v11427_v22 = vld [vmem:[#allocation16 + $0x64c] ss:$16 sps:$4 sm:$0xff]   ;;  %v11422_v49 = vld [vmem:[#allocation16 + $0x640] ss:$16 sps:$4 sm:$0xff]  }
 0x51b   :  { %v5232_v27 = vmul.f32 %v13446_v5, %v5194_v60  ;;  %v5192_v42 = vmax.f32 %v5176_v31, 0.0  ;;  %v5196_v50 = vmax.f32 %v5180_v48, 0.0  ;;  %v5175_v63 = vadd.f32 %v13469_v57, %v5137_v19  ;;  %v11433_v60 = vld [vmem:[#allocation16 + $0x66c] ss:$16 sps:$4 sm:$0xff]   ;;  %v11431_v48 = vld [vmem:[#allocation16 + $0x668] ss:$16 sps:$4 sm:$0xff]  }
 0x51c   :  { %v5179_v26 = vadd.f32 %v13469_v57, %v5141_v2  ;;  %v5115_v35 = vsel %vm1243_vm1, %v5107_v3, %v5111_v15  ;;  %v5127_v37 = vsel %vm1243_vm1, %v5111_v15, %v5099_v54  ;;  %v5263_v36 = vadd.f32 %v13498_v0, %v5225_v20  ;;  %v11410_v3 = vld [vmem:[#allocation16 + $0x600] ss:$16 sps:$4 sm:$0xff]   ;;  %v11436_v19 = vld [vmem:[#allocation16 + $0x684] ss:$16 sps:$4 sm:$0xff]   ;;  %v11437_v15 = vld [vmem:[#allocation16 + $0x688] ss:$16 sps:$4 sm:$0xff]  }
 0x51d   :  { %v5230_v29 = vmul.f32 %v13456_v4, %v5192_v42  ;;  %v5234_v5 = vmul.f32 %v13456_v4, %v5196_v50  ;;  %v5191_v53 = vmax.f32 %v5175_v63, 0.0  ;;  %v5139_v23 = vadd.f32 %v13420_v30, %v5115_v35  ;;  %v11434_v2 = vld [vmem:[#allocation16 + $0x680] ss:$16 sps:$4 sm:$0xff]   ;;  %v11443_v50 = vld [vmem:[#allocation16 + $0x6a8] ss:$16 sps:$4 sm:$0xff]  }
 0x51e   :  { %v5195_v46 = vmax.f32 %v5179_v26, 0.0  ;;  %v5143_v57 = vadd.f32 %v13432_v13, %v5127_v37  ;;  %v13585_v39 = vpack.c.bf16 %v5263_v36, %v5259_v58  ;;  %v13587_v34 = vpack.c.bf16 %v5262_v9, %v5258_v41  ;;  %v11442_v58 = vld [vmem:[#allocation16 + $0x6a4] ss:$16 sps:$4 sm:$0xff]   ;;  %v11440_v42 = vld [vmem:[#allocation16 + $0x6a0] ss:$16 sps:$4 sm:$0xff]  }
 0x51f   :  { %v5229_v54 = vmul.f32 %v13486_v44, %v5191_v53  ;;  %v5177_v61 = vadd.f32 %v13481_v14, %v5139_v23  ;;  %v5266_v4 = vadd.f32 %v13449_v47, %v5228_v40  ;;  %v5270_v7 = vadd.f32 %v13449_v47, %v5232_v27  ;;  %v11439_v40 = vld [vmem:[#allocation16 + $0x68c] ss:$16 sps:$4 sm:$0xff]   ;;  %v11448_v63 = vld [vmem:[#allocation16 + $0x6c4] ss:$16 sps:$4 sm:$0xff]   ;;  %v11446_v35 = vld [vmem:[#allocation16 + $0x6c0] ss:$16 sps:$4 sm:$0xff]  }
 0x520   :  { %v5233_v30 = vmul.f32 %v13486_v44, %v5195_v46  ;;  %v5181_v13 = vadd.f32 %v13481_v14, %v5143_v57  ;;  %6210 = vmatprep.mubr.bf16.mxu0 %v13585_v39  ;;  %6316 = vmatprep.mubr.bf16.mxu1 %v13585_v39  ;;  %v5261_v41 = vadd.f32 %v13503_v59, %v13522_v28  ;;  %v11445_v27 = vld [vmem:[#allocation16 + $0x6ac] ss:$16 sps:$4 sm:$0xff]   ;;  %v11449_v37 = vld [vmem:[#allocation16 + $0x6c8] ss:$16 sps:$4 sm:$0xff]   ;;  %v11454_v36 = vld [vmem:[#allocation16 + $0x6e4] ss:$16 sps:$4 sm:$0xff]  }
 0x521   :  { %v5193_v10 = vmax.f32 %v5177_v61, 0.0  ;;  %6211 = vmatmul.mubr.bf16.vlgmr.msra.gmra.mrb[64].mxu0 %v13587_v34  ;;  %6317 = vmatmul.mubr.bf16.vlgmr.msra.gmra.mrb[64].mxu1 %v13587_v34  ;;  %v5267_v21 = vadd.f32 %v13498_v0, %v5229_v54  ;;  %v13602_v24 = vpack.c.bf16 %v5270_v7, %v5266_v4  ;;  %v5265_v47 = vadd.f32 %v13503_v59, %v5227_v45  ;;  %v11451_v26 = vld [vmem:[#allocation16 + $0x6cc] ss:$16 sps:$4 sm:$0xff]   ;;  %v11455_v53 = vld [vmem:[#allocation16 + $0x6e8] ss:$16 sps:$4 sm:$0xff]  }
 0x522   :  { %v5197_v44 = vmax.f32 %v5181_v13, 0.0  ;;  %6232 = vmatpush1.bf16.msra.mxu0 %v11410_v3  ;;  %6338 = vmatpush1.bf16.msra.mxu1 %v11413_v25  ;;  %v5271_v14 = vadd.f32 %v13498_v0, %v5233_v30  ;;  %v13607_v9 = vpack.c.bf16 %v5264_v55, %v13527_v16  ;;  %v5268_v28 = vadd.f32 %v13459_v8, %v5230_v29  ;;  %v11424_v0 = vld [vmem:[#allocation16 + $0x644] ss:$16 sps:$4 sm:$0xff]   ;;  %v11457_v29 = vld [vmem:[#allocation16 + $0x6ec] ss:$16 sps:$4 sm:$0xff]  }
 0x523   :  { %v5231_v20 = vmul.f32 %v13495_v17, %v5193_v10  ;;  %6233 = vmatprep.subr.bf16.mxu0 %v11418_v33  ;;  %6339 = vmatprep.subr.bf16.mxu1 %v11421_v6  ;;  %v13611_v32 = vpack.c.bf16 %v5265_v47, %v5261_v41  ;;  %v5272_v38 = vadd.f32 %v13459_v8, %v5234_v5  ;;  %v11425_v8 = vld [vmem:[#allocation16 + $0x648] ss:$16 sps:$4 sm:$0xff]   ;;  %v11452_v5 = vld [vmem:[#allocation16 + $0x6e0] ss:$16 sps:$4 sm:$0xff]   ;;  %v11460_v23 = vld [vmem:[#allocation16 + $0x704] ss:$16 sps:$4 sm:$0xff]  }
 0x524   :  { %v5235_v52 = vmul.f32 %v13495_v17, %v5197_v44  ;;  %v13615_v45 = vpack.c.bf16 %v5271_v14, %v5267_v21  ;;  %v11430_v17 = vld [vmem:[#allocation16 + $0x664] ss:$16 sps:$4 sm:$0xff]   ;;  %v11463_v46 = vld [vmem:[#allocation16 + $0x70c] ss:$16 sps:$4 sm:$0xff]   ;;  %v11458_v57 = vld [vmem:[#allocation16 + $0x700] ss:$16 sps:$4 sm:$0xff]  }
 0x525   :  { %v5269_v16 = vadd.f32 %v13503_v59, %v5231_v20  ;;  %v13618_v55 = vpack.c.bf16 %v5272_v38, %v5268_v28  ;;  %v11461_v3 = vld [vmem:[#allocation16 + $0x708] ss:$16 sps:$4 sm:$0xff]   ;;  %v11466_v25 = vld [vmem:[#allocation16 + $0x724] ss:$16 sps:$4 sm:$0xff]   ;;  %v11469_v54 = vld [vmem:[#allocation16 + $0x72c] ss:$16 sps:$4 sm:$0xff]  }
 0x526   :  { %6220 = vmatprep.mubr.bf16.mxu0 %v13615_v45  ;;  %6326 = vmatprep.mubr.bf16.mxu1 %v13615_v45  ;;  %v5273_v56 = vadd.f32 %v13503_v59, %v5235_v52  ;;  %v11428_v59 = vld [vmem:[#allocation16 + $0x660] ss:$16 sps:$4 sm:$0xff]   ;;  %v11467_v33 = vld [vmem:[#allocation16 + $0x728] ss:$16 sps:$4 sm:$0xff]   ;;  %v11472_v6 = vld [vmem:[#allocation16 + $0x744] ss:$16 sps:$4 sm:$0xff]  }
 0x527   :  { %6234 = vmatpush1.bf16.msra.mxu0 %v11416_v43  ;;  %6340 = vmatpush1.bf16.msra.mxu1 %v11419_v62  ;;  %v11464_v61 = vld [vmem:[#allocation16 + $0x720] ss:$16 sps:$4 sm:$0xff]   ;;  %v11475_v4 = vld [vmem:[#allocation16 + $0x74c] ss:$16 sps:$4 sm:$0xff]   ;;  %v11473_v30 = vld [vmem:[#allocation16 + $0x748] ss:$16 sps:$4 sm:$0xff]  }
 0x528   :  { %6235 = vmatprep.subr.bf16.mxu0 %v11424_v0  ;;  %6341 = vmatprep.subr.bf16.mxu1 %v11427_v22  ;;  %v13623_v31 = vpack.c.bf16 %v5273_v56, %v5269_v16  ;;  %v11470_v7 = vld [vmem:[#allocation16 + $0x740] ss:$16 sps:$4 sm:$0xff]   ;;  %v11478_v13 = vld [vmem:[#allocation16 + $0x764] ss:$16 sps:$4 sm:$0xff]   ;;  %v11481_v41 = vld [vmem:[#allocation16 + $0x76c] ss:$16 sps:$4 sm:$0xff]  }
 0x529   :  { %6221 = vmatmul.mubr.bf16.gmra.mrb[68].mxu0 %v13602_v24  ;;  %6327 = vmatmul.mubr.bf16.gmra.mrb[68].mxu1 %v13602_v24  ;;  %v11476_v10 = vld [vmem:[#allocation16 + $0x760] ss:$16 sps:$4 sm:$0xff]   ;;  %v11479_v21 = vld [vmem:[#allocation16 + $0x768] ss:$16 sps:$4 sm:$0xff]   ;;  %v11484_v47 = vld [vmem:[#allocation16 + $0x784] ss:$16 sps:$4 sm:$0xff]  }
 0x52a   :  { %6263 = vmatprep.mubr.bf16.mxu0 %v13611_v32  ;;  %6369 = vmatprep.mubr.bf16.mxu1 %v13611_v32  ;;  %v11487_v44 = vld [vmem:[#allocation16 + $0x78c] ss:$16 sps:$4 sm:$0xff]   ;;  %v11482_v14 = vld [vmem:[#allocation16 + $0x780] ss:$16 sps:$4 sm:$0xff]   ;;  %v11485_v28 = vld [vmem:[#allocation16 + $0x788] ss:$16 sps:$4 sm:$0xff]  }
 0x52b   :  { %6236 = vmatpush1.bf16.msra.mxu0 %v11422_v49  ;;  %6342 = vmatpush1.bf16.msra.mxu1 %v11425_v8  ;;  %v11490_v20 = vld [vmem:[#allocation16 + $0x7a4] ss:$16 sps:$4 sm:$0xff]   ;;  %v11493_v43 = vld [vmem:[#allocation16 + $0x7ac] ss:$16 sps:$4 sm:$0xff]   ;;  %v11488_v62 = vld [vmem:[#allocation16 + $0x7a0] ss:$16 sps:$4 sm:$0xff]  }
 0x52c   :  { %6237 = vmatprep.subr.bf16.mxu0 %v11430_v17  ;;  %6343 = vmatprep.subr.bf16.mxu1 %v11433_v60  ;;  %v11491_v38 = vld [vmem:[#allocation16 + $0x7a8] ss:$16 sps:$4 sm:$0xff]   ;;  %v11496_v52 = vld [vmem:[#allocation16 + $0x7c4] ss:$16 sps:$4 sm:$0xff]   ;;  %v11499_v0 = vld [vmem:[#allocation16 + $0x7cc] ss:$16 sps:$4 sm:$0xff]  }
 0x52d   :  { %v11494_v22 = vld [vmem:[#allocation16 + $0x7c0] ss:$16 sps:$4 sm:$0xff]   ;;  %v11497_v16 = vld [vmem:[#allocation16 + $0x7c8] ss:$16 sps:$4 sm:$0xff]   ;;  %v11502_v56 = vld [vmem:[#allocation16 + $0x7e4] ss:$16 sps:$4 sm:$0xff]  }
 0x52e   :  { %v11505_v49 = vld [vmem:[#allocation16 + $0x7ec] ss:$16 sps:$4 sm:$0xff]   ;;  %v11500_v8 = vld [vmem:[#allocation16 + $0x7e0] ss:$16 sps:$4 sm:$0xff]   ;;  %v11503_v17 = vld [vmem:[#allocation16 + $0x7e8] ss:$16 sps:$4 sm:$0xff]  }
 0x52f   :  { %6238 = vmatpush1.bf16.msra.mxu0 %v11428_v59  ;;  %6344 = vmatpush1.bf16.msra.mxu1 %v11431_v48  ;;  %v11508_v60 = vld [vmem:[#allocation16 + $0x4] ss:$16 sps:$4 sm:$0xff]   ;;  %v11511_v59 = vld [vmem:[#allocation16 + $0xc] ss:$16 sps:$4 sm:$0xff]   ;;  %v11506_v48 = vld [vmem:[#allocation16] ss:$16 sps:$4 sm:$0xff]  }
 0x530   :  { %6239 = vmatprep.subr.bf16.mxu0 %v11436_v19  ;;  %6345 = vmatprep.subr.bf16.mxu1 %v11439_v40  ;;  %v11509_v19 = vld [vmem:[#allocation16 + $0x8] ss:$16 sps:$4 sm:$0xff]   ;;  %v11514_v40 = vld [vmem:[#allocation16 + $0x24] ss:$16 sps:$4 sm:$0xff]  }
 0x533   :  { %6240 = vmatpush1.bf16.msra.mxu0 %v11434_v2  ;;  %6346 = vmatpush1.bf16.msra.mxu1 %v11437_v15  ;;  %v11517_v2 = vld [vmem:[#allocation16 + $0x2c] ss:$16 sps:$4 sm:$0xff]   ;;  %v11512_v15 = vld [vmem:[#allocation16 + $0x20] ss:$16 sps:$4 sm:$0xff]  }
 0x534   :  { %6241 = vmatprep.subr.bf16.mxu0 %v11442_v58  ;;  %6347 = vmatprep.subr.bf16.mxu1 %v11445_v27  ;;  %v11515_v58 = vld [vmem:[#allocation16 + $0x28] ss:$16 sps:$4 sm:$0xff]   ;;  %v11520_v27 = vld [vmem:[#allocation16 + $0x44] ss:$16 sps:$4 sm:$0xff]  }
 0x537   :  { %6242 = vmatpush1.bf16.msra.mxu0 %v11440_v42  ;;  %6348 = vmatpush1.bf16.msra.mxu1 %v11443_v50  ;;  %v11523_v42 = vld [vmem:[#allocation16 + $0x4c] ss:$16 sps:$4 sm:$0xff]   ;;  %v11518_v50 = vld [vmem:[#allocation16 + $0x40] ss:$16 sps:$4 sm:$0xff]  }
 0x538   :  { %6243 = vmatprep.subr.bf16.mxu0 %v11448_v63  ;;  %6349 = vmatprep.subr.bf16.mxu1 %v11451_v26  ;;  %v11521_v63 = vld [vmem:[#allocation16 + $0x48] ss:$16 sps:$4 sm:$0xff]   ;;  %v11526_v26 = vld [vmem:[#allocation16 + $0x64] ss:$16 sps:$4 sm:$0xff]  }
 0x53b   :  { %6244 = vmatpush1.bf16.msra.mxu0 %v11446_v35  ;;  %6350 = vmatpush1.bf16.msra.mxu1 %v11449_v37  ;;  %v11529_v35 = vld [vmem:[#allocation16 + $0x6c] ss:$16 sps:$4 sm:$0xff]   ;;  %v11524_v37 = vld [vmem:[#allocation16 + $0x60] ss:$16 sps:$4 sm:$0xff]  }
 0x53c   :  { %6245 = vmatprep.subr.bf16.mxu0 %v11454_v36  ;;  %6351 = vmatprep.subr.bf16.mxu1 %v11457_v29  ;;  %v11527_v36 = vld [vmem:[#allocation16 + $0x68] ss:$16 sps:$4 sm:$0xff]   ;;  %v11532_v29 = vld [vmem:[#allocation16 + $0x84] ss:$16 sps:$4 sm:$0xff]  }
 0x53f   :  { %6246 = vmatpush1.bf16.msra.mxu0 %v11452_v5  ;;  %6352 = vmatpush1.bf16.msra.mxu1 %v11455_v53  ;;  %v11535_v5 = vld [vmem:[#allocation16 + $0x8c] ss:$16 sps:$4 sm:$0xff]   ;;  %v11530_v53 = vld [vmem:[#allocation16 + $0x80] ss:$16 sps:$4 sm:$0xff]  }
 0x540   :  { %6247 = vmatprep.subr.bf16.mxu0 %v11460_v23  ;;  %6353 = vmatprep.subr.bf16.mxu1 %v11463_v46  ;;  %v11533_v23 = vld [vmem:[#allocation16 + $0x88] ss:$16 sps:$4 sm:$0xff]   ;;  %v11538_v46 = vld [vmem:[#allocation16 + $0xa4] ss:$16 sps:$4 sm:$0xff]  }
 0x543   :  { %6248 = vmatpush1.bf16.msra.mxu0 %v11458_v57  ;;  %6354 = vmatpush1.bf16.msra.mxu1 %v11461_v3  ;;  %v11541_v57 = vld [vmem:[#allocation16 + $0xac] ss:$16 sps:$4 sm:$0xff]   ;;  %v11536_v3 = vld [vmem:[#allocation16 + $0xa0] ss:$16 sps:$4 sm:$0xff]  }
 0x544   :  { %6249 = vmatprep.subr.bf16.mxu0 %v11466_v25  ;;  %6355 = vmatprep.subr.bf16.mxu1 %v11469_v54  ;;  %v11544_v25 = vld [vmem:[#allocation16 + $0xc4] ss:$16 sps:$4 sm:$0xff]   ;;  %v11547_v54 = vld [vmem:[#allocation16 + $0xcc] ss:$16 sps:$4 sm:$0xff]  }
 0x547   :  { %6250 = vmatpush1.bf16.msra.mxu0 %v11464_v61  ;;  %6356 = vmatpush1.bf16.msra.mxu1 %v11467_v33  ;;  %v11542_v61 = vld [vmem:[#allocation16 + $0xc0] ss:$16 sps:$4 sm:$0xff]   ;;  %v11545_v33 = vld [vmem:[#allocation16 + $0xc8] ss:$16 sps:$4 sm:$0xff]  }
 0x548   :  { %6251 = vmatprep.subr.bf16.mxu0 %v11472_v6  ;;  %6357 = vmatprep.subr.bf16.mxu1 %v11475_v4  ;;  %v11550_v6 = vld [vmem:[#allocation16 + $0xe4] ss:$16 sps:$4 sm:$0xff]   ;;  %v11553_v4 = vld [vmem:[#allocation16 + $0xec] ss:$16 sps:$4 sm:$0xff]  }
 0x54b   :  { %6252 = vmatpush1.bf16.msra.mxu0 %v11470_v7  ;;  %6358 = vmatpush1.bf16.msra.mxu1 %v11473_v30  ;;  %v11548_v7 = vld [vmem:[#allocation16 + $0xe0] ss:$16 sps:$4 sm:$0xff]   ;;  %v11551_v30 = vld [vmem:[#allocation16 + $0xe8] ss:$16 sps:$4 sm:$0xff]  }
 0x54c   :  { %6253 = vmatprep.subr.bf16.mxu0 %v11478_v13  ;;  %6359 = vmatprep.subr.bf16.mxu1 %v11481_v41  ;;  %v11556_v13 = vld [vmem:[#allocation16 + $0x104] ss:$16 sps:$4 sm:$0xff]   ;;  %v11559_v41 = vld [vmem:[#allocation16 + $0x10c] ss:$16 sps:$4 sm:$0xff]  }
 0x54f   :  { %6254 = vmatpush1.bf16.msra.mxu0 %v11476_v10  ;;  %6360 = vmatpush1.bf16.msra.mxu1 %v11479_v21  ;;  %v11554_v10 = vld [vmem:[#allocation16 + $0x100] ss:$16 sps:$4 sm:$0xff]   ;;  %v11557_v21 = vld [vmem:[#allocation16 + $0x108] ss:$16 sps:$4 sm:$0xff]  }
 0x550   :  { %6255 = vmatprep.subr.bf16.mxu0 %v11484_v47  ;;  %6361 = vmatprep.subr.bf16.mxu1 %v11487_v44  ;;  %v11562_v47 = vld [vmem:[#allocation16 + $0x124] ss:$16 sps:$4 sm:$0xff]   ;;  %v11565_v44 = vld [vmem:[#allocation16 + $0x12c] ss:$16 sps:$4 sm:$0xff]  }
 0x553   :  { %6256 = vmatpush1.bf16.msra.mxu0 %v11482_v14  ;;  %6362 = vmatpush1.bf16.msra.mxu1 %v11485_v28  ;;  %v11560_v14 = vld [vmem:[#allocation16 + $0x120] ss:$16 sps:$4 sm:$0xff]   ;;  %v11563_v28 = vld [vmem:[#allocation16 + $0x128] ss:$16 sps:$4 sm:$0xff]  }
 0x554   :  { %6257 = vmatprep.subr.bf16.mxu0 %v11490_v20  ;;  %6363 = vmatprep.subr.bf16.mxu1 %v11493_v43  ;;  %v11568_v20 = vld [vmem:[#allocation16 + $0x144] ss:$16 sps:$4 sm:$0xff]   ;;  %v11571_v43 = vld [vmem:[#allocation16 + $0x14c] ss:$16 sps:$4 sm:$0xff]  }
 0x557   :  { %6258 = vmatpush1.bf16.msra.mxu0 %v11488_v62  ;;  %6364 = vmatpush1.bf16.msra.mxu1 %v11491_v38  ;;  %v11566_v62 = vld [vmem:[#allocation16 + $0x140] ss:$16 sps:$4 sm:$0xff]   ;;  %v11569_v38 = vld [vmem:[#allocation16 + $0x148] ss:$16 sps:$4 sm:$0xff]  }
 0x558   :  { %6259 = vmatprep.subr.bf16.mxu0 %v11496_v52  ;;  %6365 = vmatprep.subr.bf16.mxu1 %v11499_v0  ;;  %v11574_v52 = vld [vmem:[#allocation16 + $0x164] ss:$16 sps:$4 sm:$0xff]   ;;  %v11577_v0 = vld [vmem:[#allocation16 + $0x16c] ss:$16 sps:$4 sm:$0xff]  }
 0x55b   :  { %6260 = vmatpush1.bf16.msra.mxu0 %v11494_v22  ;;  %6366 = vmatpush1.bf16.msra.mxu1 %v11497_v16  ;;  %v11572_v22 = vld [vmem:[#allocation16 + $0x160] ss:$16 sps:$4 sm:$0xff]   ;;  %v11575_v16 = vld [vmem:[#allocation16 + $0x168] ss:$16 sps:$4 sm:$0xff]  }
 0x55c   :  { %6261 = vmatprep.subr.bf16.mxu0 %v11502_v56  ;;  %6367 = vmatprep.subr.bf16.mxu1 %v11505_v49  ;;  %v11580_v56 = vld [vmem:[#allocation16 + $0x184] ss:$16 sps:$4 sm:$0xff]   ;;  %v11583_v49 = vld [vmem:[#allocation16 + $0x18c] ss:$16 sps:$4 sm:$0xff]  }
 0x55f   :  { %6262 = vmatpush1.bf16.msra.mxu0 %v11500_v8  ;;  %6368 = vmatpush1.bf16.msra.mxu1 %v11503_v17  ;;  %v11578_v8 = vld [vmem:[#allocation16 + $0x180] ss:$16 sps:$4 sm:$0xff]   ;;  %v11581_v17 = vld [vmem:[#allocation16 + $0x188] ss:$16 sps:$4 sm:$0xff]  }
 0x560   :  { %7062 = vmatprep.subr.bf16.mxu0 %v11508_v60  ;;  %7168 = vmatprep.subr.bf16.mxu1 %v11511_v59  ;;  %v11586_v60 = vld [vmem:[#allocation16 + $0x1a4] ss:$16 sps:$4 sm:$0xff]   ;;  %v11589_v59 = vld [vmem:[#allocation16 + $0x1ac] ss:$16 sps:$4 sm:$0xff]  }
 0x562   :  { %6264 = vmatmul.mubr.bf16.vlgmr.msra.gmra.mrb[64].mxu0 %v13607_v9  ;;  %6370 = vmatmul.mubr.bf16.vlgmr.msra.gmra.mrb[64].mxu1 %v13607_v9 }
 0x563   :  { %6273 = vmatprep.mubr.bf16.mxu0 %v13623_v31  ;;  %6379 = vmatprep.mubr.bf16.mxu1 %v13623_v31 }
 0x564   :  { %7063 = vmatpush1.bf16.msra.mxu0 %v11506_v48  ;;  %7169 = vmatpush1.bf16.msra.mxu1 %v11509_v19  ;;  %v11584_v48 = vld [vmem:[#allocation16 + $0x1a0] ss:$16 sps:$4 sm:$0xff]   ;;  %v11587_v19 = vld [vmem:[#allocation16 + $0x1a8] ss:$16 sps:$4 sm:$0xff]  }
 0x565   :  { %7064 = vmatprep.subr.bf16.mxu0 %v11514_v40  ;;  %7170 = vmatprep.subr.bf16.mxu1 %v11517_v2  ;;  %v11592_v40 = vld [vmem:[#allocation16 + $0x1c4] ss:$16 sps:$4 sm:$0xff]   ;;  %v11595_v2 = vld [vmem:[#allocation16 + $0x1cc] ss:$16 sps:$4 sm:$0xff]  }
 0x568   :  { %7065 = vmatpush1.bf16.msra.mxu0 %v11512_v15  ;;  %7171 = vmatpush1.bf16.msra.mxu1 %v11515_v58  ;;  %v11590_v15 = vld [vmem:[#allocation16 + $0x1c0] ss:$16 sps:$4 sm:$0xff]   ;;  %v11593_v58 = vld [vmem:[#allocation16 + $0x1c8] ss:$16 sps:$4 sm:$0xff]  }
 0x569   :  { %7066 = vmatprep.subr.bf16.mxu0 %v11520_v27  ;;  %7172 = vmatprep.subr.bf16.mxu1 %v11523_v42  ;;  %v11598_v27 = vld [vmem:[#allocation16 + $0x1e4] ss:$16 sps:$4 sm:$0xff]   ;;  %v11601_v42 = vld [vmem:[#allocation16 + $0x1ec] ss:$16 sps:$4 sm:$0xff]  }
 0x56a   :  { %6274 = vmatmul.mubr.bf16.gmra.mrb[68].mxu0 %v13618_v55  ;;  %6380 = vmatmul.mubr.bf16.gmra.mrb[68].mxu1 %v13618_v55 }
 0x56b   :  { %7094 = vmatprep.mubr.bf16.mxu0 %v13585_v39  ;;  %7200 = vmatprep.mubr.bf16.mxu1 %v13585_v39  ;;  %v11539_v39 = vld [vmem:[#allocation16 + $0xa8] ss:$16 sps:$4 sm:$0xff]  }
 0x56c   :  { %7067 = vmatpush1.bf16.msra.mxu0 %v11518_v50  ;;  %7173 = vmatpush1.bf16.msra.mxu1 %v11521_v63  ;;  %v11596_v50 = vld [vmem:[#allocation16 + $0x1e0] ss:$16 sps:$4 sm:$0xff]   ;;  %v11599_v63 = vld [vmem:[#allocation16 + $0x1e8] ss:$16 sps:$4 sm:$0xff]  }
 0x56d   :  { %7068 = vmatprep.subr.bf16.mxu0 %v11526_v26  ;;  %7174 = vmatprep.subr.bf16.mxu1 %v11529_v35  ;;  %v11604_v26 = vld [vmem:[#allocation16 + $0x204] ss:$16 sps:$4 sm:$0xff]   ;;  %v11607_v35 = vld [vmem:[#allocation16 + $0x20c] ss:$16 sps:$4 sm:$0xff]  }
 0x570   :  { %7069 = vmatpush1.bf16.msra.mxu0 %v11524_v37  ;;  %7175 = vmatpush1.bf16.msra.mxu1 %v11527_v36  ;;  %v11602_v37 = vld [vmem:[#allocation16 + $0x200] ss:$16 sps:$4 sm:$0xff]   ;;  %v11605_v36 = vld [vmem:[#allocation16 + $0x208] ss:$16 sps:$4 sm:$0xff]  }
 0x571   :  { %7070 = vmatprep.subr.bf16.mxu0 %v11532_v29  ;;  %7176 = vmatprep.subr.bf16.mxu1 %v11535_v5  ;;  %v11610_v29 = vld [vmem:[#allocation16 + $0x224] ss:$16 sps:$4 sm:$0xff]   ;;  %v11613_v5 = vld [vmem:[#allocation16 + $0x22c] ss:$16 sps:$4 sm:$0xff]  }
 0x574   :  { %7071 = vmatpush1.bf16.msra.mxu0 %v11530_v53  ;;  %7177 = vmatpush1.bf16.msra.mxu1 %v11533_v23  ;;  %v11608_v53 = vld [vmem:[#allocation16 + $0x220] ss:$16 sps:$4 sm:$0xff]   ;;  %v11611_v23 = vld [vmem:[#allocation16 + $0x228] ss:$16 sps:$4 sm:$0xff]  }
 0x575   :  { %7072 = vmatprep.subr.bf16.mxu0 %v11538_v46  ;;  %7178 = vmatprep.subr.bf16.mxu1 %v11541_v57  ;;  %v11616_v46 = vld [vmem:[#allocation16 + $0x244] ss:$16 sps:$4 sm:$0xff]   ;;  %v11619_v57 = vld [vmem:[#allocation16 + $0x24c] ss:$16 sps:$4 sm:$0xff]  }
 0x578   :  { %7073 = vmatpush1.bf16.msra.mxu0 %v11536_v3  ;;  %7179 = vmatpush1.bf16.msra.mxu1 %v11539_v39  ;;  %v11614_v3 = vld [vmem:[#allocation16 + $0x240] ss:$16 sps:$4 sm:$0xff]   ;;  %v11617_v39 = vld [vmem:[#allocation16 + $0x248] ss:$16 sps:$4 sm:$0xff]  }
 0x579   :  { %7074 = vmatprep.subr.bf16.mxu0 %v11544_v25  ;;  %7180 = vmatprep.subr.bf16.mxu1 %v11547_v54  ;;  %v11622_v25 = vld [vmem:[#allocation16 + $0x264] ss:$16 sps:$4 sm:$0xff]   ;;  %v11623_v54 = vld [vmem:[#allocation16 + $0x268] ss:$16 sps:$4 sm:$0xff]  }
 0x57c   :  { %7075 = vmatpush1.bf16.msra.mxu0 %v11542_v61  ;;  %7181 = vmatpush1.bf16.msra.mxu1 %v11545_v33  ;;  %v11628_v61 = vld [vmem:[#allocation16 + $0x284] ss:$16 sps:$4 sm:$0xff]   ;;  %v11631_v33 = vld [vmem:[#allocation16 + $0x28c] ss:$16 sps:$4 sm:$0xff]  }
 0x57d   :  { %7076 = vmatprep.subr.bf16.mxu0 %v11550_v6  ;;  %7182 = vmatprep.subr.bf16.mxu1 %v11553_v4  ;;  %v11626_v6 = vld [vmem:[#allocation16 + $0x280] ss:$16 sps:$4 sm:$0xff]   ;;  %v11629_v4 = vld [vmem:[#allocation16 + $0x288] ss:$16 sps:$4 sm:$0xff]  }
 0x580   :  { %7077 = vmatpush1.bf16.msra.mxu0 %v11548_v7  ;;  %7183 = vmatpush1.bf16.msra.mxu1 %v11551_v30  ;;  %v11634_v7 = vld [vmem:[#allocation16 + $0x2a4] ss:$16 sps:$4 sm:$0xff]   ;;  %v11632_v30 = vld [vmem:[#allocation16 + $0x2a0] ss:$16 sps:$4 sm:$0xff]  }
 0x581   :  { %7078 = vmatprep.subr.bf16.mxu0 %v11556_v13  ;;  %7184 = vmatprep.subr.bf16.mxu1 %v11559_v41  ;;  %v11635_v13 = vld [vmem:[#allocation16 + $0x2a8] ss:$16 sps:$4 sm:$0xff]   ;;  %v11640_v41 = vld [vmem:[#allocation16 + $0x2c4] ss:$16 sps:$4 sm:$0xff]  }
 0x584   :  { %7079 = vmatpush1.bf16.msra.mxu0 %v11554_v10  ;;  %7185 = vmatpush1.bf16.msra.mxu1 %v11557_v21  ;;  %v11638_v10 = vld [vmem:[#allocation16 + $0x2c0] ss:$16 sps:$4 sm:$0xff]   ;;  %v11641_v21 = vld [vmem:[#allocation16 + $0x2c8] ss:$16 sps:$4 sm:$0xff]  }
 0x585   :  { %7080 = vmatprep.subr.bf16.mxu0 %v11562_v47  ;;  %7186 = vmatprep.subr.bf16.mxu1 %v11565_v44  ;;  %v11646_v47 = vld [vmem:[#allocation16 + $0x2e4] ss:$16 sps:$4 sm:$0xff]   ;;  %v11649_v44 = vld [vmem:[#allocation16 + $0x2ec] ss:$16 sps:$4 sm:$0xff]  }
 0x588   :  { %7081 = vmatpush1.bf16.msra.mxu0 %v11560_v14  ;;  %7187 = vmatpush1.bf16.msra.mxu1 %v11563_v28  ;;  %v11644_v14 = vld [vmem:[#allocation16 + $0x2e0] ss:$16 sps:$4 sm:$0xff]   ;;  %v11647_v28 = vld [vmem:[#allocation16 + $0x2e8] ss:$16 sps:$4 sm:$0xff]  }
 0x589   :  { %7082 = vmatprep.subr.bf16.mxu0 %v11568_v20  ;;  %7188 = vmatprep.subr.bf16.mxu1 %v11571_v43  ;;  %v11652_v20 = vld [vmem:[#allocation16 + $0x304] ss:$16 sps:$4 sm:$0xff]   ;;  %v11655_v43 = vld [vmem:[#allocation16 + $0x30c] ss:$16 sps:$4 sm:$0xff]  }
 0x58c   :  { %7083 = vmatpush1.bf16.msra.mxu0 %v11566_v62  ;;  %7189 = vmatpush1.bf16.msra.mxu1 %v11569_v38  ;;  %v11650_v62 = vld [vmem:[#allocation16 + $0x300] ss:$16 sps:$4 sm:$0xff]   ;;  %v11653_v38 = vld [vmem:[#allocation16 + $0x308] ss:$16 sps:$4 sm:$0xff]  }
 0x58d   :  { %7084 = vmatprep.subr.bf16.mxu0 %v11574_v52  ;;  %7190 = vmatprep.subr.bf16.mxu1 %v11577_v0  ;;  %v11658_v52 = vld [vmem:[#allocation16 + $0x324] ss:$16 sps:$4 sm:$0xff]   ;;  %v11661_v0 = vld [vmem:[#allocation16 + $0x32c] ss:$16 sps:$4 sm:$0xff]  }
 0x590   :  { %7085 = vmatpush1.bf16.msra.mxu0 %v11572_v22  ;;  %7191 = vmatpush1.bf16.msra.mxu1 %v11575_v16  ;;  %v11656_v22 = vld [vmem:[#allocation16 + $0x320] ss:$16 sps:$4 sm:$0xff]   ;;  %v11659_v16 = vld [vmem:[#allocation16 + $0x328] ss:$16 sps:$4 sm:$0xff]  }
 0x591   :  { %7086 = vmatprep.subr.bf16.mxu0 %v11580_v56  ;;  %7192 = vmatprep.subr.bf16.mxu1 %v11583_v49  ;;  %v11664_v56 = vld [vmem:[#allocation16 + $0x344] ss:$16 sps:$4 sm:$0xff]   ;;  %v11667_v49 = vld [vmem:[#allocation16 + $0x34c] ss:$16 sps:$4 sm:$0xff]  }
 0x594   :  { %7087 = vmatpush1.bf16.msra.mxu0 %v11578_v8  ;;  %7193 = vmatpush1.bf16.msra.mxu1 %v11581_v17  ;;  %v11662_v8 = vld [vmem:[#allocation16 + $0x340] ss:$16 sps:$4 sm:$0xff]   ;;  %v11665_v17 = vld [vmem:[#allocation16 + $0x348] ss:$16 sps:$4 sm:$0xff]  }
 0x595   :  { %7088 = vmatprep.subr.bf16.mxu0 %v11586_v60  ;;  %7194 = vmatprep.subr.bf16.mxu1 %v11589_v59  ;;  %v11670_v60 = vld [vmem:[#allocation16 + $0x364] ss:$16 sps:$4 sm:$0xff]   ;;  %v11673_v59 = vld [vmem:[#allocation16 + $0x36c] ss:$16 sps:$4 sm:$0xff]  }
 0x598   :  { %7089 = vmatpush1.bf16.msra.mxu0 %v11584_v48  ;;  %7195 = vmatpush1.bf16.msra.mxu1 %v11587_v19  ;;  %v11668_v48 = vld [vmem:[#allocation16 + $0x360] ss:$16 sps:$4 sm:$0xff]   ;;  %v11671_v19 = vld [vmem:[#allocation16 + $0x368] ss:$16 sps:$4 sm:$0xff]  }
 0x599   :  { %7090 = vmatprep.subr.bf16.mxu0 %v11592_v40  ;;  %7196 = vmatprep.subr.bf16.mxu1 %v11595_v2  ;;  %v11676_v40 = vld [vmem:[#allocation16 + $0x384] ss:$16 sps:$4 sm:$0xff]   ;;  %v11679_v2 = vld [vmem:[#allocation16 + $0x38c] ss:$16 sps:$4 sm:$0xff]  }
 0x59c   :  { %7091 = vmatpush1.bf16.msra.mxu0 %v11590_v15  ;;  %7197 = vmatpush1.bf16.msra.mxu1 %v11593_v58  ;;  %v11674_v15 = vld [vmem:[#allocation16 + $0x380] ss:$16 sps:$4 sm:$0xff]   ;;  %v11677_v58 = vld [vmem:[#allocation16 + $0x388] ss:$16 sps:$4 sm:$0xff]  }
 0x59d   :  { %7092 = vmatprep.subr.bf16.mxu0 %v11598_v27  ;;  %7198 = vmatprep.subr.bf16.mxu1 %v11601_v42  ;;  %v11682_v27 = vld [vmem:[#allocation16 + $0x3a4] ss:$16 sps:$4 sm:$0xff]   ;;  %v11685_v42 = vld [vmem:[#allocation16 + $0x3ac] ss:$16 sps:$4 sm:$0xff]  }
 0x5a0   :  { %7093 = vmatpush1.bf16.msra.mxu0 %v11596_v50  ;;  %7199 = vmatpush1.bf16.msra.mxu1 %v11599_v63  ;;  %v11680_v50 = vld [vmem:[#allocation16 + $0x3a0] ss:$16 sps:$4 sm:$0xff]   ;;  %v11683_v63 = vld [vmem:[#allocation16 + $0x3a8] ss:$16 sps:$4 sm:$0xff]  }
 0x5a1   :  { %7115 = vmatprep.subr.bf16.mxu0 %v11604_v26  ;;  %7221 = vmatprep.subr.bf16.mxu1 %v11607_v35  ;;  %v11688_v26 = vld [vmem:[#allocation16 + $0x3c4] ss:$16 sps:$4 sm:$0xff]   ;;  %v11691_v35 = vld [vmem:[#allocation16 + $0x3cc] ss:$16 sps:$4 sm:$0xff]  }
 0x5a3   :  { %7095 = vmatmul.mubr.bf16.vlgmr.msra.gmra.mrb[72].mxu0 %v13587_v34  ;;  %7201 = vmatmul.mubr.bf16.vlgmr.msra.gmra.mrb[72].mxu1 %v13587_v34  ;;  %v11625_v34 = vld [vmem:[#allocation16 + $0x26c] ss:$16 sps:$4 sm:$0xff]  }
 0x5a4   :  { %7104 = vmatprep.mubr.bf16.mxu0 %v13615_v45  ;;  %7116 = vmatpush1.bf16.msra.mxu0 %v11602_v37  ;;  %v11686_v37 = vld [vmem:[#allocation16 + $0x3c0] ss:$16 sps:$4 sm:$0xff]  }
 0x5a5   :  { %7210 = vmatprep.mubr.bf16.mxu1 %v13615_v45  ;;  %7222 = vmatpush1.bf16.msra.mxu1 %v11605_v36  ;;  %v11620_v45 = vld [vmem:[#allocation16 + $0x260] ss:$16 sps:$4 sm:$0xff]   ;;  %v11689_v36 = vld [vmem:[#allocation16 + $0x3c8] ss:$16 sps:$4 sm:$0xff]  }
 0x5a6   :  { %7117 = vmatprep.subr.bf16.mxu0 %v11610_v29  ;;  %7223 = vmatprep.subr.bf16.mxu1 %v11613_v5  ;;  %v11694_v29 = vld [vmem:[#allocation16 + $0x3e4] ss:$16 sps:$4 sm:$0xff]   ;;  %v11697_v5 = vld [vmem:[#allocation16 + $0x3ec] ss:$16 sps:$4 sm:$0xff]  }
 0x5a8   :  { %7118 = vmatpush1.bf16.msra.mxu0 %v11608_v53  ;;  %v11692_v53 = vld [vmem:[#allocation16 + $0x3e0] ss:$16 sps:$4 sm:$0xff]  }
 0x5a9   :  { %7224 = vmatpush1.bf16.msra.mxu1 %v11611_v23  ;;  %7119 = vmatprep.subr.bf16.mxu0 %v11616_v46  ;;  %v11695_v23 = vld [vmem:[#allocation16 + $0x3e8] ss:$16 sps:$4 sm:$0xff]   ;;  %v11700_v46 = vld [vmem:[#allocation22 + $0x4] ss:$16 sps:$4 sm:$0xff]  }
 0x5aa   :  { %7225 = vmatprep.subr.bf16.mxu1 %v11619_v57  ;;  %v11703_v57 = vld [vmem:[#allocation22 + $0xc] ss:$16 sps:$4 sm:$0xff]  }
 0x5ab   :  { %7105 = vmatmul.mubr.bf16.gmra.mrb[76].mxu0 %v13602_v24  ;;  %7211 = vmatmul.mubr.bf16.gmra.mrb[76].mxu1 %v13602_v24  ;;  %v11637_v24 = vld [vmem:[#allocation16 + $0x2ac] ss:$16 sps:$4 sm:$0xff]  }
 0x5ac   :  { %7120 = vmatpush1.bf16.msra.mxu0 %v11614_v3  ;;  %7147 = vmatprep.mubr.bf16.mxu0 %v13611_v32  ;;  %v11698_v3 = vld [vmem:[#allocation22] ss:$16 sps:$4 sm:$0xff]  }
 0x5ad   :  { %7226 = vmatpush1.bf16.msra.mxu1 %v11617_v39  ;;  %7253 = vmatprep.mubr.bf16.mxu1 %v13611_v32  ;;  %v11643_v32 = vld [vmem:[#allocation16 + $0x2cc] ss:$16 sps:$4 sm:$0xff]   ;;  %v11701_v39 = vld [vmem:[#allocation22 + $0x8] ss:$16 sps:$4 sm:$0xff]  }
 0x5ae   :  { %7121 = vmatprep.subr.bf16.mxu0 %v11622_v25  ;;  %7227 = vmatprep.subr.bf16.mxu1 %v11625_v34  ;;  %v11706_v25 = vld [vmem:[#allocation22 + $0x24] ss:$16 sps:$4 sm:$0xff]   ;;  %v11709_v34 = vld [vmem:[#allocation22 + $0x2c] ss:$16 sps:$4 sm:$0xff]  }
 0x5b0   :  { %7122 = vmatpush1.bf16.msra.mxu0 %v11620_v45  ;;  %v11704_v45 = vld [vmem:[#allocation22 + $0x20] ss:$16 sps:$4 sm:$0xff]  }
 0x5b1   :  { %7228 = vmatpush1.bf16.msra.mxu1 %v11623_v54  ;;  %7123 = vmatprep.subr.bf16.mxu0 %v11628_v61  ;;  %v11707_v54 = vld [vmem:[#allocation22 + $0x28] ss:$16 sps:$4 sm:$0xff]   ;;  %v11712_v61 = vld [vmem:[#allocation22 + $0x44] ss:$16 sps:$4 sm:$0xff]  }
 0x5b2   :  { %7229 = vmatprep.subr.bf16.mxu1 %v11631_v33  ;;  %v11715_v33 = vld [vmem:[#allocation22 + $0x4c] ss:$16 sps:$4 sm:$0xff]  }
 0x5b4   :  { %7124 = vmatpush1.bf16.msra.mxu0 %v11626_v6  ;;  %v11710_v6 = vld [vmem:[#allocation22 + $0x40] ss:$16 sps:$4 sm:$0xff]  }
 0x5b5   :  { %7230 = vmatpush1.bf16.msra.mxu1 %v11629_v4  ;;  %7125 = vmatprep.subr.bf16.mxu0 %v11634_v7  ;;  %v11713_v4 = vld [vmem:[#allocation22 + $0x48] ss:$16 sps:$4 sm:$0xff]   ;;  %v11718_v7 = vld [vmem:[#allocation22 + $0x64] ss:$16 sps:$4 sm:$0xff]  }
 0x5b6   :  { %7231 = vmatprep.subr.bf16.mxu1 %v11637_v24  ;;  %v11719_v24 = vld [vmem:[#allocation22 + $0x68] ss:$16 sps:$4 sm:$0xff]  }
 0x5b8   :  { %7126 = vmatpush1.bf16.msra.mxu0 %v11632_v30  ;;  %v11724_v30 = vld [vmem:[#allocation22 + $0x84] ss:$16 sps:$4 sm:$0xff]  }
 0x5b9   :  { %7232 = vmatpush1.bf16.msra.mxu1 %v11635_v13  ;;  %7127 = vmatprep.subr.bf16.mxu0 %v11640_v41  ;;  %v11727_v13 = vld [vmem:[#allocation22 + $0x8c] ss:$16 sps:$4 sm:$0xff]   ;;  %v11722_v41 = vld [vmem:[#allocation22 + $0x80] ss:$16 sps:$4 sm:$0xff]  }
 0x5ba   :  { %7233 = vmatprep.subr.bf16.mxu1 %v11643_v32  ;;  %v11725_v32 = vld [vmem:[#allocation22 + $0x88] ss:$16 sps:$4 sm:$0xff]  }
 0x5bc   :  { %7128 = vmatpush1.bf16.msra.mxu0 %v11638_v10  ;;  %v11730_v10 = vld [vmem:[#allocation22 + $0xa4] ss:$16 sps:$4 sm:$0xff]  }
 0x5bd   :  { %7234 = vmatpush1.bf16.msra.mxu1 %v11641_v21  ;;  %7129 = vmatprep.subr.bf16.mxu0 %v11646_v47  ;;  %v11733_v21 = vld [vmem:[#allocation22 + $0xac] ss:$16 sps:$4 sm:$0xff]   ;;  %v11728_v47 = vld [vmem:[#allocation22 + $0xa0] ss:$16 sps:$4 sm:$0xff]  }
 0x5be   :  { %7235 = vmatprep.subr.bf16.mxu1 %v11649_v44  ;;  %v11736_v44 = vld [vmem:[#allocation22 + $0xc4] ss:$16 sps:$4 sm:$0xff]  }
 0x5c0   :  { %7130 = vmatpush1.bf16.msra.mxu0 %v11644_v14  ;;  %v11739_v14 = vld [vmem:[#allocation22 + $0xcc] ss:$16 sps:$4 sm:$0xff]  }
 0x5c1   :  { %7236 = vmatpush1.bf16.msra.mxu1 %v11647_v28  ;;  %7131 = vmatprep.subr.bf16.mxu0 %v11652_v20  ;;  %v11734_v28 = vld [vmem:[#allocation22 + $0xc0] ss:$16 sps:$4 sm:$0xff]   ;;  %v11737_v20 = vld [vmem:[#allocation22 + $0xc8] ss:$16 sps:$4 sm:$0xff]  }
 0x5c2   :  { %7237 = vmatprep.subr.bf16.mxu1 %v11655_v43  ;;  %v11742_v43 = vld [vmem:[#allocation22 + $0xe4] ss:$16 sps:$4 sm:$0xff]  }
 0x5c4   :  { %7132 = vmatpush1.bf16.msra.mxu0 %v11650_v62  ;;  %v11745_v62 = vld [vmem:[#allocation22 + $0xec] ss:$16 sps:$4 sm:$0xff]  }
 0x5c5   :  { %7238 = vmatpush1.bf16.msra.mxu1 %v11653_v38  ;;  %7133 = vmatprep.subr.bf16.mxu0 %v11658_v52  ;;  %v11740_v38 = vld [vmem:[#allocation22 + $0xe0] ss:$16 sps:$4 sm:$0xff]   ;;  %v11743_v52 = vld [vmem:[#allocation22 + $0xe8] ss:$16 sps:$4 sm:$0xff]  }
 0x5c6   :  { %7239 = vmatprep.subr.bf16.mxu1 %v11661_v0  ;;  %v11748_v0 = vld [vmem:[#allocation22 + $0x104] ss:$16 sps:$4 sm:$0xff]  }
 0x5c8   :  { %7134 = vmatpush1.bf16.msra.mxu0 %v11656_v22  ;;  %v11751_v22 = vld [vmem:[#allocation22 + $0x10c] ss:$16 sps:$4 sm:$0xff]  }
 0x5c9   :  { %7240 = vmatpush1.bf16.msra.mxu1 %v11659_v16  ;;  %7135 = vmatprep.subr.bf16.mxu0 %v11664_v56  ;;  %v11746_v16 = vld [vmem:[#allocation22 + $0x100] ss:$16 sps:$4 sm:$0xff]   ;;  %v11749_v56 = vld [vmem:[#allocation22 + $0x108] ss:$16 sps:$4 sm:$0xff]  }
 0x5ca   :  { %7241 = vmatprep.subr.bf16.mxu1 %v11667_v49  ;;  %v11754_v49 = vld [vmem:[#allocation22 + $0x124] ss:$16 sps:$4 sm:$0xff]  }
 0x5cc   :  { %7136 = vmatpush1.bf16.msra.mxu0 %v11662_v8  ;;  %v11757_v8 = vld [vmem:[#allocation22 + $0x12c] ss:$16 sps:$4 sm:$0xff]  }
 0x5cd   :  { %7242 = vmatpush1.bf16.msra.mxu1 %v11665_v17  ;;  %7137 = vmatprep.subr.bf16.mxu0 %v11670_v60  ;;  %v11752_v17 = vld [vmem:[#allocation22 + $0x120] ss:$16 sps:$4 sm:$0xff]   ;;  %v11755_v60 = vld [vmem:[#allocation22 + $0x128] ss:$16 sps:$4 sm:$0xff]  }
 0x5ce   :  { %7243 = vmatprep.subr.bf16.mxu1 %v11673_v59  ;;  %v11760_v59 = vld [vmem:[#allocation22 + $0x144] ss:$16 sps:$4 sm:$0xff]  }
 0x5d0   :  { %7138 = vmatpush1.bf16.msra.mxu0 %v11668_v48  ;;  %v11763_v48 = vld [vmem:[#allocation22 + $0x14c] ss:$16 sps:$4 sm:$0xff]  }
 0x5d1   :  { %7244 = vmatpush1.bf16.msra.mxu1 %v11671_v19  ;;  %7139 = vmatprep.subr.bf16.mxu0 %v11676_v40  ;;  %v11758_v19 = vld [vmem:[#allocation22 + $0x140] ss:$16 sps:$4 sm:$0xff]   ;;  %v11761_v40 = vld [vmem:[#allocation22 + $0x148] ss:$16 sps:$4 sm:$0xff]  }
 0x5d2   :  { %7245 = vmatprep.subr.bf16.mxu1 %v11679_v2  ;;  %v11766_v2 = vld [vmem:[#allocation22 + $0x164] ss:$16 sps:$4 sm:$0xff]  }
 0x5d4   :  { %7140 = vmatpush1.bf16.msra.mxu0 %v11674_v15  ;;  %v11769_v15 = vld [vmem:[#allocation22 + $0x16c] ss:$16 sps:$4 sm:$0xff]  }
 0x5d5   :  { %7246 = vmatpush1.bf16.msra.mxu1 %v11677_v58  ;;  %7141 = vmatprep.subr.bf16.mxu0 %v11682_v27  ;;  %v11764_v58 = vld [vmem:[#allocation22 + $0x160] ss:$16 sps:$4 sm:$0xff]   ;;  %v11767_v27 = vld [vmem:[#allocation22 + $0x168] ss:$16 sps:$4 sm:$0xff]  }
 0x5d6   :  { %7247 = vmatprep.subr.bf16.mxu1 %v11685_v42 }
 0x5d8   :  { %7142 = vmatpush1.bf16.msra.mxu0 %v11680_v50 }
 0x5d9   :  { %7248 = vmatpush1.bf16.msra.mxu1 %v11683_v63  ;;  %7143 = vmatprep.subr.bf16.mxu0 %v11688_v26 }
 0x5da   :  { %7249 = vmatprep.subr.bf16.mxu1 %v11691_v35 }
 0x5dc   :  { %7144 = vmatpush1.bf16.msra.mxu0 %v11686_v37 }
 0x5dd   :  { %7250 = vmatpush1.bf16.msra.mxu1 %v11689_v36  ;;  %7145 = vmatprep.subr.bf16.mxu0 %v11694_v29 }
 0x5de   :  { %7251 = vmatprep.subr.bf16.mxu1 %v11697_v5 }
 0x5e0   :  { %7146 = vmatpush1.bf16.msra.mxu0 %v11692_v53 }
 0x5e1   :  { %7252 = vmatpush1.bf16.msra.mxu1 %v11695_v23  ;;  %8202 = vmatprep.subr.bf16.mxu0 %v11700_v46 }
 0x5e2   :  { %8300 = vmatprep.subr.bf16.mxu1 %v11703_v57 }
 0x5e3   :  { %7148 = vmatmul.mubr.bf16.vlgmr.msra.gmra.mrb[72].mxu0 %v13607_v9 }
 0x5e4   :  { %7254 = vmatmul.mubr.bf16.vlgmr.msra.gmra.mrb[72].mxu1 %v13607_v9  ;;  %7157 = vmatprep.mubr.bf16.mxu0 %v13623_v31  ;;  %v11721_v9 = vld [vmem:[#allocation22 + $0x6c] ss:$16 sps:$4 sm:$0xff]  }
 0x5e5   :  { %7263 = vmatprep.mubr.bf16.mxu1 %v13623_v31  ;;  %8203 = vmatpush1.bf16.msra.mxu0 %v11698_v3  ;;  %v11716_v31 = vld [vmem:[#allocation22 + $0x60] ss:$16 sps:$4 sm:$0xff]  }
 0x5e6   :  { %8301 = vmatpush1.bf16.msra.mxu1 %v11701_v39  ;;  %8204 = vmatprep.subr.bf16.mxu0 %v11706_v25 }
 0x5e7   :  { %8302 = vmatprep.subr.bf16.mxu1 %v11709_v34 }
 0x5e9   :  { %8205 = vmatpush1.bf16.msra.mxu0 %v11704_v45 }
 0x5ea   :  { %8303 = vmatpush1.bf16.msra.mxu1 %v11707_v54  ;;  %8206 = vmatprep.subr.bf16.mxu0 %v11712_v61  ;;  %v11772_v54 = vld [vmem:[#allocation22 + $0x184] ss:$16 sps:$4 sm:$0xff]   ;;  %v11775_v61 = vld [vmem:[#allocation22 + $0x18c] ss:$16 sps:$4 sm:$0xff]  }
 0x5eb   :  { %7158 = vmatmul.mubr.bf16.gmra.mrb[76].mxu0 %v13618_v55  ;;  %8304 = vmatprep.subr.bf16.mxu1 %v11715_v33 }
 0x5ec   :  { %7264 = vmatmul.mubr.bf16.gmra.mrb[76].mxu1 %v13618_v55  ;;  %v11731_v55 = vld [vmem:[#allocation22 + $0xa8] ss:$16 sps:$4 sm:$0xff]  }
 0x5ed   :  { %8207 = vmatpush1.bf16.msra.mxu0 %v11710_v6 }
 0x5ee   :  { %8305 = vmatpush1.bf16.msra.mxu1 %v11713_v4  ;;  %8208 = vmatprep.subr.bf16.mxu0 %v11718_v7  ;;  %v11770_v4 = vld [vmem:[#allocation22 + $0x180] ss:$16 sps:$4 sm:$0xff]   ;;  %v11773_v7 = vld [vmem:[#allocation22 + $0x188] ss:$16 sps:$4 sm:$0xff]  }
 0x5ef   :  { %8306 = vmatprep.subr.bf16.mxu1 %v11721_v9 }
 0x5f1   :  { %8209 = vmatpush1.bf16.msra.mxu0 %v11716_v31 }
 0x5f2   :  { %8307 = vmatpush1.bf16.msra.mxu1 %v11719_v24  ;;  %8210 = vmatprep.subr.bf16.mxu0 %v11724_v30 }
 0x5f3   :  { %8308 = vmatprep.subr.bf16.mxu1 %v11727_v13 }
 0x5f5   :  { %8211 = vmatpush1.bf16.msra.mxu0 %v11722_v41 }
 0x5f6   :  { %8309 = vmatpush1.bf16.msra.mxu1 %v11725_v32  ;;  %8212 = vmatprep.subr.bf16.mxu0 %v11730_v10 }
 0x5f7   :  { %8310 = vmatprep.subr.bf16.mxu1 %v11733_v21 }
 0x5f9   :  { %8213 = vmatpush1.bf16.msra.mxu0 %v11728_v47 }
 0x5fa   :  { %8311 = vmatpush1.bf16.msra.mxu1 %v11731_v55  ;;  %8214 = vmatprep.subr.bf16.mxu0 %v11736_v44  ;;  %v11778_v55 = vld [vmem:[#allocation22 + $0x1a4] ss:$16 sps:$4 sm:$0xff]  }
 0x5fb   :  { %8312 = vmatprep.subr.bf16.mxu1 %v11739_v14 }
 0x5fd   :  { %8215 = vmatpush1.bf16.msra.mxu0 %v11734_v28 }
 0x5fe   :  { %8313 = vmatpush1.bf16.msra.mxu1 %v11737_v20  ;;  %8216 = vmatprep.subr.bf16.mxu0 %v11742_v43  ;;  %v11776_v43 = vld [vmem:[#allocation22 + $0x1a0] ss:$16 sps:$4 sm:$0xff]  }
 0x5ff   :  { %8314 = vmatprep.subr.bf16.mxu1 %v11745_v62 }
 0x601   :  { %8217 = vmatpush1.bf16.msra.mxu0 %v11740_v38 }
 0x602   :  { %8315 = vmatpush1.bf16.msra.mxu1 %v11743_v52  ;;  %8218 = vmatprep.subr.bf16.mxu0 %v11748_v0  ;;  %v11779_v52 = vld [vmem:[#allocation22 + $0x1a8] ss:$16 sps:$4 sm:$0xff]   ;;  %v11781_v0 = vld [vmem:[#allocation22 + $0x1ac] ss:$16 sps:$4 sm:$0xff]  }
 0x603   :  { %8316 = vmatprep.subr.bf16.mxu1 %v11751_v22 }
 0x605   :  { %8219 = vmatpush1.bf16.msra.mxu0 %v11746_v16 }
 0x606   :  { %8317 = vmatpush1.bf16.msra.mxu1 %v11749_v56  ;;  %8220 = vmatprep.subr.bf16.mxu0 %v11754_v49 }
 0x607   :  { %8318 = vmatprep.subr.bf16.mxu1 %v11757_v8 }
 0x609   :  { %8221 = vmatpush1.bf16.msra.mxu0 %v11752_v17 }
 0x60a   :  { %8319 = vmatpush1.bf16.msra.mxu1 %v11755_v60  ;;  %8222 = vmatprep.subr.bf16.mxu0 %v11760_v59  ;;  %v11784_v60 = vld [vmem:[#allocation22 + $0x1c4] ss:$16 sps:$4 sm:$0xff]   ;;  %v11787_v59 = vld [vmem:[#allocation22 + $0x1cc] ss:$16 sps:$4 sm:$0xff]  }
 0x60b   :  { %8320 = vmatprep.subr.bf16.mxu1 %v11763_v48 }
 0x60d   :  { %8223 = vmatpush1.bf16.msra.mxu0 %v11758_v19 }
 0x60e   :  { %8321 = vmatpush1.bf16.msra.mxu1 %v11761_v40  ;;  %8224 = vmatprep.subr.bf16.mxu0 %v11766_v2  ;;  %v11782_v40 = vld [vmem:[#allocation22 + $0x1c0] ss:$16 sps:$4 sm:$0xff]   ;;  %v11785_v2 = vld [vmem:[#allocation22 + $0x1c8] ss:$16 sps:$4 sm:$0xff]  }
 0x60f   :  { %8322 = vmatprep.subr.bf16.mxu1 %v11769_v15 }
 0x611   :  { %8225 = vmatpush1.bf16.msra.mxu0 %v11764_v58 }
 0x612   :  { %8323 = vmatpush1.bf16.msra.mxu1 %v11767_v27  ;;  %8226 = vmatprep.subr.bf16.mxu0 %v11772_v54 }
 0x613   :  { %8324 = vmatprep.subr.bf16.mxu1 %v11775_v61  ;;  %v13742_v61 = vrot.slane %v7328_v18, %v13054_v51 }
 0x615   :  { %8227 = vmatpush1.bf16.msra.mxu0 %v11770_v4 }
 0x616   :  { %8325 = vmatpush1.bf16.msra.mxu1 %v11773_v7  ;;  %8228 = vmatprep.subr.bf16.mxu0 %v11778_v55 }
 0x617   :  { %8326 = vmatprep.subr.bf16.mxu1 %v11781_v0 }
 0x619   :  { %8229 = vmatpush1.bf16.msra.mxu0 %v11776_v43 }
 0x61a   :  { %8327 = vmatpush1.bf16.msra.mxu1 %v11779_v52  ;;  %8230 = vmatprep.subr.bf16.mxu0 %v11784_v60 }
 0x61b   :  { %8328 = vmatprep.subr.bf16.mxu1 %v11787_v59 }
 0x61d   :  { %8231 = vmatpush1.bf16.msra.mxu0 %v11782_v40 }
 0x61e   :  { %8329 = vmatpush1.bf16.msra.mxu1 %v11785_v2 }
 0x635   :  { %v13651_v42 = vpop.f32.mrb[64].mxu0  ;;  %v13653_v50 = vpop.f32.mrb[64].mxu1 }
 0x636   :  { %v13655_v63 = vpop.f32.mrb[65].mxu0  ;;  %v13657_v26 = vpop.f32.mrb[65].mxu1  ;;  %v6390_v36 = vrot.slane %v13651_v42, 2  ;;  %v6392_v29 = vrot.slane %v13653_v50, 2  ;;  %v11790_v50 = vld [vmem:[#allocation22 + $0x1e4] ss:$16 sps:$4 sm:$0xff]  }
 0x637   :  { %v6269_v35 = vpop.f32.mrb[66].mxu0  ;;  %v6375_v37 = vpop.f32.mrb[66].mxu1  ;;  %v6391_v57 = vrot.slane %v13655_v63, 2  ;;  %v6393_v3 = vrot.slane %v13657_v26, 2  ;;  %v11793_v63 = vld [vmem:[#allocation22 + $0x1ec] ss:$16 sps:$4 sm:$0xff]   ;;  %8232 = vmatprep.subr.bf16.mxu0 %v11790_v50 }
 0x638   :  { %v6394_v5 = vrot.slane %v6269_v35, 2  ;;  %v6396_v53 = vrot.slane %v6375_v37, 2  ;;  %v6271_v23 = vpop.f32.mrb[67].mxu0  ;;  %v6377_v46 = vpop.f32.mrb[67].mxu1  ;;  %v11788_v26 = vld [vmem:[#allocation22 + $0x1e0] ss:$16 sps:$4 sm:$0xff]   ;;  %8330 = vmatprep.subr.bf16.mxu1 %v11793_v63 }
 0x639   :  { %v6395_v39 = vrot.slane %v6271_v23, 2  ;;  %v6397_v25 = vrot.slane %v6377_v46, 2  ;;  %v11791_v35 = vld [vmem:[#allocation22 + $0x1e8] ss:$16 sps:$4 sm:$0xff]   ;;  %8233 = vmatpush1.bf16.msra.mxu0 %v11788_v26  ;;  %v11796_v37 = vld [vmem:[#allocation22 + $0x204] ss:$16 sps:$4 sm:$0xff]   ;;  %v13729_v46 = vrot.slane %v7328_v18, %v13051_v11 }
 0x63a   :  { %v13665_v34 = vsel %vm1243_vm1, %v6390_v36, %v6394_v5  ;;  %v13669_v45 = vsel %vm1243_vm1, %v6392_v29, %v6396_v53  ;;  %8331 = vmatpush1.bf16.msra.mxu1 %v11791_v35  ;;  %8251 = vmatprep.subr.bf16.mxu0 %v11796_v37 }
 0x63b   :  { %v13673_v33 = vsel %vm1243_vm1, %v6391_v57, %v6395_v39  ;;  %v13677_v6 = vsel %vm1243_vm1, %v6393_v3, %v6397_v25 }
 0x63d   :  { %v6275_v9 = vpop.f32.mrb[68].mxu0  ;;  %v6381_v31 = vpop.f32.mrb[68].mxu1 }
 0x63e   :  { %v6398_v24 = vrot.slane %v6275_v9, 2  ;;  %v6400_v30 = vrot.slane %v6381_v31, 2  ;;  %v6277_v13 = vpop.f32.mrb[69].mxu0  ;;  %v6383_v41 = vpop.f32.mrb[69].mxu1 }
 0x63f   :  { %v6399_v32 = vrot.slane %v6277_v13, 2  ;;  %v6401_v10 = vrot.slane %v6383_v41, 2  ;;  %v6279_v21 = vpop.f32.mrb[70].mxu0  ;;  %v6385_v47 = vpop.f32.mrb[70].mxu1 }
 0x640   :  { %v6402_v44 = vrot.slane %v6279_v21, 2  ;;  %v6404_v14 = vrot.slane %v6385_v47, 2  ;;  %v6281_v28 = vpop.f32.mrb[71].mxu0  ;;  %v6387_v20 = vpop.f32.mrb[71].mxu1  ;;  %v6410_v22 = vsel %vm1243_vm1, %v6394_v5, %v6398_v24  ;;  %v13683_v16 = vsel %vm1243_vm1, %v6396_v53, %v6400_v30  ;;  %v7366_v5 = vld [vmem:[#allocation20] sm:$0xf] }
 0x641   :  { %v6403_v62 = vrot.slane %v6281_v28, 2  ;;  %v6405_v38 = vrot.slane %v6387_v20, 2  ;;  %v13687_v56 = vsel %vm1243_vm1, %v6395_v39, %v6399_v32  ;;  %v13691_v49 = vsel %vm1243_vm1, %v6397_v25, %v6401_v10 }
 0x642   :  { %v13695_v8 = vsel %vm1243_vm1, %v6398_v24, %v6402_v44  ;;  %v13699_v17 = vsel %vm1243_vm1, %v6400_v30, %v6404_v14  ;;  %v13711_v15 = vsel %vm1243_vm1, %v6402_v44, %v6390_v36  ;;  %v13715_v58 = vsel %vm1243_vm1, %v6404_v14, %v6392_v29  ;;  %v11799_v36 = vld [vmem:[#allocation22 + $0x20c] ss:$16 sps:$4 sm:$0xff]   ;;  %v7274_v29 = vld [vmem:[#allocation17] sm:$0xf] }
 0x643   :  { %v13703_v48 = vsel %vm1243_vm1, %v6399_v32, %v6403_v62  ;;  %v13707_v19 = vsel %vm1243_vm1, %v6401_v10, %v6405_v38  ;;  %v13719_v27 = vsel %vm1243_vm1, %v6403_v62, %v6391_v57  ;;  %v13723_v42 = vsel %vm1243_vm1, %v6405_v38, %v6393_v3  ;;  %8349 = vmatprep.subr.bf16.mxu1 %v11799_v36 }
 0x644   :  { %v13726_v53 = vrot.slane %v7274_v29, %v13051_v11  ;;  %v13732_v57 = vrot.slane %v7366_v5, %v13051_v11  ;;  %v13735_v3 = vrot.slane %v7274_v29, %v13054_v51  ;;  %v13738_v39 = vrot.slane %v7274_v29, %v13057_v12 }
 0x645   :  { %v13745_v4 = vrot.slane %v7366_v5, %v13054_v51  ;;  %v13748_v9 = vrot.slane %v7274_v29, %v13060_v1  ;;  %v13753_v30 = vrot.slane %v7328_v18, %v13057_v12  ;;  %v13761_v44 = vrot.slane %v7366_v5, %v13057_v12 }
 0x646   :  { %v13776_v35 = vrot.slane %v7366_v5, %v13060_v1 }
 0x6b6   :  { %v7149_v23 = vpop.f32.mrb[72].mxu0 }
 0x6b7   :  { %v10360_v25 = vadd.f32 %v7149_v23, %v13665_v34  ;;  %v7255_v54 = vpop.f32.mrb[72].mxu1  ;;  %v7151_v7 = vpop.f32.mrb[73].mxu0  ;;  %v13756_v34 = vrot.slane %v7328_v18, %v13060_v1 }
 0x6b8   :  { %v10368_v31 = vadd.f32 %v7255_v54, %v13669_v45  ;;  %v10361_v24 = vadd.f32 %v7151_v7, %v13673_v33  ;;  %v7257_v13 = vpop.f32.mrb[73].mxu1  ;;  %v7153_v41 = vpop.f32.mrb[74].mxu0 }
 0x6b9   :  { %v7296_v32 = vadd.f32 %v10360_v25, %v13726_v53  ;;  %v10369_v10 = vadd.f32 %v7257_v13, %v13677_v6  ;;  %v10362_v21 = vadd.f32 %v7153_v41, %v6410_v22  ;;  %v7259_v47 = vpop.f32.mrb[74].mxu1  ;;  %v7155_v55 = vpop.f32.mrb[75].mxu0 }
 0x6ba   :  { %v7298_v45 = vadd.f32 %v10368_v31, %v13735_v3  ;;  %v7297_v33 = vadd.f32 %v10361_v24, %v13738_v39  ;;  %v10370_v14 = vadd.f32 %v7259_v47, %v13683_v16  ;;  %v10363_v28 = vadd.f32 %v7155_v55, %v13687_v56  ;;  %v7261_v20 = vpop.f32.mrb[75].mxu1 }
 0x6bb   :  { %v7312_v43 = vmax.f32 %v7296_v32, 0.0  ;;  %v7299_v62 = vadd.f32 %v10369_v10, %v13748_v9  ;;  %v7300_v6 = vadd.f32 %v10362_v21, %v13726_v53  ;;  %v10371_v38 = vadd.f32 %v7261_v20, %v13691_v49 }
 0x6bc   :  { %v7314_v52 = vmax.f32 %v7298_v45, 0.0  ;;  %v7313_v0 = vmax.f32 %v7297_v33, 0.0  ;;  %v7302_v22 = vadd.f32 %v10370_v14, %v13735_v3  ;;  %v7301_v60 = vadd.f32 %v10363_v28, %v13738_v39 }
 0x6bd   :  { %v7350_v59 = vmul.f32 %v13729_v46, %v7312_v43  ;;  %v7315_v40 = vmax.f32 %v7299_v62, 0.0  ;;  %v7316_v16 = vmax.f32 %v7300_v6, 0.0  ;;  %v7303_v56 = vadd.f32 %v10371_v38, %v13748_v9 }
 0x6be   :  { %v7352_v2 = vmul.f32 %v13742_v61, %v7314_v52  ;;  %v7318_v50 = vmax.f32 %v7302_v22, 0.0  ;;  %v7317_v63 = vmax.f32 %v7301_v60, 0.0  ;;  %v7159_v26 = vpop.f32.mrb[76].mxu0  ;;  %v7351_v37 = vmul.f32 %v13753_v30, %v7313_v0 }
 0x6bf   :  { %v7388_v49 = vadd.f32 %v13732_v57, %v7350_v59  ;;  %v7353_v36 = vmul.f32 %v13756_v34, %v7315_v40  ;;  %v7354_v29 = vmul.f32 %v13729_v46, %v7316_v16  ;;  %v7265_v18 = vpop.f32.mrb[76].mxu1  ;;  %v7161_v23 = vpop.f32.mrb[77].mxu0  ;;  %v7319_v7 = vmax.f32 %v7303_v56, 0.0 }
 0x6c0   :  { %v7390_v25 = vadd.f32 %v13745_v4, %v7352_v2  ;;  %v7356_v54 = vmul.f32 %v13742_v61, %v7318_v50  ;;  %v10364_v31 = vadd.f32 %v7159_v26, %v13695_v8  ;;  %v7267_v24 = vpop.f32.mrb[77].mxu1  ;;  %v7163_v5 = vpop.f32.mrb[78].mxu0  ;;  %v7355_v41 = vmul.f32 %v13753_v30, %v7317_v63 }
 0x6c1   :  { %v7392_v13 = vadd.f32 %v13732_v57, %v7354_v29  ;;  %v10372_v32 = vadd.f32 %v7265_v18, %v13699_v17  ;;  %v10365_v10 = vadd.f32 %v7161_v23, %v13703_v48  ;;  %v7269_v21 = vpop.f32.mrb[78].mxu1  ;;  %v7165_v47 = vpop.f32.mrb[79].mxu0  ;;  %v10373_v33 = vadd.f32 %v7267_v24, %v13707_v19 }
 0x6c2   :  { %v7394_v55 = vadd.f32 %v13745_v4, %v7356_v54  ;;  %v7304_v45 = vadd.f32 %v10364_v31, %v13726_v53  ;;  %v10366_v8 = vadd.f32 %v7163_v5, %v13711_v15  ;;  %v7271_v14 = vpop.f32.mrb[79].mxu1  ;;  %v10374_v17 = vadd.f32 %v7269_v21, %v13715_v58  ;;  %v11797_v54 = vld [vmem:[#allocation22 + $0x208] ss:$16 sps:$4 sm:$0xff]   ;;  %v11805_v31 = vld [vmem:[#allocation22 + $0x22c] ss:$16 sps:$4 sm:$0xff]  }
 0x6c3   :  { %v7404_v28 = vpack.c.bf16 %v7392_v13, %v7388_v49  ;;  %v7306_v20 = vadd.f32 %v10372_v32, %v13735_v3  ;;  %v7305_v43 = vadd.f32 %v10365_v10, %v13738_v39  ;;  %v7307_v6 = vadd.f32 %v10373_v33, %v13748_v9  ;;  %v11800_v10 = vld [vmem:[#allocation22 + $0x220] ss:$16 sps:$4 sm:$0xff]   ;;  %v11803_v21 = vld [vmem:[#allocation22 + $0x228] ss:$16 sps:$4 sm:$0xff]  }
 0x6c4   :  { %v13796_v62 = vpack.c.bf16 %v7394_v55, %v7390_v25  ;;  %v7320_v48 = vmax.f32 %v7304_v45, 0.0  ;;  %v7308_v38 = vadd.f32 %v10366_v8, %v13726_v53  ;;  %v7310_v19 = vadd.f32 %v10374_v17, %v13735_v3  ;;  %v11811_v55 = vld [vmem:[#allocation22 + $0x24c] ss:$16 sps:$4 sm:$0xff]   ;;  %v11809_v33 = vld [vmem:[#allocation22 + $0x248] ss:$16 sps:$4 sm:$0xff]  }
 0x6c5   :  { %v7322_v52 = vmax.f32 %v7306_v20, 0.0  ;;  %v7321_v0 = vmax.f32 %v7305_v43, 0.0  ;;  %v10367_v15 = vadd.f32 %v7165_v47, %v13719_v27  ;;  %v7323_v60 = vmax.f32 %v7307_v6, 0.0  ;;  %v11808_v47 = vld [vmem:[#allocation22 + $0x244] ss:$16 sps:$4 sm:$0xff]  }
 0x6c6   :  { %v7358_v22 = vmul.f32 %v13729_v46, %v7320_v48  ;;  %v7324_v59 = vmax.f32 %v7308_v38, 0.0  ;;  %v10375_v40 = vadd.f32 %v7271_v14, %v13723_v42  ;;  %v7357_v58 = vmul.f32 %v13756_v34, %v7319_v7  ;;  %v11802_v7 = vld [vmem:[#allocation22 + $0x224] ss:$16 sps:$4 sm:$0xff]   ;;  %v11817_v8 = vld [vmem:[#allocation22 + $0x26c] ss:$16 sps:$4 sm:$0xff]  }
 0x6c7   :  { %v7360_v16 = vmul.f32 %v13742_v61, %v7322_v52  ;;  %v7326_v56 = vmax.f32 %v7310_v19, 0.0  ;;  %v7309_v2 = vadd.f32 %v10367_v15, %v13738_v39  ;;  %v7359_v53 = vmul.f32 %v13753_v30, %v7321_v0  ;;  %v11812_v14 = vld [vmem:[#allocation22 + $0x260] ss:$16 sps:$4 sm:$0xff]   ;;  %v11820_v20 = vld [vmem:[#allocation22 + $0x284] ss:$16 sps:$4 sm:$0xff]  }
 0x6c8   :  { %v7362_v50 = vmul.f32 %v13729_v46, %v7324_v59  ;;  %v7311_v3 = vadd.f32 %v10375_v40, %v13748_v9  ;;  %v7389_v26 = vadd.f32 %v13761_v44, %v7351_v37  ;;  %v7393_v42 = vadd.f32 %v13761_v44, %v7355_v41  ;;  %v11794_v46 = vld [vmem:[#allocation22 + $0x200] ss:$16 sps:$4 sm:$0xff]   ;;  %v11823_v43 = vld [vmem:[#allocation22 + $0x28c] ss:$16 sps:$4 sm:$0xff]   ;;  %v11821_v48 = vld [vmem:[#allocation22 + $0x288] ss:$16 sps:$4 sm:$0xff]  }
 0x6c9   :  { %v7364_v27 = vmul.f32 %v13742_v61, %v7326_v56  ;;  %v7325_v63 = vmax.f32 %v7309_v2, 0.0  ;;  %v7361_v49 = vmul.f32 %v13756_v34, %v7323_v60  ;;  %v7396_v18 = vadd.f32 %v13732_v57, %v7358_v22  ;;  %v11818_v17 = vld [vmem:[#allocation22 + $0x280] ss:$16 sps:$4 sm:$0xff]   ;;  %v11826_v6 = vld [vmem:[#allocation22 + $0x2a4] ss:$16 sps:$4 sm:$0xff]  }
 0x6ca   :  { %v7327_v29 = vmax.f32 %v7311_v3, 0.0  ;;  %v7400_v39 = vadd.f32 %v13732_v57, %v7362_v50  ;;  %v7405_v25 = vpack.c.bf16 %v7393_v42, %v7389_v26  ;;  %v7391_v9 = vadd.f32 %v13776_v35, %v7353_v36  ;;  %v11829_v38 = vld [vmem:[#allocation22 + $0x2ac] ss:$16 sps:$4 sm:$0xff]   ;;  %v11824_v52 = vld [vmem:[#allocation22 + $0x2a0] ss:$16 sps:$4 sm:$0xff]  }
 0x6cb   :  { %v7363_v23 = vmul.f32 %v13753_v30, %v7325_v63  ;;  %v7395_v61 = vadd.f32 %v13776_v35, %v7357_v58  ;;  %v7398_v5 = vadd.f32 %v13745_v4, %v7360_v16  ;;  %v7402_v13 = vadd.f32 %v13745_v4, %v7364_v27  ;;  %v11827_v0 = vld [vmem:[#allocation22 + $0x2a8] ss:$16 sps:$4 sm:$0xff]   ;;  %v11832_v19 = vld [vmem:[#allocation22 + $0x2c4] ss:$16 sps:$4 sm:$0xff]   ;;  %v11835_v15 = vld [vmem:[#allocation22 + $0x2cc] ss:$16 sps:$4 sm:$0xff]  }
 0x6cc   :  { %v7365_v37 = vmul.f32 %v13756_v34, %v7327_v29  ;;  %v7408_v24 = vpack.c.bf16 %v7400_v39, %v7396_v18  ;;  %8234 = vmatprep.mubr.bf16.mxu0 %v7405_v25  ;;  %8332 = vmatprep.mubr.bf16.mxu1 %v7405_v25  ;;  %v7397_v57 = vadd.f32 %v13761_v44, %v7359_v53  ;;  %v11830_v22 = vld [vmem:[#allocation22 + $0x2c0] ss:$16 sps:$4 sm:$0xff]   ;;  %v11833_v60 = vld [vmem:[#allocation22 + $0x2c8] ss:$16 sps:$4 sm:$0xff]   ;;  %v11838_v59 = vld [vmem:[#allocation22 + $0x2e4] ss:$16 sps:$4 sm:$0xff]  }
 0x6cd   :  { %v7401_v30 = vadd.f32 %v13761_v44, %v7363_v23  ;;  %v7407_v41 = vpack.c.bf16 %v7395_v61, %v7391_v9  ;;  %8235 = vmatmul.mubr.bf16.vlgmr.msra.gmra.mrb[80].mxu0 %v7404_v28  ;;  %8333 = vmatmul.mubr.bf16.vlgmr.msra.gmra.mrb[80].mxu1 %v7404_v28  ;;  %v7399_v36 = vadd.f32 %v13776_v35, %v7361_v49  ;;  %v11806_v44 = vld [vmem:[#allocation22 + $0x240] ss:$16 sps:$4 sm:$0xff]   ;;  %v11815_v28 = vld [vmem:[#allocation22 + $0x268] ss:$16 sps:$4 sm:$0xff]   ;;  %v11841_v40 = vld [vmem:[#allocation22 + $0x2ec] ss:$16 sps:$4 sm:$0xff]  }
 0x6ce   :  { %v7403_v34 = vadd.f32 %v13776_v35, %v7365_v37  ;;  %v13826_v32 = vpack.c.bf16 %v7402_v13, %v7398_v5  ;;  %8252 = vmatpush1.bf16.msra.mxu0 %v11794_v46  ;;  %8350 = vmatpush1.bf16.msra.mxu1 %v11797_v54  ;;  %v11814_v35 = vld [vmem:[#allocation22 + $0x264] ss:$16 sps:$4 sm:$0xff]   ;;  %v11836_v58 = vld [vmem:[#allocation22 + $0x2e0] ss:$16 sps:$4 sm:$0xff]   ;;  %v11839_v16 = vld [vmem:[#allocation22 + $0x2e8] ss:$16 sps:$4 sm:$0xff]  }
 0x6cf   :  { %v7409_v4 = vpack.c.bf16 %v7401_v30, %v7397_v57  ;;  %8253 = vmatprep.subr.bf16.mxu0 %v11802_v7  ;;  %8351 = vmatprep.subr.bf16.mxu1 %v11805_v31  ;;  %v11844_v56 = vld [vmem:[#allocation22 + $0x304] ss:$16 sps:$4 sm:$0xff]   ;;  %v11847_v2 = vld [vmem:[#allocation22 + $0x30c] ss:$16 sps:$4 sm:$0xff]   ;;  %v11842_v53 = vld [vmem:[#allocation22 + $0x300] ss:$16 sps:$4 sm:$0xff]  }
 0x6d0   :  { %v13828_v45 = vpack.c.bf16 %v7403_v34, %v7399_v36  ;;  %v11845_v50 = vld [vmem:[#allocation22 + $0x308] ss:$16 sps:$4 sm:$0xff]   ;;  %v11850_v3 = vld [vmem:[#allocation22 + $0x324] ss:$16 sps:$4 sm:$0xff]   ;;  %v11853_v27 = vld [vmem:[#allocation22 + $0x32c] ss:$16 sps:$4 sm:$0xff]  }
 0x6d1   :  { %8244 = vmatprep.mubr.bf16.mxu0 %v7409_v4  ;;  %8342 = vmatprep.mubr.bf16.mxu1 %v7409_v4  ;;  %v11848_v63 = vld [vmem:[#allocation22 + $0x320] ss:$16 sps:$4 sm:$0xff]   ;;  %v11851_v26 = vld [vmem:[#allocation22 + $0x328] ss:$16 sps:$4 sm:$0xff]   ;;  %v11856_v42 = vld [vmem:[#allocation22 + $0x344] ss:$16 sps:$4 sm:$0xff]  }
 0x6d2   :  { %8254 = vmatpush1.bf16.msra.mxu0 %v11800_v10  ;;  %8352 = vmatpush1.bf16.msra.mxu1 %v11803_v21  ;;  %v11859_v49 = vld [vmem:[#allocation22 + $0x34c] ss:$16 sps:$4 sm:$0xff]   ;;  %v11854_v29 = vld [vmem:[#allocation22 + $0x340] ss:$16 sps:$4 sm:$0xff]   ;;  %v11857_v18 = vld [vmem:[#allocation22 + $0x348] ss:$16 sps:$4 sm:$0xff]  }
 0x6d3   :  { %8255 = vmatprep.subr.bf16.mxu0 %v11808_v47  ;;  %8353 = vmatprep.subr.bf16.mxu1 %v11811_v55  ;;  %v11862_v39 = vld [vmem:[#allocation22 + $0x364] ss:$16 sps:$4 sm:$0xff]   ;;  %v11865_v23 = vld [vmem:[#allocation22 + $0x36c] ss:$16 sps:$4 sm:$0xff]   ;;  %v11860_v25 = vld [vmem:[#allocation22 + $0x360] ss:$16 sps:$4 sm:$0xff]  }
 0x6d4   :  { %v11863_v46 = vld [vmem:[#allocation22 + $0x368] ss:$16 sps:$4 sm:$0xff]   ;;  %v11868_v54 = vld [vmem:[#allocation22 + $0x384] ss:$16 sps:$4 sm:$0xff]   ;;  %v11871_v9 = vld [vmem:[#allocation22 + $0x38c] ss:$16 sps:$4 sm:$0xff]  }
 0x6d5   :  { %8245 = vmatmul.mubr.bf16.gmra.mrb[84].mxu0 %v7408_v24  ;;  %8343 = vmatmul.mubr.bf16.gmra.mrb[84].mxu1 %v7408_v24  ;;  %v11866_v61 = vld [vmem:[#allocation22 + $0x380] ss:$16 sps:$4 sm:$0xff]   ;;  %v11869_v37 = vld [vmem:[#allocation22 + $0x388] ss:$16 sps:$4 sm:$0xff]   ;;  %v11874_v7 = vld [vmem:[#allocation22 + $0x3a4] ss:$16 sps:$4 sm:$0xff]  }
 0x6d6   :  { %8256 = vmatpush1.bf16.msra.mxu0 %v11806_v44  ;;  %8354 = vmatpush1.bf16.msra.mxu1 %v11809_v33  ;;  %v11877_v31 = vld [vmem:[#allocation22 + $0x3ac] ss:$16 sps:$4 sm:$0xff]   ;;  %v11872_v24 = vld [vmem:[#allocation22 + $0x3a0] ss:$16 sps:$4 sm:$0xff]   ;;  %v11875_v5 = vld [vmem:[#allocation22 + $0x3a8] ss:$16 sps:$4 sm:$0xff]  }
 0x6d7   :  { %8283 = vmatprep.mubr.bf16.mxu0 %v7407_v41  ;;  %8381 = vmatprep.mubr.bf16.mxu1 %v7407_v41  ;;  %v11880_v13 = vld [vmem:[#allocation22 + $0x3c4] ss:$16 sps:$4 sm:$0xff]   ;;  %v11883_v57 = vld [vmem:[#allocation22 + $0x3cc] ss:$16 sps:$4 sm:$0xff]   ;;  %v11878_v30 = vld [vmem:[#allocation22 + $0x3c0] ss:$16 sps:$4 sm:$0xff]  }
 0x6d8   :  { %8257 = vmatprep.subr.bf16.mxu0 %v11814_v35  ;;  %8355 = vmatprep.subr.bf16.mxu1 %v11817_v8  ;;  %v11881_v41 = vld [vmem:[#allocation22 + $0x3c8] ss:$16 sps:$4 sm:$0xff]   ;;  %v11886_v36 = vld [vmem:[#allocation22 + $0x3e4] ss:$16 sps:$4 sm:$0xff]   ;;  %v11889_v34 = vld [vmem:[#allocation22 + $0x3ec] ss:$16 sps:$4 sm:$0xff]  }
 0x6d9   :  { %v11884_v10 = vld [vmem:[#allocation22 + $0x3e0] ss:$16 sps:$4 sm:$0xff]   ;;  %v11887_v21 = vld [vmem:[#allocation22 + $0x3e8] ss:$16 sps:$4 sm:$0xff]  }
 0x6da   :  { %8258 = vmatpush1.bf16.msra.mxu0 %v11812_v14  ;;  %8356 = vmatpush1.bf16.msra.mxu1 %v11815_v28  ;;  %v11890_v4 = vld [vmem:[#allocation28 + $0x140] sm:$0xff]   ;;  %v11894_v33 = vld [vmem:[#allocation28 + $0x148] sm:$0xff]   ;;  %v11899_v14 = vld [vmem:[#allocation28 + $0x1d0] sm:$0xff]  }
 0x6db   :  { %8259 = vmatprep.subr.bf16.mxu0 %v11820_v20  ;;  %8357 = vmatprep.subr.bf16.mxu1 %v11823_v43  ;;  %v11891_v47 = vld [vmem:[#allocation28 + $0x1c0] sm:$0xff]   ;;  %v11895_v35 = vld [vmem:[#allocation28 + $0x1c8] sm:$0xff]   ;;  %v11900_v28 = vld [vmem:[#allocation28 + $0x110] sm:$0xff]  }
 0x6dc   :  { %v11892_v55 = vld [vmem:[#allocation28 + $0x100] sm:$0xff]   ;;  %v11896_v8 = vld [vmem:[#allocation28 + $0x108] sm:$0xff]   ;;  %v11902_v20 = vld [vmem:[#allocation28 + $0x158] sm:$0xff]  }
 0x6dd   :  { %v11893_v44 = vld [vmem:[#allocation28 + $0x180] sm:$0xff]   ;;  %v11903_v43 = vld [vmem:[#allocation28 + $0x1d8] sm:$0xff]  }
 0x6de   :  { %8260 = vmatpush1.bf16.msra.mxu0 %v11818_v17  ;;  %8358 = vmatpush1.bf16.msra.mxu1 %v11821_v48  ;;  %v11904_v17 = vld [vmem:[#allocation28 + $0x118] sm:$0xff]  }
 0x6df   :  { %8261 = vmatprep.subr.bf16.mxu0 %v11826_v6  ;;  %8359 = vmatprep.subr.bf16.mxu1 %v11829_v38  ;;  %v11905_v48 = vld [vmem:[#allocation28 + $0x198] sm:$0xff]   ;;  %v11906_v6 = vld [vmem:[#allocation28 + $0x160] sm:$0xff]  }
 0x6e0   :  { %v11907_v38 = vld [vmem:[#allocation28 + $0x1e0] sm:$0xff]  }
 0x6e2   :  { %8262 = vmatpush1.bf16.msra.mxu0 %v11824_v52  ;;  %8360 = vmatpush1.bf16.msra.mxu1 %v11827_v0  ;;  %v11908_v52 = vld [vmem:[#allocation28 + $0x120] sm:$0xff]  }
 0x6e3   :  { %8263 = vmatprep.subr.bf16.mxu0 %v11832_v19  ;;  %8361 = vmatprep.subr.bf16.mxu1 %v11835_v15  ;;  %v11909_v0 = vld [vmem:[#allocation28 + $0x1a0] sm:$0xff]   ;;  %v11910_v19 = vld [vmem:[#allocation28 + $0x168] sm:$0xff]  }
 0x6e4   :  { %v11911_v15 = vld [vmem:[#allocation28 + $0x1e8] sm:$0xff]  }
 0x6e6   :  { %8264 = vmatpush1.bf16.msra.mxu0 %v11830_v22  ;;  %8362 = vmatpush1.bf16.msra.mxu1 %v11833_v60  ;;  %v11912_v22 = vld [vmem:[#allocation28 + $0x128] sm:$0xff]  }
 0x6e7   :  { %8265 = vmatprep.subr.bf16.mxu0 %v11838_v59  ;;  %8363 = vmatprep.subr.bf16.mxu1 %v11841_v40  ;;  %v11913_v60 = vld [vmem:[#allocation28 + $0x1a8] sm:$0xff]   ;;  %v11914_v59 = vld [vmem:[#allocation28 + $0x170] sm:$0xff]  }
 0x6e8   :  { %v11915_v40 = vld [vmem:[#allocation28 + $0x1f0] sm:$0xff]  }
 0x6ea   :  { %8266 = vmatpush1.bf16.msra.mxu0 %v11836_v58  ;;  %8364 = vmatpush1.bf16.msra.mxu1 %v11839_v16  ;;  %v11916_v58 = vld [vmem:[#allocation28 + $0x130] sm:$0xff]  }
 0x6eb   :  { %8267 = vmatprep.subr.bf16.mxu0 %v11844_v56  ;;  %8365 = vmatprep.subr.bf16.mxu1 %v11847_v2  ;;  %v11917_v16 = vld [vmem:[#allocation28 + $0x1b0] sm:$0xff]   ;;  %v11918_v56 = vld [vmem:[#allocation28 + $0x178] sm:$0xff]  }
 0x6ec   :  { %v11919_v2 = vld [vmem:[#allocation28 + $0x1f8] sm:$0xff]  }
 0x6ee   :  { %8268 = vmatpush1.bf16.msra.mxu0 %v11842_v53  ;;  %8366 = vmatpush1.bf16.msra.mxu1 %v11845_v50  ;;  %v11920_v53 = vld [vmem:[#allocation28 + $0x138] sm:$0xff]  }
 0x6ef   :  { %8269 = vmatprep.subr.bf16.mxu0 %v11850_v3  ;;  %8367 = vmatprep.subr.bf16.mxu1 %v11853_v27  ;;  %v11921_v50 = vld [vmem:[#allocation28 + $0x1b8] sm:$0xff]   ;;  %v11922_v3 = vld [vmem:[#allocation28 + $0x40] sm:$0xff]  }
 0x6f0   :  { %v11923_v27 = vld [vmem:[#allocation28 + $0xc0] sm:$0xff]  }
 0x6f2   :  { %8270 = vmatpush1.bf16.msra.mxu0 %v11848_v63  ;;  %8368 = vmatpush1.bf16.msra.mxu1 %v11851_v26 }
 0x6f3   :  { %8271 = vmatprep.subr.bf16.mxu0 %v11856_v42  ;;  %8369 = vmatprep.subr.bf16.mxu1 %v11859_v49 }
 0x6f6   :  { %8272 = vmatpush1.bf16.msra.mxu0 %v11854_v29  ;;  %8370 = vmatpush1.bf16.msra.mxu1 %v11857_v18 }
 0x6f7   :  { %8273 = vmatprep.subr.bf16.mxu0 %v11862_v39  ;;  %8371 = vmatprep.subr.bf16.mxu1 %v11865_v23 }
 0x6fa   :  { %8274 = vmatpush1.bf16.msra.mxu0 %v11860_v25  ;;  %8372 = vmatpush1.bf16.msra.mxu1 %v11863_v46  ;;  %v7540_v25 = vld [vmem:[#allocation23] sm:$0xf] }
 0x6fb   :  { %8275 = vmatprep.subr.bf16.mxu0 %v11868_v54  ;;  %8373 = vmatprep.subr.bf16.mxu1 %v11871_v9  ;;  %v7545_v46 = vrot.slane %v7540_v25, %v13051_v11  ;;  %v8406_v54 = vld [vmem:[#allocation25] sm:$0xf]  ;;  %v7553_v9 = vrot.slane %v7540_v25, %v13054_v51 }
 0x6fe   :  { %8276 = vmatpush1.bf16.msra.mxu0 %v11866_v61  ;;  %8374 = vmatpush1.bf16.msra.mxu1 %v11869_v37  ;;  %v8436_v61 = vld [vmem:[#allocation26] sm:$0xf]  ;;  %v7549_v37 = vrot.slane %v7540_v25, %v13057_v12 }
 0x6ff   :  { %8277 = vmatprep.subr.bf16.mxu0 %v11874_v7  ;;  %8375 = vmatprep.subr.bf16.mxu1 %v11877_v31  ;;  %v7557_v7 = vrot.slane %v7540_v25, %v13060_v1 }
 0x702   :  { %8278 = vmatpush1.bf16.msra.mxu0 %v11872_v24  ;;  %8376 = vmatpush1.bf16.msra.mxu1 %v11875_v5  ;;  %v8411_v24 = vrot.slane %v8406_v54, %v13051_v11 }
 0x703   :  { %8279 = vmatprep.subr.bf16.mxu0 %v11880_v13  ;;  %8377 = vmatprep.subr.bf16.mxu1 %v11883_v57  ;;  %v8419_v13 = vrot.slane %v8406_v54, %v13054_v51 }
 0x706   :  { %8280 = vmatpush1.bf16.msra.mxu0 %v11878_v30  ;;  %8378 = vmatpush1.bf16.msra.mxu1 %v11881_v41  ;;  %v8441_v30 = vrot.slane %v8436_v61, %v13051_v11 }
 0x707   :  { %8281 = vmatprep.subr.bf16.mxu0 %v11886_v36  ;;  %8379 = vmatprep.subr.bf16.mxu1 %v11889_v34  ;;  %v8415_v34 = vrot.slane %v8406_v54, %v13057_v12 }
 0x70a   :  { %8282 = vmatpush1.bf16.msra.mxu0 %v11884_v10  ;;  %8380 = vmatpush1.bf16.msra.mxu1 %v11887_v21  ;;  %v8449_v21 = vrot.slane %v8436_v61, %v13054_v51  ;;  %v8453_v51 = vrot.slane %v8436_v61, %v13060_v1 }
 0x70b   :  { %10256 = vmatprep.subr.bf16.mxu0 %v11890_v4  ;;  %10278 = vmatprep.subr.bf16.mxu1 %v11891_v47 }
 0x70d   :  { %8284 = vmatmul.mubr.bf16.vlgmr.msra.gmra.mrb[80].mxu0 %v13796_v62  ;;  %8382 = vmatmul.mubr.bf16.vlgmr.msra.gmra.mrb[80].mxu1 %v13796_v62  ;;  %v11897_v62 = vld [vmem:[#allocation28 + $0x188] sm:$0xff]  }
 0x70e   :  { %8293 = vmatprep.mubr.bf16.mxu0 %v13828_v45  ;;  %8391 = vmatprep.mubr.bf16.mxu1 %v13828_v45  ;;  %v11898_v45 = vld [vmem:[#allocation28 + $0x150] sm:$0xff]  }
 0x70f   :  { %10257 = vmatpush3.bf16.msra.mxu0 %v11892_v55  ;;  %10279 = vmatpush3.bf16.msra.mxu1 %v11893_v44  ;;  %v8423_v55 = vrot.slane %v8406_v54, %v13060_v1 }
 0x710   :  { %10258 = vmatprep.subr.bf16.mxu0 %v11894_v33  ;;  %10280 = vmatprep.subr.bf16.mxu1 %v11895_v35 }
 0x713   :  { %10259 = vmatpush3.bf16.msra.mxu0 %v11896_v8  ;;  %10281 = vmatpush3.bf16.msra.mxu1 %v11897_v62 }
 0x714   :  { %10260 = vmatprep.subr.bf16.mxu0 %v11898_v45  ;;  %10282 = vmatprep.subr.bf16.mxu1 %v11899_v14 }
 0x715   :  { %8294 = vmatmul.mubr.bf16.gmra.mrb[88].mxu0 %v13826_v32  ;;  %8392 = vmatmul.mubr.bf16.gmra.mrb[88].mxu1 %v13826_v32  ;;  %v11901_v32 = vld [vmem:[#allocation28 + $0x190] sm:$0xff]  }
 0x717   :  { %10261 = vmatpush3.bf16.msra.mxu0 %v11900_v28  ;;  %10283 = vmatpush3.bf16.msra.mxu1 %v11901_v32 }
 0x718   :  { %10262 = vmatprep.subr.bf16.mxu0 %v11902_v20  ;;  %10284 = vmatprep.subr.bf16.mxu1 %v11903_v43 }
 0x71b   :  { %10263 = vmatpush3.bf16.msra.mxu0 %v11904_v17  ;;  %10285 = vmatpush3.bf16.msra.mxu1 %v11905_v48  ;;  %v8445_v17 = vrot.slane %v8436_v61, %v13057_v12 }
 0x71c   :  { %10264 = vmatprep.subr.bf16.mxu0 %v11906_v6  ;;  %10286 = vmatprep.subr.bf16.mxu1 %v11907_v38 }
 0x71f   :  { %10265 = vmatpush3.bf16.msra.mxu0 %v11908_v52  ;;  %10287 = vmatpush3.bf16.msra.mxu1 %v11909_v0 }
 0x720   :  { %10266 = vmatprep.subr.bf16.mxu0 %v11910_v19  ;;  %10288 = vmatprep.subr.bf16.mxu1 %v11911_v15 }
 0x723   :  { %10267 = vmatpush3.bf16.msra.mxu0 %v11912_v22  ;;  %10289 = vmatpush3.bf16.msra.mxu1 %v11913_v60 }
 0x724   :  { %10268 = vmatprep.subr.bf16.mxu0 %v11914_v59  ;;  %10290 = vmatprep.subr.bf16.mxu1 %v11915_v40 }
 0x727   :  { %10269 = vmatpush3.bf16.msra.mxu0 %v11916_v58  ;;  %10291 = vmatpush3.bf16.msra.mxu1 %v11917_v16 }
 0x728   :  { %10270 = vmatprep.subr.bf16.mxu0 %v11918_v56  ;;  %10292 = vmatprep.subr.bf16.mxu1 %v11919_v2 }
 0x72b   :  { %10271 = vmatpush3.bf16.msra.mxu0 %v11920_v53  ;;  %10293 = vmatpush3.bf16.msra.mxu1 %v11921_v50 }
 0x72c   :  { %10300 = vmatprep.subr.bf16.mxu0 %v11922_v3  ;;  %10322 = vmatprep.subr.bf16.mxu1 %v11923_v27 }
 0x7a8   :  { %v8246_v63 = vpop.f32.mrb[84].mxu0  ;;  %v8344_v26 = vpop.f32.mrb[84].mxu1 }
 0x7a9   :  { %v8247_v42 = vpop.f32.mrb[85].mxu0  ;;  %v8345_v49 = vpop.f32.mrb[85].mxu1 }
 0x7aa   :  { %v8248_v29 = vpop.f32.mrb[86].mxu0  ;;  %v8346_v18 = vpop.f32.mrb[86].mxu1 }
 0x7ab   :  { %v8249_v39 = vpop.f32.mrb[87].mxu0  ;;  %v8347_v23 = vpop.f32.mrb[87].mxu1 }
 0x7e0   :  { %v8285_v31 = vpop.f32.mrb[80].mxu0  ;;  %v8383_v5 = vpop.f32.mrb[80].mxu1 }
 0x7e1   :  { %v10376_v57 = vadd.f32 %v8285_v31, %v7545_v46  ;;  %v10380_v41 = vadd.f32 %v8383_v5, %v7553_v9  ;;  %v8287_v36 = vpop.f32.mrb[81].mxu0  ;;  %v8385_v10 = vpop.f32.mrb[81].mxu1 }
 0x7e2   :  { %v10377_v4 = vadd.f32 %v8287_v36, %v7549_v37  ;;  %v10381_v47 = vadd.f32 %v8385_v10, %v7557_v7  ;;  %v8289_v44 = vpop.f32.mrb[82].mxu0  ;;  %v8387_v33 = vpop.f32.mrb[82].mxu1 }
 0x7e3   :  { %v8398_v35 = vmax.f32 %v10376_v57, 0.0  ;;  %v8400_v8 = vmax.f32 %v10380_v41, 0.0  ;;  %v10378_v62 = vadd.f32 %v8289_v44, %v7545_v46  ;;  %v10382_v45 = vadd.f32 %v8387_v33, %v7553_v9  ;;  %v8291_v14 = vpop.f32.mrb[83].mxu0  ;;  %v8389_v28 = vpop.f32.mrb[83].mxu1 }
 0x7e4   :  { %v8399_v11 = vmax.f32 %v10377_v4, 0.0  ;;  %v8401_v32 = vmax.f32 %v10381_v47, 0.0  ;;  %v10379_v20 = vadd.f32 %v8291_v14, %v7549_v37  ;;  %v10383_v43 = vadd.f32 %v8389_v28, %v7557_v7 }
 0x7e5   :  { %v8402_v48 = vmax.f32 %v10378_v62, 0.0  ;;  %v8404_v6 = vmax.f32 %v10382_v45, 0.0  ;;  %v8428_v38 = vmul.f32 %v8411_v24, %v8398_v35  ;;  %v8430_v52 = vmul.f32 %v8419_v13, %v8400_v8 }
 0x7e6   :  { %v8403_v0 = vmax.f32 %v10379_v20, 0.0  ;;  %v8405_v19 = vmax.f32 %v10383_v43, 0.0  ;;  %v8429_v15 = vmul.f32 %v8415_v34, %v8399_v11  ;;  %v8431_v22 = vmul.f32 %v8423_v55, %v8401_v32 }
 0x7e7   :  { %v8432_v60 = vmul.f32 %v8411_v24, %v8402_v48  ;;  %v8434_v59 = vmul.f32 %v8419_v13, %v8404_v6  ;;  %v8458_v1 = vadd.f32 %v8441_v30, %v8428_v38  ;;  %v8460_v3 = vadd.f32 %v8449_v21, %v8430_v52 }
 0x7e8   :  { %v8433_v40 = vmul.f32 %v8415_v34, %v8403_v0  ;;  %v8435_v58 = vmul.f32 %v8423_v55, %v8405_v19  ;;  %v8295_v16 = vpop.f32.mrb[88].mxu0  ;;  %v8393_v56 = vpop.f32.mrb[88].mxu1  ;;  %v8459_v49 = vadd.f32 %v8445_v17, %v8429_v15  ;;  %v8461_v29 = vadd.f32 %v8453_v51, %v8431_v22 }
 0x7e9   :  { %v8462_v2 = vadd.f32 %v8441_v30, %v8432_v60  ;;  %v8464_v53 = vadd.f32 %v8449_v21, %v8434_v59  ;;  %v8296_v12 = vpop.f32.mrb[89].mxu0  ;;  %v8394_v50 = vpop.f32.mrb[89].mxu1 }
 0x7ea   :  { %v8463_v27 = vadd.f32 %v8445_v17, %v8433_v40  ;;  %v8465_v63 = vadd.f32 %v8453_v51, %v8435_v58  ;;  %v8297_v26 = vpop.f32.mrb[90].mxu0  ;;  %v8395_v42 = vpop.f32.mrb[90].mxu1 }
 0x7eb   :  { %v8467_v18 = vsel %vm8466_vm4, %v8462_v2, 0.0  ;;  %v8483_v39 = vsel %vm8466_vm4, %v8464_v53, 0.0  ;;  %v8298_v23 = vpop.f32.mrb[91].mxu0  ;;  %v8396_v25 = vpop.f32.mrb[91].mxu1 }
 0x7ec   :  { %v8468_v46 = vadd.f32 %v8467_v18, %v8458_v1  ;;  %v8484_v54 = vadd.f32 %v8483_v39, %v8460_v3  ;;  %v8475_v9 = vsel %vm8466_vm4, %v8463_v27, 0.0  ;;  %v8491_v61 = vsel %vm8466_vm4, %v8465_v63, 0.0 }
 0x7ed   :  { %v8476_v37 = vadd.f32 %v8475_v9, %v8459_v49  ;;  %v8492_v7 = vadd.f32 %v8491_v61, %v8461_v29 }
 0x7ee   :  { %v8469_v31 = vrot.slane %v8468_v46, 4  ;;  %v8485_v24 = vrot.slane %v8484_v54, 4 }
 0x7ef   :  { %v8477_v5 = vrot.slane %v8476_v37, 4  ;;  %v8493_v13 = vrot.slane %v8492_v7, 4 }
 0x7f0   :  { %v8470_v57 = vadd.f32 %v8469_v31, %v8468_v46  ;;  %v8486_v30 = vadd.f32 %v8485_v24, %v8484_v54 }
 0x7f1   :  { %v8478_v41 = vadd.f32 %v8477_v5, %v8476_v37  ;;  %v8494_v36 = vadd.f32 %v8493_v13, %v8492_v7 }
 0x7f2   :  { %v8471_v34 = vrot.slane %v8470_v57, 2  ;;  %v8487_v10 = vrot.slane %v8486_v30, 2 }
 0x7f3   :  { %v8479_v21 = vrot.slane %v8478_v41, 2  ;;  %v8495_v4 = vrot.slane %v8494_v36, 2 }
 0x7f4   :  { %v8472_v47 = vadd.f32 %v8471_v34, %v8470_v57  ;;  %v8488_v55 = vadd.f32 %v8487_v10, %v8486_v30 }
 0x7f5   :  { %v8480_v44 = vadd.f32 %v8479_v21, %v8478_v41  ;;  %v8496_v33 = vadd.f32 %v8495_v4, %v8494_v36 }
 0x7f6   :  { %v8473_v35 = vrot.slane %v8472_v47, 1  ;;  %v8489_v8 = vrot.slane %v8488_v55, 1 }
 0x7f7   :  { %v8481_v62 = vrot.slane %v8480_v44, 1  ;;  %v8497_v45 = vrot.slane %v8496_v33, 1 }
 0x7f8   :  { %v8474_v14 = vadd.f32 %v8473_v35, %v8472_v47  ;;  %v8490_v28 = vadd.f32 %v8489_v8, %v8488_v55 }
 0x7f9   :  { %v8482_v11 = vadd.f32 %v8481_v62, %v8480_v44  ;;  %v8498_v32 = vadd.f32 %v8497_v45, %v8496_v33  ;;  %v11924_v62 = vld [vmem:[#allocation28] sm:$0xff]  }
 0x7fa   :  { %v13852_v20 = vmul.f32 0.083333336, %v8474_v14  ;;  %v13854_v43 = vmul.f32 0.083333336, %v8490_v28  ;;  %v11925_v45 = vld [vmem:[#allocation28 + $0x80] sm:$0xff]  }
 0x7fb   :  { %v13856_v17 = vmul.f32 0.083333336, %v8482_v11  ;;  %v13858_v51 = vmul.f32 0.083333336, %v8498_v32  ;;  %v11926_v11 = vld [vmem:[#allocation28 + $0x48] sm:$0xff]  }
 0x7fc   :  { %v8503_v48 = vsub.f32 %v8458_v1, %v13852_v20  ;;  %v8507_v6 = vsub.f32 %v8462_v2, %v13852_v20  ;;  %v8505_v38 = vsub.f32 %v8460_v3, %v13854_v43  ;;  %v8509_v52 = vsub.f32 %v8464_v53, %v13854_v43  ;;  %v11927_v32 = vld [vmem:[#allocation28 + $0xc8] sm:$0xff]  }
 0x7fd   :  { %v8504_v0 = vsub.f32 %v8459_v49, %v13856_v17  ;;  %v8508_v19 = vsub.f32 %v8463_v27, %v13856_v17  ;;  %v8506_v15 = vsub.f32 %v8461_v29, %v13858_v51  ;;  %v8510_v22 = vsub.f32 %v8465_v63, %v13858_v51 }
 0x7fe   :  { %v8511_v60 = vmul.f32 %v8503_v48, %v8503_v48  ;;  %v8515_v59 = vmul.f32 %v8507_v6, %v8507_v6  ;;  %v8513_v40 = vmul.f32 %v8505_v38, %v8505_v38  ;;  %v8517_v58 = vmul.f32 %v8509_v52, %v8509_v52  ;;  %v11928_v38 = vld [vmem:[#allocation28 + $0x8] sm:$0xff]  }
 0x7ff   :  { %v8512_v16 = vmul.f32 %v8504_v0, %v8504_v0  ;;  %v8516_v56 = vmul.f32 %v8508_v19, %v8508_v19  ;;  %v8514_v12 = vmul.f32 %v8506_v15, %v8506_v15  ;;  %v8518_v2 = vmul.f32 %v8510_v22, %v8510_v22  ;;  %v11929_v52 = vld [vmem:[#allocation28 + $0x88] sm:$0xff]   ;;  %v11930_v0 = vld [vmem:[#allocation28 + $0x50] sm:$0xff]  }
 0x800   :  { %v8519_v50 = vsel %vm8466_vm4, %v8515_v59, 0.0  ;;  %v8535_v53 = vsel %vm8466_vm4, %v8517_v58, 0.0  ;;  %v8556_v48 = vpack.c.bf16 %v13856_v17, %v13856_v17  ;;  %v8558_v6 = vpack.c.bf16 %v13858_v51, %v13858_v51  ;;  %v11931_v19 = vld [vmem:[#allocation28 + $0xd0] sm:$0xff]   ;;  %v11934_v17 = vld [vmem:[#allocation28 + $0x58] sm:$0xff]   ;;  %v11939_v58 = vld [vmem:[#allocation28 + $0xe0] sm:$0xff]  }
 0x801   :  { %v8520_v1 = vadd.f32 %v8519_v50, %v8511_v60  ;;  %v8536_v3 = vadd.f32 %v8535_v53, %v8513_v40  ;;  %v8527_v27 = vsel %vm8466_vm4, %v8516_v56, 0.0  ;;  %v8543_v26 = vsel %vm8466_vm4, %v8518_v2, 0.0  ;;  %v11932_v15 = vld [vmem:[#allocation28 + $0x10] sm:$0xff]   ;;  %v11935_v60 = vld [vmem:[#allocation28 + $0xd8] sm:$0xff]   ;;  %v11938_v40 = vld [vmem:[#allocation28 + $0x60] sm:$0xff]  }
 0x802   :  { %v8528_v42 = vadd.f32 %v8527_v27, %v8512_v16  ;;  %v8544_v63 = vadd.f32 %v8543_v26, %v8514_v12  ;;  %v11933_v22 = vld [vmem:[#allocation28 + $0x90] sm:$0xff]   ;;  %v11936_v51 = vld [vmem:[#allocation28 + $0x18] sm:$0xff]   ;;  %v11940_v16 = vld [vmem:[#allocation28 + $0x20] sm:$0xff]  }
 0x803   :  { %v8521_v49 = vrot.slane %v8520_v1, 4  ;;  %v8537_v29 = vrot.slane %v8536_v3, 4  ;;  %v11937_v59 = vld [vmem:[#allocation28 + $0x98] sm:$0xff]   ;;  %v11941_v56 = vld [vmem:[#allocation28 + $0xa0] sm:$0xff]   ;;  %v11942_v12 = vld [vmem:[#allocation28 + $0x68] sm:$0xff]  }
 0x804   :  { %v8529_v18 = vrot.slane %v8528_v42, 4  ;;  %v8545_v39 = vrot.slane %v8544_v63, 4  ;;  %v11943_v2 = vld [vmem:[#allocation28 + $0xe8] sm:$0xff]   ;;  %v11948_v27 = vld [vmem:[#allocation28 + $0x30] sm:$0xff]  }
 0x805   :  { %v8522_v23 = vadd.f32 %v8521_v49, %v8520_v1  ;;  %v8538_v25 = vadd.f32 %v8537_v29, %v8536_v3  ;;  %v11944_v50 = vld [vmem:[#allocation28 + $0x28] sm:$0xff]   ;;  %v11946_v1 = vld [vmem:[#allocation28 + $0x70] sm:$0xff]   ;;  %v11952_v49 = vld [vmem:[#allocation28 + $0x38] sm:$0xff]  }
 0x806   :  { %v8530_v46 = vadd.f32 %v8529_v18, %v8528_v42  ;;  %v8546_v54 = vadd.f32 %v8545_v39, %v8544_v63  ;;  %v11945_v53 = vld [vmem:[#allocation28 + $0xa8] sm:$0xff]   ;;  %v11947_v3 = vld [vmem:[#allocation28 + $0xf0] sm:$0xff]   ;;  %v11950_v42 = vld [vmem:[#allocation28 + $0x78] sm:$0xff]   ;;  %v8555_v18 = vpack.c.bf16 %v13852_v20, %v13852_v20  ;;  %v8557_v39 = vpack.c.bf16 %v13854_v43, %v13854_v43 }
 0x807   :  { %v8523_v9 = vrot.slane %v8522_v23, 2  ;;  %v8539_v61 = vrot.slane %v8538_v25, 2  ;;  %v11949_v26 = vld [vmem:[#allocation28 + $0xb0] sm:$0xff]   ;;  %v11951_v63 = vld [vmem:[#allocation28 + $0xf8] sm:$0xff]  }
 0x808   :  { %v8531_v37 = vrot.slane %v8530_v46, 2  ;;  %v8547_v7 = vrot.slane %v8546_v54, 2  ;;  %v11953_v29 = vld [vmem:[#allocation28 + $0xb8] sm:$0xff]  }
 0x809   :  { %v8524_v31 = vadd.f32 %v8523_v9, %v8522_v23  ;;  %v8540_v24 = vadd.f32 %v8539_v61, %v8538_v25 }
 0x80a   :  { %v8532_v5 = vadd.f32 %v8531_v37, %v8530_v46  ;;  %v8548_v13 = vadd.f32 %v8547_v7, %v8546_v54 }
 0x80b   :  { %v8525_v57 = vrot.slane %v8524_v31, 1  ;;  %v8541_v30 = vrot.slane %v8540_v24, 1 }
 0x80c   :  { %v8533_v41 = vrot.slane %v8532_v5, 1  ;;  %v8549_v36 = vrot.slane %v8548_v13, 1 }
 0x80d   :  { %v8526_v34 = vadd.f32 %v8525_v57, %v8524_v31  ;;  %v8542_v10 = vadd.f32 %v8541_v30, %v8540_v24 }
 0x80e   :  { %v8534_v21 = vadd.f32 %v8533_v41, %v8532_v5  ;;  %v8550_v4 = vadd.f32 %v8549_v36, %v8548_v13 }
 0x80f   :  { %v8551_v47 = vmul.f32 0.09090909, %v8526_v34  ;;  %v8553_v55 = vmul.f32 0.09090909, %v8542_v10 }
 0x810   :  { %v8552_v44 = vmul.f32 0.09090909, %v8534_v21  ;;  %v8554_v33 = vmul.f32 0.09090909, %v8550_v4 }
 0x811   :  { %v8623_v14 = vpack.c.bf16 %v8551_v47, %v8551_v47  ;;  %v8625_v28 = vpack.c.bf16 %v8553_v55, %v8553_v55  ;;  %v9235_v47 = vld [vmem:[#allocation29] sm:$0x1] }
 0x812   :  { %v8624_v35 = vpack.c.bf16 %v8552_v44, %v8552_v44  ;;  %v8626_v8 = vpack.c.bf16 %v8554_v33, %v8554_v33 }
 0x814   :  { %8915 = vmatprep.mubr.bf16.mxu0 %v8624_v35  ;;  %8955 = vmatprep.mubr.bf16.mxu1 %v8626_v8 }
 0x815   :  { %8916 = vmatmul.mubr.bf16.vlgmr.msra.gmra.mrb[92].mxu0 %v8623_v14  ;;  %8956 = vmatmul.mubr.bf16.vlgmr.msra.gmra.mrb[92].mxu1 %v8625_v28 }
 0x816   :  { %10301 = vmatpush3.bf16.msra.mxu0 %v11924_v62  ;;  %10323 = vmatpush3.bf16.msra.mxu1 %v11925_v45 }
 0x817   :  { %9187 = vmatprep.mubr.bf16.mxu0 %v8556_v48  ;;  %9227 = vmatprep.mubr.bf16.mxu1 %v8558_v6 }
 0x818   :  { %10302 = vmatprep.subr.bf16.mxu0 %v11926_v11  ;;  %10324 = vmatprep.subr.bf16.mxu1 %v11927_v32 }
 0x81a   :  { %10303 = vmatpush3.bf16.msra.mxu0 %v11928_v38  ;;  %10325 = vmatpush3.bf16.msra.mxu1 %v11929_v52 }
 0x81b   :  { %10304 = vmatprep.subr.bf16.mxu0 %v11930_v0  ;;  %10326 = vmatprep.subr.bf16.mxu1 %v11931_v19 }
 0x81e   :  { %10305 = vmatpush3.bf16.msra.mxu0 %v11932_v15  ;;  %10327 = vmatpush3.bf16.msra.mxu1 %v11933_v22 }
 0x81f   :  { %10306 = vmatprep.subr.bf16.mxu0 %v11934_v17  ;;  %10328 = vmatprep.subr.bf16.mxu1 %v11935_v60 }
 0x822   :  { %10307 = vmatpush3.bf16.msra.mxu0 %v11936_v51  ;;  %10329 = vmatpush3.bf16.msra.mxu1 %v11937_v59 }
 0x823   :  { %10308 = vmatprep.subr.bf16.mxu0 %v11938_v40  ;;  %10330 = vmatprep.subr.bf16.mxu1 %v11939_v58 }
 0x826   :  { %10309 = vmatpush3.bf16.msra.mxu0 %v11940_v16  ;;  %10331 = vmatpush3.bf16.msra.mxu1 %v11941_v56 }
 0x827   :  { %10310 = vmatprep.subr.bf16.mxu0 %v11942_v12  ;;  %10332 = vmatprep.subr.bf16.mxu1 %v11943_v2 }
 0x82a   :  { %10311 = vmatpush3.bf16.msra.mxu0 %v11944_v50  ;;  %10333 = vmatpush3.bf16.msra.mxu1 %v11945_v53 }
 0x82b   :  { %10312 = vmatprep.subr.bf16.mxu0 %v11946_v1  ;;  %10334 = vmatprep.subr.bf16.mxu1 %v11947_v3 }
 0x82e   :  { %10313 = vmatpush3.bf16.msra.mxu0 %v11948_v27  ;;  %10335 = vmatpush3.bf16.msra.mxu1 %v11949_v26 }
 0x82f   :  { %10314 = vmatprep.subr.bf16.mxu0 %v11950_v42  ;;  %10336 = vmatprep.subr.bf16.mxu1 %v11951_v63 }
 0x832   :  { %10315 = vmatpush3.bf16.msra.mxu0 %v11952_v49  ;;  %10337 = vmatpush3.bf16.msra.mxu1 %v11953_v29 }
 0x835   :  { %9188 = vmatmul.mubr.bf16.vlgmr.msra.gmra.mrb[96].mxu0 %v8555_v18  ;;  %9228 = vmatmul.mubr.bf16.vlgmr.msra.gmra.mrb[96].mxu1 %v8557_v39 }
 0x8e8   :  { %v10272_v23 = vpop.f32.mrb[92].mxu0  ;;  %v10294_v25 = vpop.f32.mrb[92].mxu1 }
 0x8e9   :  { %v10273_v46 = vpop.f32.mrb[93].mxu0  ;;  %v10295_v54 = vpop.f32.mrb[93].mxu1 }
 0x8ea   :  { %v10274_v9 = vadd.f32 %v10273_v46, %v10272_v23  ;;  %v10296_v61 = vadd.f32 %v10295_v54, %v10294_v25  ;;  %v10275_v37 = vpop.f32.mrb[94].mxu0  ;;  %v10297_v7 = vpop.f32.mrb[94].mxu1 }
 0x8eb   :  { %v10276_v31 = vpop.f32.mrb[95].mxu0  ;;  %v10298_v24 = vpop.f32.mrb[95].mxu1 }
 0x8ec   :  { %v8958_v5 = vadd.f32 %v10296_v61, %v10274_v9 }
 0x908   :  { %v10316_v13 = vpop.f32.mrb[96].mxu0  ;;  %v10338_v57 = vpop.f32.mrb[96].mxu1 }
 0x909   :  { %v10317_v30 = vpop.f32.mrb[97].mxu0  ;;  %v10339_v20 = vpop.f32.mrb[97].mxu1 }
 0x90a   :  { %v10318_v41 = vadd.f32 %v10317_v30, %v10316_v13  ;;  %v10340_v36 = vadd.f32 %v10339_v20, %v10338_v57  ;;  %v10319_v43 = vpop.f32.mrb[98].mxu0  ;;  %v10341_v34 = vpop.f32.mrb[98].mxu1 }
 0x90b   :  { %v10320_v10 = vpop.f32.mrb[99].mxu0  ;;  %v10342_v21 = vpop.f32.mrb[99].mxu1 }
 0x90c   :  { %v9190_v4 = vadd.f32 %v10318_v41, %v8958_v5 }
 0x90e   :  { %v9230_v55 = vadd.f32 %v10340_v36, %v9190_v4 }
 0x910   :  { %v9236_v44 = vadd.f32 %v9235_v47, %v9230_v55 }
 0x912   :  { %9237 = vst [vmem:[#allocation31] sm:$0x1] %v9236_v44 }
 0x913   :  { %12363 = shalt.err (!%p12360_p8)
}
 0x914   :  { %s12364_s2 = scalar_lea.hbm %s13911_s19, 16 }
 0x915   :  { %p12365_p9 = scmp.ne.s32.totalorder %s13911_s19, %s12364_s2  ;;  %p12368_p10 = scmp.lt.u32.totalorder %s12364_s2, %s13911_s19 }
 0x917   :  { %p12370_p11 = pnand %p12368_p10, %p12365_p9 }
 0x919   :  { %12373 = shalt.err (!%p12370_p11)
}
 0x91a   :  { %9247 = dma.vmem_to_hbm [thread:$0]  %s9245_s23, 16, %s13911_s19, [#allocation4]  }
 0x91b   :  { %12394 = dma.done.wait [#allocation4], 16  }
 0x91c   :  { %12395 = vsyncadd [#allocation4], 4294967280 }
 0x91d   :  { %9251 = vsyncpa [#allocation3], 1 }
 0x91e   :  { %9252 = vsyncpa [#allocation6], 1 }
 0x91f   :  { %9253 = vsyncpa [#allocation9], 1 }
 0x920   :  { %9254 = vsyncpa [#allocation12], 1 }
 0x921   :  { %9255 = vsyncpa [#allocation15], 1 }
 0x922   :  { %9256 = vsyncpa [#allocation18], 1 }
 0x923   :  { %9257 = vsyncpa [#allocation21], 1 }
 0x924   :  { %9258 = vsyncpa [#allocation24], 1 }
 0x925   :  { %9259 = vsyncpa [#allocation27], 1 }
 0x926   :  { %9260 = vsyncpa [#allocation30], 1 }
 0x927   :  { %9261 = vsyncpa [#allocation4], 1 }

</bundles_post_ra>
